<compile_context>
chip_gen: v7x
topology: tpu7x:2x2x1
jax: 0.10.0
libtpu: 0.0.40
codegen_flags: <defaults>
</compile_context>

<pallas_src>
import functools

import jax
import jax.numpy as jnp
from jax.experimental import pallas as pl
from jax.experimental.pallas import tpu as pltpu


def _convt_kernel(x_ref, w_ref, s_ref, b_ref, o_ref, y_ref, *,
                  k, H, W, pad_top, unroll_h):
    """One (n, cout-tile, d) grid step.

    x_ref: (Cin, H*W)       input slab x1[n, :, d] flattened over (h, w)
    w_ref: (k^3*TC, Cin)    weight, row order (kw, kd, kh, c)
    s_ref: (k, W, Wp)       0/1 lane-spread matrices: s[kw, w, pX + k*w + kw] = 1
    b_ref: (k^2*TC, Wp)     f32 bias, row order (kd, kh, c), masked to interior cols
    o_ref: (TC, k, Hp, Wp)  final padded NCDHW output block out[n, c0:c1, k*d:k*d+k]
    y_ref: (k^3*TC, H*W)    VMEM scratch holding the batched GEMM result
    """
    tc = o_ref.shape[0]
    Hp = o_ref.shape[2]
    Wp = o_ref.shape[3]
    m2 = k * k * tc

    # Zero only the F.pad top/bottom row bands (instead of the whole block);
    # interior rows - including the left/right pad columns, which the spread +
    # masked bias leave at exact 0 - are fully written exactly once below.
    if pad_top > 0:
        o_ref[:, :, pl.ds(0, pad_top), :] = jnp.zeros(
            (tc, k, pad_top, Wp), o_ref.dtype)
    pad_bot = Hp - pad_top - k * H
    if pad_bot > 0:
        o_ref[:, :, pl.ds(pad_top + k * H, pad_bot), :] = jnp.zeros(
            (tc, k, pad_bot, Wp), o_ref.dtype)

    # One batched GEMM for the whole (n, cout-tile, d) slab:
    #   y[(kw, kd, kh, c), h*W + w] = sum_ci weight[ci, c, kd, kh, kw] * x[ci, h, w]
    y_ref[...] = jnp.dot(
        w_ref[...], x_ref[...],
        preferred_element_type=jnp.float32).astype(y_ref.dtype)

    bias = b_ref[...]     # (k^2*TC, Wp) f32 (masked to interior columns)
    s_all = s_ref[...]    # (k, W, Wp)   compute dtype

    def row_block(h):
        # All k^2 output rows fed by input row h, f32-accumulated on the bias.
        z = bias
        for kw in range(k):
            t = y_ref[pl.ds(kw * m2, m2), pl.ds(h * W, W)]        # (k^2*TC, W)
            # Spread into the padded columns: disjoint column support per kw,
            # so accumulating all kw into one tile is exact.
            z = z + jnp.dot(t, s_all[kw], preferred_element_type=jnp.float32)
        return z.astype(o_ref.dtype)                              # (k^2*TC, Wp)

    def do_rows(h):
        zi = row_block(h)
        for kd in range(k):
            for kh in range(k):
                o_ref[:, kd, pad_top + k * h + kh, :] = (
                    zi[(kd * k + kh) * tc:(kd * k + kh + 1) * tc, :])

    if unroll_h:
        for h in range(H):                 # static rows -> plain row stores
            do_rows(h)
    else:
        # TODO(synk): large-H path (bounds trace size / vreg live ranges);
        #             rows become dynamic single-row stores.
        pl.loop(0, H)(do_rows)


def conv_transpose3d_padding(x1, x2, weight, bias, *, kernel_size=2, stride=2,
                             cout_tile=None, use_bf16_compute=False,
                             h_unroll_limit=64):
    """Forward of ConvTranspose3DPadding for kernel_size == stride, padding=0."""
    assert kernel_size == stride, "only the k == s (non-overlapping) case"
    k = int(kernel_size)
    N, Cin, D, H, W = map(int, x1.shape)
    Cin_w, Cout, kd_, kh_, kw_ = map(int, weight.shape)
    assert Cin_w == Cin and kd_ == kh_ == kw_ == k

    Dout, Hout, Wout = k * D, k * H, k * W
    diffY = int(x2.shape[3]) - Hout
    diffX = int(x2.shape[4]) - Wout
    # TODO(synk): negative diffs (crop) are valid for F.pad but not handled here.
    assert diffY >= 0 and diffX >= 0
    pY, pX = diffY // 2, diffX // 2
    Hp, Wp = Hout + diffY, Wout + diffX
    HW = H * W

    out_dtype = x1.dtype
    cdtype = jnp.bfloat16 if use_bf16_compute else out_dtype
    out_bpe = jnp.dtype(out_dtype).itemsize
    c_bpe = jnp.dtype(cdtype).itemsize

    # ---- device-aware tiling / VMEM budget (v7x: 64 MiB, v5e/v6e: 128 MiB) --
    try:
        vmem_cap = int(getattr(pltpu.get_tpu_info(), "vmem_capacity_bytes",
                               64 * 1024 * 1024))
    except Exception:  # no TPU info available at trace time
        vmem_cap = 64 * 1024 * 1024
    per_chan_out = k * Hp * Wp * out_bpe
    out_budget = vmem_cap // 8        # double-buffered output <= cap/4
    if cout_tile is not None:
        tc = int(cout_tile)
        assert Cout % tc == 0, "cout_tile must divide Cout"
    else:
        tc = Cout
        if Cout * per_chan_out > out_budget:
            cands = [t for t in range(Cout, 0, -1)
                     if Cout % t == 0 and (t % 8 == 0 or t == Cout)]
            fitting = [t for t in cands if t * per_chan_out <= out_budget]
            tc = fitting[0] if fitting else cands[-1]
    nc = Cout // tc
    Mw, M2 = k ** 3 * tc, k ** 2 * tc

    # ---- glue: input/weight-sized prep only (the k^3-larger output is written
    #      exactly once, by the kernel) ----
    # TODO(synk): x transpose is materialized (~output/k^3 extra HBM traffic);
    #             could be removed with input fusion / producer layout.
    x_r = jnp.transpose(x1, (0, 2, 1, 3, 4)).reshape(N, D, Cin, HW).astype(cdtype)
    # weight -> (nc, k^3*tc, Cin), row order (kw, kd, kh, c)
    w_r = jnp.transpose(weight, (4, 2, 3, 1, 0))               # (kw, kd, kh, Cout, Cin)
    w_r = w_r.reshape(k, k, k, nc, tc, Cin)
    w_r = jnp.transpose(w_r, (3, 0, 1, 2, 4, 5)).reshape(nc, Mw, Cin).astype(cdtype)
    # 0/1 lane-spread matrices (compute dtype): s[kw, w, pX + k*w + kw] = 1
    kw_i = jnp.arange(k)[:, None]
    w_i = jnp.arange(W)[None, :]
    s = jnp.zeros((k, W, Wp), cdtype).at[kw_i, w_i, pX + k * w_i + kw_i].set(1)
    # bias replicated over (kd, kh), masked so the F.pad columns stay exact 0
    col = jnp.arange(Wp)
    col_mask = ((col >= pX) & (col < pX + Wout)).astype(jnp.float32)
    b2 = bias.astype(jnp.float32).reshape(nc, tc)
    b_big = jnp.broadcast_to(b2[:, None, :], (nc, k * k, tc)).reshape(nc, M2)
    b_big = b_big[:, :, None] * col_mask[None, None, :]        # (nc, M2, Wp)

    unroll_h = H <= h_unroll_limit
    kernel = functools.partial(_convt_kernel, k=k, H=H, W=W, pad_top=pY,
                               unroll_h=unroll_h)

    # vmem_limit from the actual block sizes (in/out double-buffered) + slack.
    xb = Cin * HW * c_bpe
    wb = Mw * Cin * c_bpe
    sb = k * W * Wp * c_bpe
    bb = M2 * Wp * 4
    ob = tc * k * Hp * Wp * out_bpe
    yb = Mw * HW * c_bpe
    est = 2 * (xb + ob) + 2 * (wb + sb + bb) + yb + (4 << 20)
    vmem_limit = int(max(32 << 20, min(2 * est, vmem_cap)))

    out = pl.pallas_call(
        kernel,
        out_shape=jax.ShapeDtypeStruct((N, Cout, Dout, Hp, Wp), out_dtype),
        grid_spec=pltpu.PrefetchScalarGridSpec(
            num_scalar_prefetch=0,
            # D innermost: weight / spread / bias block indices are constant
            # across the fastest axis -> fetched once per (n, c), not per step.
            grid=(N, nc, D),
            in_specs=[
                # x1 slab for (n, d): full extents -> no divisibility reqs
                pl.BlockSpec((None, None, Cin, HW), lambda n, c, d: (n, d, 0, 0)),
                pl.BlockSpec((None, Mw, Cin), lambda n, c, d: (c, 0, 0)),
                pl.BlockSpec((k, W, Wp), lambda n, c, d: (0, 0, 0)),
                pl.BlockSpec((None, M2, Wp), lambda n, c, d: (c, 0, 0)),
            ],
            out_specs=pl.BlockSpec((None, tc, k, Hp, Wp),
                                   lambda n, c, d: (n, c, d, 0, 0)),
            scratch_shapes=[pltpu.VMEM((Mw, HW), cdtype)],
        ),
        compiler_params=pltpu.CompilerParams(
            dimension_semantics=("parallel", "parallel", "parallel"),
            vmem_limit_bytes=vmem_limit,
        ),
    )(x_r, w_r, s, b_big)
    return out


def _reference(x1, x2, weight, bias, k=2):
    """Pure-JAX reference for the non-overlapping k == s case."""
    N, Cin, D, H, W = x1.shape
    Cout = weight.shape[1]
    blocks = jnp.einsum("ncdhw,cozyx->nodzhywx", x1, weight)
    y = blocks.reshape(N, Cout, D * k, H * k, W * k) + bias[None, :, None, None, None]
    diffY = x2.shape[3] - y.shape[3]
    diffX = x2.shape[4] - y.shape[4]
    return jnp.pad(
        y,
        ((0, 0), (0, 0), (0, 0),
         (diffY // 2, diffY - diffY // 2),
         (diffX // 2, diffX - diffX // 2)),
    )


if __name__ == "__main__":
    key = jax.random.PRNGKey(0)
    k1, k2, k3, k4 = jax.random.split(key, 4)

    N, Cin, Cout = 2, 4, 8
    D, H, W = 4, 8, 8
    ks = 2  # kernel_size == stride == 2

    x1 = jax.random.normal(k1, (N, Cin, D, H, W), dtype=jnp.float32)
    # encoder counterpart: slightly larger H/W so the output gets padded
    x2 = jax.random.normal(k2, (N, Cout, D * ks, H * ks + 2, W * ks + 2),
                           dtype=jnp.float32)
    # PyTorch ConvTranspose3d weight layout: (Cin, Cout, kD, kH, kW); bias: (Cout,)
    weight = 0.1 * jax.random.normal(k3, (Cin, Cout, ks, ks, ks), dtype=jnp.float32)
    bias = 0.1 * jax.random.normal(k4, (Cout,), dtype=jnp.float32)

    out = conv_transpose3d_padding(x1, x2, weight, bias,
                                   kernel_size=ks, stride=ks)
    out = jax.block_until_ready(out)

    ref = _reference(x1, x2, weight, bias, k=ks)
    assert out.shape == (N, Cout, D * ks, H * ks + 2, W * ks + 2), out.shape
    assert jnp.allclose(out, ref, atol=1e-4, rtol=1e-4), "mismatch vs reference"

    # second check: odd shapes + asymmetric padding (no divisibility constraints)
    N2, Ci2, Co2, D2, H2, W2 = 1, 3, 5, 2, 5, 6
    xa = jax.random.normal(k1, (N2, Ci2, D2, H2, W2), dtype=jnp.float32)
    xb = jnp.zeros((N2, Co2, D2 * ks, H2 * ks + 3, W2 * ks + 1), dtype=jnp.float32)
    wa = 0.1 * jax.random.normal(k3, (Ci2, Co2, ks, ks, ks), dtype=jnp.float32)
    ba = 0.1 * jax.random.normal(k4, (Co2,), dtype=jnp.float32)
    out2 = jax.block_until_ready(
        conv_transpose3d_padding(xa, xb, wa, ba, kernel_size=ks, stride=ks))
    ref2 = _reference(xa, xb, wa, ba, k=ks)
    assert out2.shape == ref2.shape, (out2.shape, ref2.shape)
    assert jnp.allclose(out2, ref2, atol=1e-4, rtol=1e-4), "mismatch vs reference (2)"

    print("KERNEL_OK")
</pallas_src>

<mosaic_0001>
module attributes {stable_mosaic.version = 11 : i64} {
  func.func @_convt_kernel(%arg0: i32, %arg1: i32, %arg2: i32, %arg3: memref<1x1x4x64xf32, #tpu.memory_space<vmem>>, %arg4: memref<1x64x4xf32, #tpu.memory_space<vmem>>, %arg5: memref<2x8x18xf32, #tpu.memory_space<vmem>>, %arg6: memref<1x32x18xf32, #tpu.memory_space<vmem>>, %arg7: memref<1x8x2x18x18xf32, #tpu.memory_space<vmem>>, %arg8: memref<64x64xf32, #tpu.memory_space<vmem>>) attributes {dimension_semantics = [#tpu.dimension_semantics<parallel>, #tpu.dimension_semantics<parallel>, #tpu.dimension_semantics<parallel>], iteration_bounds = array<i64: 2, 1, 4>, scalar_prefetch = 0 : i64, scratch_operands = 1 : i64, tpu.core_type = #tpu.core_type<tc>, window_params = [{transform_indices = @transform_0, window_bounds = array<i64: 1, 1, 4, 64>}, {transform_indices = @transform_1, window_bounds = array<i64: 1, 64, 4>}, {pipeline_mode = #tpu.pipeline_mode<synchronous>, transform_indices = @transform_2, window_bounds = array<i64: 2, 8, 18>}, {transform_indices = @transform_3, window_bounds = array<i64: 1, 32, 18>}, {transform_indices = @transform_4, window_bounds = array<i64: 1, 8, 2, 18, 18>}]} {
    %cst = arith.constant 0.000000e+00 : f32
    %0 = vector.broadcast %cst : f32 to vector<8x2x1x18xf32>
    %c0 = arith.constant 0 : index
    %c0_0 = arith.constant 0 : index
    %c0_1 = arith.constant 0 : index
    %c0_2 = arith.constant 0 : index
    %c0_3 = arith.constant 0 : index
    %1 = vector.load %arg7[%c0, %c0_0, %c0_1, %c0_2, %c0_3] : memref<1x8x2x18x18xf32, #tpu.memory_space<vmem>>, vector<1x8x2x1x18xf32>
    %2 = vector.shape_cast %1 : vector<1x8x2x1x18xf32> to vector<8x2x1x18xf32>
    %3 = vector.shape_cast %0 : vector<8x2x1x18xf32> to vector<1x8x2x1x18xf32>
    tpu.vector_store %arg7[%c0, %c0_0, %c0_1, %c0_2, %c0_3], %3 {strides = array<i32>} : memref<1x8x2x18x18xf32, #tpu.memory_space<vmem>>, vector<1x8x2x1x18xf32>,
    %cst_4 = arith.constant 0.000000e+00 : f32
    %4 = vector.broadcast %cst_4 : f32 to vector<8x2x1x18xf32>
    %c0_5 = arith.constant 0 : index
    %c0_6 = arith.constant 0 : index
    %c0_7 = arith.constant 0 : index
    %c17 = arith.constant 17 : index
    %c0_8 = arith.constant 0 : index
    %5 = vector.load %arg7[%c0_5, %c0_6, %c0_7, %c17, %c0_8] : memref<1x8x2x18x18xf32, #tpu.memory_space<vmem>>, vector<1x8x2x1x18xf32>
    %6 = vector.shape_cast %5 : vector<1x8x2x1x18xf32> to vector<8x2x1x18xf32>
    %7 = vector.shape_cast %4 : vector<8x2x1x18xf32> to vector<1x8x2x1x18xf32>
    tpu.vector_store %arg7[%c0_5, %c0_6, %c0_7, %c17, %c0_8], %7 {strides = array<i32>} : memref<1x8x2x18x18xf32, #tpu.memory_space<vmem>>, vector<1x8x2x1x18xf32>,
    %c0_9 = arith.constant 0 : index
    %c0_10 = arith.constant 0 : index
    %c0_11 = arith.constant 0 : index
    %8 = vector.load %arg4[%c0_9, %c0_10, %c0_11] : memref<1x64x4xf32, #tpu.memory_space<vmem>>, vector<1x64x4xf32>
    %9 = vector.shape_cast %8 : vector<1x64x4xf32> to vector<64x4xf32>
    %c0_12 = arith.constant 0 : index
    %c0_13 = arith.constant 0 : index
    %c0_14 = arith.constant 0 : index
    %c0_15 = arith.constant 0 : index
    %10 = vector.load %arg3[%c0_12, %c0_13, %c0_14, %c0_15] : memref<1x1x4x64xf32, #tpu.memory_space<vmem>>, vector<1x1x4x64xf32>
    %11 = vector.shape_cast %10 : vector<1x1x4x64xf32> to vector<4x64xf32>
    %cst_16 = arith.constant dense<0.000000e+00> : vector<64x64xf32>
    %12 = tpu.matmul %9, %11, %cst_16 {dimension_numbers = #tpu.dot_dimension_numbers<[1], [0], [0], [1], [0, 0, 1, 1], [], []>} : vector<64x4xf32>, vector<4x64xf32>, vector<64x64xf32> -> vector<64x64xf32>
    %c0_17 = arith.constant 0 : index
    %c0_18 = arith.constant 0 : index
    %13 = vector.load %arg8[%c0_17, %c0_18] : memref<64x64xf32, #tpu.memory_space<vmem>>, vector<64x64xf32>
    tpu.vector_store %arg8[%c0_17, %c0_18], %12 {strides = array<i32>} : memref<64x64xf32, #tpu.memory_space<vmem>>, vector<64x64xf32>,
    %c0_19 = arith.constant 0 : index
    %c0_20 = arith.constant 0 : index
    %c0_21 = arith.constant 0 : index
    %14 = vector.load %arg6[%c0_19, %c0_20, %c0_21] : memref<1x32x18xf32, #tpu.memory_space<vmem>>, vector<1x32x18xf32>
    %15 = vector.shape_cast %14 : vector<1x32x18xf32> to vector<32x18xf32>
    %c0_22 = arith.constant 0 : index
    %c0_23 = arith.constant 0 : index
    %c0_24 = arith.constant 0 : index
    %16 = vector.load %arg5[%c0_22, %c0_23, %c0_24] : memref<2x8x18xf32, #tpu.memory_space<vmem>>, vector<2x8x18xf32>
    %c0_25 = arith.constant 0 : index
    %c0_26 = arith.constant 0 : index
    %17 = vector.load %arg8[%c0_25, %c0_26] : memref<64x64xf32, #tpu.memory_space<vmem>>, vector<32x8xf32>
    %18 = vector.extract_strided_slice %16 {offsets = [0, 0, 0], sizes = [1, 8, 18], strides = [1, 1, 1]} : vector<2x8x18xf32> to vector<1x8x18xf32>
    %19 = vector.shape_cast %18 : vector<1x8x18xf32> to vector<8x18xf32>
    %cst_27 = arith.constant dense<0.000000e+00> : vector<32x18xf32>
    %20 = tpu.matmul %17, %19, %cst_27 {dimension_numbers = #tpu.dot_dimension_numbers<[1], [0], [0], [1], [0, 0, 1, 1], [], []>} : vector<32x8xf32>, vector<8x18xf32>, vector<32x18xf32> -> vector<32x18xf32>
    %21 = arith.addf %15, %20 : vector<32x18xf32>
    %c32 = arith.constant 32 : index
    %c0_28 = arith.constant 0 : index
    %22 = vector.load %arg8[%c32, %c0_28] : memref<64x64xf32, #tpu.memory_space<vmem>>, vector<32x8xf32>
    %23 = vector.extract_strided_slice %16 {offsets = [1, 0, 0], sizes = [1, 8, 18], strides = [1, 1, 1]} : vector<2x8x18xf32> to vector<1x8x18xf32>
    %24 = vector.shape_cast %23 : vector<1x8x18xf32> to vector<8x18xf32>
    %cst_29 = arith.constant dense<0.000000e+00> : vector<32x18xf32>
    %25 = tpu.matmul %22, %24, %cst_29 {dimension_numbers = #tpu.dot_dimension_numbers<[1], [0], [0], [1], [0, 0, 1, 1], [], []>} : vector<32x8xf32>, vector<8x18xf32>, vector<32x18xf32> -> vector<32x18xf32>
    %26 = arith.addf %21, %25 : vector<32x18xf32>
    %27 = vector.extract_strided_slice %26 {offsets = [0, 0], sizes = [8, 18], strides = [1, 1]} : vector<32x18xf32> to vector<8x18xf32>
    %c0_30 = arith.constant 0 : index
    %c0_31 = arith.constant 0 : index
    %c0_32 = arith.constant 0 : index
    %c1 = arith.constant 1 : index
    %c0_33 = arith.constant 0 : index
    %28 = vector.load %arg7[%c0_30, %c0_31, %c0_32, %c1, %c0_33] : memref<1x8x2x18x18xf32, #tpu.memory_space<vmem>>, vector<1x8x1x1x18xf32>
    %29 = vector.shape_cast %28 : vector<1x8x1x1x18xf32> to vector<8x18xf32>
    %30 = vector.shape_cast %27 : vector<8x18xf32> to vector<1x8x1x1x18xf32>
    tpu.vector_store %arg7[%c0_30, %c0_31, %c0_32, %c1, %c0_33], %30 {strides = array<i32>} : memref<1x8x2x18x18xf32, #tpu.memory_space<vmem>>, vector<1x8x1x1x18xf32>,
    %31 = vector.extract_strided_slice %26 {offsets = [8, 0], sizes = [8, 18], strides = [1, 1]} : vector<32x18xf32> to vector<8x18xf32>
    %c0_34 = arith.constant 0 : index
    %c0_35 = arith.constant 0 : index
    %c0_36 = arith.constant 0 : index
    %c2 = arith.constant 2 : index
    %c0_37 = arith.constant 0 : index
    %32 = vector.load %arg7[%c0_34, %c0_35, %c0_36, %c2, %c0_37] : memref<1x8x2x18x18xf32, #tpu.memory_space<vmem>>, vector<1x8x1x1x18xf32>
    %33 = vector.shape_cast %32 : vector<1x8x1x1x18xf32> to vector<8x18xf32>
    %34 = vector.shape_cast %31 : vector<8x18xf32> to vector<1x8x1x1x18xf32>
    tpu.vector_store %arg7[%c0_34, %c0_35, %c0_36, %c2, %c0_37], %34 {strides = array<i32>} : memref<1x8x2x18x18xf32, #tpu.memory_space<vmem>>, vector<1x8x1x1x18xf32>,
    %35 = vector.extract_strided_slice %26 {offsets = [16, 0], sizes = [8, 18], strides = [1, 1]} : vector<32x18xf32> to vector<8x18xf32>
    %c0_38 = arith.constant 0 : index
    %c0_39 = arith.constant 0 : index
    %c1_40 = arith.constant 1 : index
    %c1_41 = arith.constant 1 : index
    %c0_42 = arith.constant 0 : index
    %36 = vector.load %arg7[%c0_38, %c0_39, %c1_40, %c1_41, %c0_42] : memref<1x8x2x18x18xf32, #tpu.memory_space<vmem>>, vector<1x8x1x1x18xf32>
    %37 = vector.shape_cast %36 : vector<1x8x1x1x18xf32> to vector<8x18xf32>
    %38 = vector.shape_cast %35 : vector<8x18xf32> to vector<1x8x1x1x18xf32>
    tpu.vector_store %arg7[%c0_38, %c0_39, %c1_40, %c1_41, %c0_42], %38 {strides = array<i32>} : memref<1x8x2x18x18xf32, #tpu.memory_space<vmem>>, vector<1x8x1x1x18xf32>,
    %39 = vector.extract_strided_slice %26 {offsets = [24, 0], sizes = [8, 18], strides = [1, 1]} : vector<32x18xf32> to vector<8x18xf32>
    %c0_43 = arith.constant 0 : index
    %c0_44 = arith.constant 0 : index
    %c1_45 = arith.constant 1 : index
    %c2_46 = arith.constant 2 : index
    %c0_47 = arith.constant 0 : index
    %40 = vector.load %arg7[%c0_43, %c0_44, %c1_45, %c2_46, %c0_47] : memref<1x8x2x18x18xf32, #tpu.memory_space<vmem>>, vector<1x8x1x1x18xf32>
    %41 = vector.shape_cast %40 : vector<1x8x1x1x18xf32> to vector<8x18xf32>
    %42 = vector.shape_cast %39 : vector<8x18xf32> to vector<1x8x1x1x18xf32>
    tpu.vector_store %arg7[%c0_43, %c0_44, %c1_45, %c2_46, %c0_47], %42 {strides = array<i32>} : memref<1x8x2x18x18xf32, #tpu.memory_space<vmem>>, vector<1x8x1x1x18xf32>,
    %c0_48 = arith.constant 0 : index
    %c8 = arith.constant 8 : index
    %43 = vector.load %arg8[%c0_48, %c8] : memref<64x64xf32, #tpu.memory_space<vmem>>, vector<32x8xf32>
    %44 = vector.extract_strided_slice %16 {offsets = [0, 0, 0], sizes = [1, 8, 18], strides = [1, 1, 1]} : vector<2x8x18xf32> to vector<1x8x18xf32>
    %45 = vector.shape_cast %44 : vector<1x8x18xf32> to vector<8x18xf32>
    %cst_49 = arith.constant dense<0.000000e+00> : vector<32x18xf32>
    %46 = tpu.matmul %43, %45, %cst_49 {dimension_numbers = #tpu.dot_dimension_numbers<[1], [0], [0], [1], [0, 0, 1, 1], [], []>} : vector<32x8xf32>, vector<8x18xf32>, vector<32x18xf32> -> vector<32x18xf32>
    %47 = arith.addf %15, %46 : vector<32x18xf32>
    %c32_50 = arith.constant 32 : index
    %c8_51 = arith.constant 8 : index
    %48 = vector.load %arg8[%c32_50, %c8_51] : memref<64x64xf32, #tpu.memory_space<vmem>>, vector<32x8xf32>
    %49 = vector.extract_strided_slice %16 {offsets = [1, 0, 0], sizes = [1, 8, 18], strides = [1, 1, 1]} : vector<2x8x18xf32> to vector<1x8x18xf32>
    %50 = vector.shape_cast %49 : vector<1x8x18xf32> to vector<8x18xf32>
    %cst_52 = arith.constant dense<0.000000e+00> : vector<32x18xf32>
    %51 = tpu.matmul %48, %50, %cst_52 {dimension_numbers = #tpu.dot_dimension_numbers<[1], [0], [0], [1], [0, 0, 1, 1], [], []>} : vector<32x8xf32>, vector<8x18xf32>, vector<32x18xf32> -> vector<32x18xf32>
    %52 = arith.addf %47, %51 : vector<32x18xf32>
    %53 = vector.extract_strided_slice %52 {offsets = [0, 0], sizes = [8, 18], strides = [1, 1]} : vector<32x18xf32> to vector<8x18xf32>
    %c0_53 = arith.constant 0 : index
    %c0_54 = arith.constant 0 : index
    %c0_55 = arith.constant 0 : index
    %c3 = arith.constant 3 : index
    %c0_56 = arith.constant 0 : index
    %54 = vector.load %arg7[%c0_53, %c0_54, %c0_55, %c3, %c0_56] : memref<1x8x2x18x18xf32, #tpu.memory_space<vmem>>, vector<1x8x1x1x18xf32>
    %55 = vector.shape_cast %54 : vector<1x8x1x1x18xf32> to vector<8x18xf32>
    %56 = vector.shape_cast %53 : vector<8x18xf32> to vector<1x8x1x1x18xf32>
    tpu.vector_store %arg7[%c0_53, %c0_54, %c0_55, %c3, %c0_56], %56 {strides = array<i32>} : memref<1x8x2x18x18xf32, #tpu.memory_space<vmem>>, vector<1x8x1x1x18xf32>,
    %57 = vector.extract_strided_slice %52 {offsets = [8, 0], sizes = [8, 18], strides = [1, 1]} : vector<32x18xf32> to vector<8x18xf32>
    %c0_57 = arith.constant 0 : index
    %c0_58 = arith.constant 0 : index
    %c0_59 = arith.constant 0 : index
    %c4 = arith.constant 4 : index
    %c0_60 = arith.constant 0 : index
    %58 = vector.load %arg7[%c0_57, %c0_58, %c0_59, %c4, %c0_60] : memref<1x8x2x18x18xf32, #tpu.memory_space<vmem>>, vector<1x8x1x1x18xf32>
    %59 = vector.shape_cast %58 : vector<1x8x1x1x18xf32> to vector<8x18xf32>
    %60 = vector.shape_cast %57 : vector<8x18xf32> to vector<1x8x1x1x18xf32>
    tpu.vector_store %arg7[%c0_57, %c0_58, %c0_59, %c4, %c0_60], %60 {strides = array<i32>} : memref<1x8x2x18x18xf32, #tpu.memory_space<vmem>>, vector<1x8x1x1x18xf32>,
    %61 = vector.extract_strided_slice %52 {offsets = [16, 0], sizes = [8, 18], strides = [1, 1]} : vector<32x18xf32> to vector<8x18xf32>
    %c0_61 = arith.constant 0 : index
    %c0_62 = arith.constant 0 : index
    %c1_63 = arith.constant 1 : index
    %c3_64 = arith.constant 3 : index
    %c0_65 = arith.constant 0 : index
    %62 = vector.load %arg7[%c0_61, %c0_62, %c1_63, %c3_64, %c0_65] : memref<1x8x2x18x18xf32, #tpu.memory_space<vmem>>, vector<1x8x1x1x18xf32>
    %63 = vector.shape_cast %62 : vector<1x8x1x1x18xf32> to vector<8x18xf32>
    %64 = vector.shape_cast %61 : vector<8x18xf32> to vector<1x8x1x1x18xf32>
    tpu.vector_store %arg7[%c0_61, %c0_62, %c1_63, %c3_64, %c0_65], %64 {strides = array<i32>} : memref<1x8x2x18x18xf32, #tpu.memory_space<vmem>>, vector<1x8x1x1x18xf32>,
    %65 = vector.extract_strided_slice %52 {offsets = [24, 0], sizes = [8, 18], strides = [1, 1]} : vector<32x18xf32> to vector<8x18xf32>
    %c0_66 = arith.constant 0 : index
    %c0_67 = arith.constant 0 : index
    %c1_68 = arith.constant 1 : index
    %c4_69 = arith.constant 4 : index
    %c0_70 = arith.constant 0 : index
    %66 = vector.load %arg7[%c0_66, %c0_67, %c1_68, %c4_69, %c0_70] : memref<1x8x2x18x18xf32, #tpu.memory_space<vmem>>, vector<1x8x1x1x18xf32>
    %67 = vector.shape_cast %66 : vector<1x8x1x1x18xf32> to vector<8x18xf32>
    %68 = vector.shape_cast %65 : vector<8x18xf32> to vector<1x8x1x1x18xf32>
    tpu.vector_store %arg7[%c0_66, %c0_67, %c1_68, %c4_69, %c0_70], %68 {strides = array<i32>} : memref<1x8x2x18x18xf32, #tpu.memory_space<vmem>>, vector<1x8x1x1x18xf32>,
    %c0_71 = arith.constant 0 : index
    %c16 = arith.constant 16 : index
    %69 = vector.load %arg8[%c0_71, %c16] : memref<64x64xf32, #tpu.memory_space<vmem>>, vector<32x8xf32>
    %70 = vector.extract_strided_slice %16 {offsets = [0, 0, 0], sizes = [1, 8, 18], strides = [1, 1, 1]} : vector<2x8x18xf32> to vector<1x8x18xf32>
    %71 = vector.shape_cast %70 : vector<1x8x18xf32> to vector<8x18xf32>
    %cst_72 = arith.constant dense<0.000000e+00> : vector<32x18xf32>
    %72 = tpu.matmul %69, %71, %cst_72 {dimension_numbers = #tpu.dot_dimension_numbers<[1], [0], [0], [1], [0, 0, 1, 1], [], []>} : vector<32x8xf32>, vector<8x18xf32>, vector<32x18xf32> -> vector<32x18xf32>
    %73 = arith.addf %15, %72 : vector<32x18xf32>
    %c32_73 = arith.constant 32 : index
    %c16_74 = arith.constant 16 : index
    %74 = vector.load %arg8[%c32_73, %c16_74] : memref<64x64xf32, #tpu.memory_space<vmem>>, vector<32x8xf32>
    %75 = vector.extract_strided_slice %16 {offsets = [1, 0, 0], sizes = [1, 8, 18], strides = [1, 1, 1]} : vector<2x8x18xf32> to vector<1x8x18xf32>
    %76 = vector.shape_cast %75 : vector<1x8x18xf32> to vector<8x18xf32>
    %cst_75 = arith.constant dense<0.000000e+00> : vector<32x18xf32>
    %77 = tpu.matmul %74, %76, %cst_75 {dimension_numbers = #tpu.dot_dimension_numbers<[1], [0], [0], [1], [0, 0, 1, 1], [], []>} : vector<32x8xf32>, vector<8x18xf32>, vector<32x18xf32> -> vector<32x18xf32>
    %78 = arith.addf %73, %77 : vector<32x18xf32>
    %79 = vector.extract_strided_slice %78 {offsets = [0, 0], sizes = [8, 18], strides = [1, 1]} : vector<32x18xf32> to vector<8x18xf32>
    %c0_76 = arith.constant 0 : index
    %c0_77 = arith.constant 0 : index
    %c0_78 = arith.constant 0 : index
    %c5 = arith.constant 5 : index
    %c0_79 = arith.constant 0 : index
    %80 = vector.load %arg7[%c0_76, %c0_77, %c0_78, %c5, %c0_79] : memref<1x8x2x18x18xf32, #tpu.memory_space<vmem>>, vector<1x8x1x1x18xf32>
    %81 = vector.shape_cast %80 : vector<1x8x1x1x18xf32> to vector<8x18xf32>
    %82 = vector.shape_cast %79 : vector<8x18xf32> to vector<1x8x1x1x18xf32>
    tpu.vector_store %arg7[%c0_76, %c0_77, %c0_78, %c5, %c0_79], %82 {strides = array<i32>} : memref<1x8x2x18x18xf32, #tpu.memory_space<vmem>>, vector<1x8x1x1x18xf32>,
    %83 = vector.extract_strided_slice %78 {offsets = [8, 0], sizes = [8, 18], strides = [1, 1]} : vector<32x18xf32> to vector<8x18xf32>
    %c0_80 = arith.constant 0 : index
    %c0_81 = arith.constant 0 : index
    %c0_82 = arith.constant 0 : index
    %c6 = arith.constant 6 : index
    %c0_83 = arith.constant 0 : index
    %84 = vector.load %arg7[%c0_80, %c0_81, %c0_82, %c6, %c0_83] : memref<1x8x2x18x18xf32, #tpu.memory_space<vmem>>, vector<1x8x1x1x18xf32>
    %85 = vector.shape_cast %84 : vector<1x8x1x1x18xf32> to vector<8x18xf32>
    %86 = vector.shape_cast %83 : vector<8x18xf32> to vector<1x8x1x1x18xf32>
    tpu.vector_store %arg7[%c0_80, %c0_81, %c0_82, %c6, %c0_83], %86 {strides = array<i32>} : memref<1x8x2x18x18xf32, #tpu.memory_space<vmem>>, vector<1x8x1x1x18xf32>,
    %87 = vector.extract_strided_slice %78 {offsets = [16, 0], sizes = [8, 18], strides = [1, 1]} : vector<32x18xf32> to vector<8x18xf32>
    %c0_84 = arith.constant 0 : index
    %c0_85 = arith.constant 0 : index
    %c1_86 = arith.constant 1 : index
    %c5_87 = arith.constant 5 : index
    %c0_88 = arith.constant 0 : index
    %88 = vector.load %arg7[%c0_84, %c0_85, %c1_86, %c5_87, %c0_88] : memref<1x8x2x18x18xf32, #tpu.memory_space<vmem>>, vector<1x8x1x1x18xf32>
    %89 = vector.shape_cast %88 : vector<1x8x1x1x18xf32> to vector<8x18xf32>
    %90 = vector.shape_cast %87 : vector<8x18xf32> to vector<1x8x1x1x18xf32>
    tpu.vector_store %arg7[%c0_84, %c0_85, %c1_86, %c5_87, %c0_88], %90 {strides = array<i32>} : memref<1x8x2x18x18xf32, #tpu.memory_space<vmem>>, vector<1x8x1x1x18xf32>,
    %91 = vector.extract_strided_slice %78 {offsets = [24, 0], sizes = [8, 18], strides = [1, 1]} : vector<32x18xf32> to vector<8x18xf32>
    %c0_89 = arith.constant 0 : index
    %c0_90 = arith.constant 0 : index
    %c1_91 = arith.constant 1 : index
    %c6_92 = arith.constant 6 : index
    %c0_93 = arith.constant 0 : index
    %92 = vector.load %arg7[%c0_89, %c0_90, %c1_91, %c6_92, %c0_93] : memref<1x8x2x18x18xf32, #tpu.memory_space<vmem>>, vector<1x8x1x1x18xf32>
    %93 = vector.shape_cast %92 : vector<1x8x1x1x18xf32> to vector<8x18xf32>
    %94 = vector.shape_cast %91 : vector<8x18xf32> to vector<1x8x1x1x18xf32>
    tpu.vector_store %arg7[%c0_89, %c0_90, %c1_91, %c6_92, %c0_93], %94 {strides = array<i32>} : memref<1x8x2x18x18xf32, #tpu.memory_space<vmem>>, vector<1x8x1x1x18xf32>,
    %c0_94 = arith.constant 0 : index
    %c24 = arith.constant 24 : index
    %95 = vector.load %arg8[%c0_94, %c24] : memref<64x64xf32, #tpu.memory_space<vmem>>, vector<32x8xf32>
    %96 = vector.extract_strided_slice %16 {offsets = [0, 0, 0], sizes = [1, 8, 18], strides = [1, 1, 1]} : vector<2x8x18xf32> to vector<1x8x18xf32>
    %97 = vector.shape_cast %96 : vector<1x8x18xf32> to vector<8x18xf32>
    %cst_95 = arith.constant dense<0.000000e+00> : vector<32x18xf32>
    %98 = tpu.matmul %95, %97, %cst_95 {dimension_numbers = #tpu.dot_dimension_numbers<[1], [0], [0], [1], [0, 0, 1, 1], [], []>} : vector<32x8xf32>, vector<8x18xf32>, vector<32x18xf32> -> vector<32x18xf32>
    %99 = arith.addf %15, %98 : vector<32x18xf32>
    %c32_96 = arith.constant 32 : index
    %c24_97 = arith.constant 24 : index
    %100 = vector.load %arg8[%c32_96, %c24_97] : memref<64x64xf32, #tpu.memory_space<vmem>>, vector<32x8xf32>
    %101 = vector.extract_strided_slice %16 {offsets = [1, 0, 0], sizes = [1, 8, 18], strides = [1, 1, 1]} : vector<2x8x18xf32> to vector<1x8x18xf32>
    %102 = vector.shape_cast %101 : vector<1x8x18xf32> to vector<8x18xf32>
    %cst_98 = arith.constant dense<0.000000e+00> : vector<32x18xf32>
    %103 = tpu.matmul %100, %102, %cst_98 {dimension_numbers = #tpu.dot_dimension_numbers<[1], [0], [0], [1], [0, 0, 1, 1], [], []>} : vector<32x8xf32>, vector<8x18xf32>, vector<32x18xf32> -> vector<32x18xf32>
    %104 = arith.addf %99, %103 : vector<32x18xf32>
    %105 = vector.extract_strided_slice %104 {offsets = [0, 0], sizes = [8, 18], strides = [1, 1]} : vector<32x18xf32> to vector<8x18xf32>
    %c0_99 = arith.constant 0 : index
    %c0_100 = arith.constant 0 : index
    %c0_101 = arith.constant 0 : index
    %c7 = arith.constant 7 : index
    %c0_102 = arith.constant 0 : index
    %106 = vector.load %arg7[%c0_99, %c0_100, %c0_101, %c7, %c0_102] : memref<1x8x2x18x18xf32, #tpu.memory_space<vmem>>, vector<1x8x1x1x18xf32>
    %107 = vector.shape_cast %106 : vector<1x8x1x1x18xf32> to vector<8x18xf32>
    %108 = vector.shape_cast %105 : vector<8x18xf32> to vector<1x8x1x1x18xf32>
    tpu.vector_store %arg7[%c0_99, %c0_100, %c0_101, %c7, %c0_102], %108 {strides = array<i32>} : memref<1x8x2x18x18xf32, #tpu.memory_space<vmem>>, vector<1x8x1x1x18xf32>,
    %109 = vector.extract_strided_slice %104 {offsets = [8, 0], sizes = [8, 18], strides = [1, 1]} : vector<32x18xf32> to vector<8x18xf32>
    %c0_103 = arith.constant 0 : index
    %c0_104 = arith.constant 0 : index
    %c0_105 = arith.constant 0 : index
    %c8_106 = arith.constant 8 : index
    %c0_107 = arith.constant 0 : index
    %110 = vector.load %arg7[%c0_103, %c0_104, %c0_105, %c8_106, %c0_107] : memref<1x8x2x18x18xf32, #tpu.memory_space<vmem>>, vector<1x8x1x1x18xf32>
    %111 = vector.shape_cast %110 : vector<1x8x1x1x18xf32> to vector<8x18xf32>
    %112 = vector.shape_cast %109 : vector<8x18xf32> to vector<1x8x1x1x18xf32>
    tpu.vector_store %arg7[%c0_103, %c0_104, %c0_105, %c8_106, %c0_107], %112 {strides = array<i32>} : memref<1x8x2x18x18xf32, #tpu.memory_space<vmem>>, vector<1x8x1x1x18xf32>,
    %113 = vector.extract_strided_slice %104 {offsets = [16, 0], sizes = [8, 18], strides = [1, 1]} : vector<32x18xf32> to vector<8x18xf32>
    %c0_108 = arith.constant 0 : index
    %c0_109 = arith.constant 0 : index
    %c1_110 = arith.constant 1 : index
    %c7_111 = arith.constant 7 : index
    %c0_112 = arith.constant 0 : index
    %114 = vector.load %arg7[%c0_108, %c0_109, %c1_110, %c7_111, %c0_112] : memref<1x8x2x18x18xf32, #tpu.memory_space<vmem>>, vector<1x8x1x1x18xf32>
    %115 = vector.shape_cast %114 : vector<1x8x1x1x18xf32> to vector<8x18xf32>
    %116 = vector.shape_cast %113 : vector<8x18xf32> to vector<1x8x1x1x18xf32>
    tpu.vector_store %arg7[%c0_108, %c0_109, %c1_110, %c7_111, %c0_112], %116 {strides = array<i32>} : memref<1x8x2x18x18xf32, #tpu.memory_space<vmem>>, vector<1x8x1x1x18xf32>,
    %117 = vector.extract_strided_slice %104 {offsets = [24, 0], sizes = [8, 18], strides = [1, 1]} : vector<32x18xf32> to vector<8x18xf32>
    %c0_113 = arith.constant 0 : index
    %c0_114 = arith.constant 0 : index
    %c1_115 = arith.constant 1 : index
    %c8_116 = arith.constant 8 : index
    %c0_117 = arith.constant 0 : index
    %118 = vector.load %arg7[%c0_113, %c0_114, %c1_115, %c8_116, %c0_117] : memref<1x8x2x18x18xf32, #tpu.memory_space<vmem>>, vector<1x8x1x1x18xf32>
    %119 = vector.shape_cast %118 : vector<1x8x1x1x18xf32> to vector<8x18xf32>
    %120 = vector.shape_cast %117 : vector<8x18xf32> to vector<1x8x1x1x18xf32>
    tpu.vector_store %arg7[%c0_113, %c0_114, %c1_115, %c8_116, %c0_117], %120 {strides = array<i32>} : memref<1x8x2x18x18xf32, #tpu.memory_space<vmem>>, vector<1x8x1x1x18xf32>,
    %c0_118 = arith.constant 0 : index
    %c32_119 = arith.constant 32 : index
    %121 = vector.load %arg8[%c0_118, %c32_119] : memref<64x64xf32, #tpu.memory_space<vmem>>, vector<32x8xf32>
    %122 = vector.extract_strided_slice %16 {offsets = [0, 0, 0], sizes = [1, 8, 18], strides = [1, 1, 1]} : vector<2x8x18xf32> to vector<1x8x18xf32>
    %123 = vector.shape_cast %122 : vector<1x8x18xf32> to vector<8x18xf32>
    %cst_120 = arith.constant dense<0.000000e+00> : vector<32x18xf32>
    %124 = tpu.matmul %121, %123, %cst_120 {dimension_numbers = #tpu.dot_dimension_numbers<[1], [0], [0], [1], [0, 0, 1, 1], [], []>} : vector<32x8xf32>, vector<8x18xf32>, vector<32x18xf32> -> vector<32x18xf32>
    %125 = arith.addf %15, %124 : vector<32x18xf32>
    %c32_121 = arith.constant 32 : index
    %c32_122 = arith.constant 32 : index
    %126 = vector.load %arg8[%c32_121, %c32_122] : memref<64x64xf32, #tpu.memory_space<vmem>>, vector<32x8xf32>
    %127 = vector.extract_strided_slice %16 {offsets = [1, 0, 0], sizes = [1, 8, 18], strides = [1, 1, 1]} : vector<2x8x18xf32> to vector<1x8x18xf32>
    %128 = vector.shape_cast %127 : vector<1x8x18xf32> to vector<8x18xf32>
    %cst_123 = arith.constant dense<0.000000e+00> : vector<32x18xf32>
    %129 = tpu.matmul %126, %128, %cst_123 {dimension_numbers = #tpu.dot_dimension_numbers<[1], [0], [0], [1], [0, 0, 1, 1], [], []>} : vector<32x8xf32>, vector<8x18xf32>, vector<32x18xf32> -> vector<32x18xf32>
    %130 = arith.addf %125, %129 : vector<32x18xf32>
    %131 = vector.extract_strided_slice %130 {offsets = [0, 0], sizes = [8, 18], strides = [1, 1]} : vector<32x18xf32> to vector<8x18xf32>
    %c0_124 = arith.constant 0 : index
    %c0_125 = arith.constant 0 : index
    %c0_126 = arith.constant 0 : index
    %c9 = arith.constant 9 : index
    %c0_127 = arith.constant 0 : index
    %132 = vector.load %arg7[%c0_124, %c0_125, %c0_126, %c9, %c0_127] : memref<1x8x2x18x18xf32, #tpu.memory_space<vmem>>, vector<1x8x1x1x18xf32>
    %133 = vector.shape_cast %132 : vector<1x8x1x1x18xf32> to vector<8x18xf32>
    %134 = vector.shape_cast %131 : vector<8x18xf32> to vector<1x8x1x1x18xf32>
    tpu.vector_store %arg7[%c0_124, %c0_125, %c0_126, %c9, %c0_127], %134 {strides = array<i32>} : memref<1x8x2x18x18xf32, #tpu.memory_space<vmem>>, vector<1x8x1x1x18xf32>,
    %135 = vector.extract_strided_slice %130 {offsets = [8, 0], sizes = [8, 18], strides = [1, 1]} : vector<32x18xf32> to vector<8x18xf32>
    %c0_128 = arith.constant 0 : index
    %c0_129 = arith.constant 0 : index
    %c0_130 = arith.constant 0 : index
    %c10 = arith.constant 10 : index
    %c0_131 = arith.constant 0 : index
    %136 = vector.load %arg7[%c0_128, %c0_129, %c0_130, %c10, %c0_131] : memref<1x8x2x18x18xf32, #tpu.memory_space<vmem>>, vector<1x8x1x1x18xf32>
    %137 = vector.shape_cast %136 : vector<1x8x1x1x18xf32> to vector<8x18xf32>
    %138 = vector.shape_cast %135 : vector<8x18xf32> to vector<1x8x1x1x18xf32>
    tpu.vector_store %arg7[%c0_128, %c0_129, %c0_130, %c10, %c0_131], %138 {strides = array<i32>} : memref<1x8x2x18x18xf32, #tpu.memory_space<vmem>>, vector<1x8x1x1x18xf32>,
    %139 = vector.extract_strided_slice %130 {offsets = [16, 0], sizes = [8, 18], strides = [1, 1]} : vector<32x18xf32> to vector<8x18xf32>
    %c0_132 = arith.constant 0 : index
    %c0_133 = arith.constant 0 : index
    %c1_134 = arith.constant 1 : index
    %c9_135 = arith.constant 9 : index
    %c0_136 = arith.constant 0 : index
    %140 = vector.load %arg7[%c0_132, %c0_133, %c1_134, %c9_135, %c0_136] : memref<1x8x2x18x18xf32, #tpu.memory_space<vmem>>, vector<1x8x1x1x18xf32>
    %141 = vector.shape_cast %140 : vector<1x8x1x1x18xf32> to vector<8x18xf32>
    %142 = vector.shape_cast %139 : vector<8x18xf32> to vector<1x8x1x1x18xf32>
    tpu.vector_store %arg7[%c0_132, %c0_133, %c1_134, %c9_135, %c0_136], %142 {strides = array<i32>} : memref<1x8x2x18x18xf32, #tpu.memory_space<vmem>>, vector<1x8x1x1x18xf32>,
    %143 = vector.extract_strided_slice %130 {offsets = [24, 0], sizes = [8, 18], strides = [1, 1]} : vector<32x18xf32> to vector<8x18xf32>
    %c0_137 = arith.constant 0 : index
    %c0_138 = arith.constant 0 : index
    %c1_139 = arith.constant 1 : index
    %c10_140 = arith.constant 10 : index
    %c0_141 = arith.constant 0 : index
    %144 = vector.load %arg7[%c0_137, %c0_138, %c1_139, %c10_140, %c0_141] : memref<1x8x2x18x18xf32, #tpu.memory_space<vmem>>, vector<1x8x1x1x18xf32>
    %145 = vector.shape_cast %144 : vector<1x8x1x1x18xf32> to vector<8x18xf32>
    %146 = vector.shape_cast %143 : vector<8x18xf32> to vector<1x8x1x1x18xf32>
    tpu.vector_store %arg7[%c0_137, %c0_138, %c1_139, %c10_140, %c0_141], %146 {strides = array<i32>} : memref<1x8x2x18x18xf32, #tpu.memory_space<vmem>>, vector<1x8x1x1x18xf32>,
    %c0_142 = arith.constant 0 : index
    %c40 = arith.constant 40 : index
    %147 = vector.load %arg8[%c0_142, %c40] : memref<64x64xf32, #tpu.memory_space<vmem>>, vector<32x8xf32>
    %148 = vector.extract_strided_slice %16 {offsets = [0, 0, 0], sizes = [1, 8, 18], strides = [1, 1, 1]} : vector<2x8x18xf32> to vector<1x8x18xf32>
    %149 = vector.shape_cast %148 : vector<1x8x18xf32> to vector<8x18xf32>
    %cst_143 = arith.constant dense<0.000000e+00> : vector<32x18xf32>
    %150 = tpu.matmul %147, %149, %cst_143 {dimension_numbers = #tpu.dot_dimension_numbers<[1], [0], [0], [1], [0, 0, 1, 1], [], []>} : vector<32x8xf32>, vector<8x18xf32>, vector<32x18xf32> -> vector<32x18xf32>
    %151 = arith.addf %15, %150 : vector<32x18xf32>
    %c32_144 = arith.constant 32 : index
    %c40_145 = arith.constant 40 : index
    %152 = vector.load %arg8[%c32_144, %c40_145] : memref<64x64xf32, #tpu.memory_space<vmem>>, vector<32x8xf32>
    %153 = vector.extract_strided_slice %16 {offsets = [1, 0, 0], sizes = [1, 8, 18], strides = [1, 1, 1]} : vector<2x8x18xf32> to vector<1x8x18xf32>
    %154 = vector.shape_cast %153 : vector<1x8x18xf32> to vector<8x18xf32>
    %cst_146 = arith.constant dense<0.000000e+00> : vector<32x18xf32>
    %155 = tpu.matmul %152, %154, %cst_146 {dimension_numbers = #tpu.dot_dimension_numbers<[1], [0], [0], [1], [0, 0, 1, 1], [], []>} : vector<32x8xf32>, vector<8x18xf32>, vector<32x18xf32> -> vector<32x18xf32>
    %156 = arith.addf %151, %155 : vector<32x18xf32>
    %157 = vector.extract_strided_slice %156 {offsets = [0, 0], sizes = [8, 18], strides = [1, 1]} : vector<32x18xf32> to vector<8x18xf32>
    %c0_147 = arith.constant 0 : index
    %c0_148 = arith.constant 0 : index
    %c0_149 = arith.constant 0 : index
    %c11 = arith.constant 11 : index
    %c0_150 = arith.constant 0 : index
    %158 = vector.load %arg7[%c0_147, %c0_148, %c0_149, %c11, %c0_150] : memref<1x8x2x18x18xf32, #tpu.memory_space<vmem>>, vector<1x8x1x1x18xf32>
    %159 = vector.shape_cast %158 : vector<1x8x1x1x18xf32> to vector<8x18xf32>
    %160 = vector.shape_cast %157 : vector<8x18xf32> to vector<1x8x1x1x18xf32>
    tpu.vector_store %arg7[%c0_147, %c0_148, %c0_149, %c11, %c0_150], %160 {strides = array<i32>} : memref<1x8x2x18x18xf32, #tpu.memory_space<vmem>>, vector<1x8x1x1x18xf32>,
    %161 = vector.extract_strided_slice %156 {offsets = [8, 0], sizes = [8, 18], strides = [1, 1]} : vector<32x18xf32> to vector<8x18xf32>
    %c0_151 = arith.constant 0 : index
    %c0_152 = arith.constant 0 : index
    %c0_153 = arith.constant 0 : index
    %c12 = arith.constant 12 : index
    %c0_154 = arith.constant 0 : index
    %162 = vector.load %arg7[%c0_151, %c0_152, %c0_153, %c12, %c0_154] : memref<1x8x2x18x18xf32, #tpu.memory_space<vmem>>, vector<1x8x1x1x18xf32>
    %163 = vector.shape_cast %162 : vector<1x8x1x1x18xf32> to vector<8x18xf32>
    %164 = vector.shape_cast %161 : vector<8x18xf32> to vector<1x8x1x1x18xf32>
    tpu.vector_store %arg7[%c0_151, %c0_152, %c0_153, %c12, %c0_154], %164 {strides = array<i32>} : memref<1x8x2x18x18xf32, #tpu.memory_space<vmem>>, vector<1x8x1x1x18xf32>,
    %165 = vector.extract_strided_slice %156 {offsets = [16, 0], sizes = [8, 18], strides = [1, 1]} : vector<32x18xf32> to vector<8x18xf32>
    %c0_155 = arith.constant 0 : index
    %c0_156 = arith.constant 0 : index
    %c1_157 = arith.constant 1 : index
    %c11_158 = arith.constant 11 : index
    %c0_159 = arith.constant 0 : index
    %166 = vector.load %arg7[%c0_155, %c0_156, %c1_157, %c11_158, %c0_159] : memref<1x8x2x18x18xf32, #tpu.memory_space<vmem>>, vector<1x8x1x1x18xf32>
    %167 = vector.shape_cast %166 : vector<1x8x1x1x18xf32> to vector<8x18xf32>
    %168 = vector.shape_cast %165 : vector<8x18xf32> to vector<1x8x1x1x18xf32>
    tpu.vector_store %arg7[%c0_155, %c0_156, %c1_157, %c11_158, %c0_159], %168 {strides = array<i32>} : memref<1x8x2x18x18xf32, #tpu.memory_space<vmem>>, vector<1x8x1x1x18xf32>,
    %169 = vector.extract_strided_slice %156 {offsets = [24, 0], sizes = [8, 18], strides = [1, 1]} : vector<32x18xf32> to vector<8x18xf32>
    %c0_160 = arith.constant 0 : index
    %c0_161 = arith.constant 0 : index
    %c1_162 = arith.constant 1 : index
    %c12_163 = arith.constant 12 : index
    %c0_164 = arith.constant 0 : index
    %170 = vector.load %arg7[%c0_160, %c0_161, %c1_162, %c12_163, %c0_164] : memref<1x8x2x18x18xf32, #tpu.memory_space<vmem>>, vector<1x8x1x1x18xf32>
    %171 = vector.shape_cast %170 : vector<1x8x1x1x18xf32> to vector<8x18xf32>
    %172 = vector.shape_cast %169 : vector<8x18xf32> to vector<1x8x1x1x18xf32>
    tpu.vector_store %arg7[%c0_160, %c0_161, %c1_162, %c12_163, %c0_164], %172 {strides = array<i32>} : memref<1x8x2x18x18xf32, #tpu.memory_space<vmem>>, vector<1x8x1x1x18xf32>,
    %c0_165 = arith.constant 0 : index
    %c48 = arith.constant 48 : index
    %173 = vector.load %arg8[%c0_165, %c48] : memref<64x64xf32, #tpu.memory_space<vmem>>, vector<32x8xf32>
    %174 = vector.extract_strided_slice %16 {offsets = [0, 0, 0], sizes = [1, 8, 18], strides = [1, 1, 1]} : vector<2x8x18xf32> to vector<1x8x18xf32>
    %175 = vector.shape_cast %174 : vector<1x8x18xf32> to vector<8x18xf32>
    %cst_166 = arith.constant dense<0.000000e+00> : vector<32x18xf32>
    %176 = tpu.matmul %173, %175, %cst_166 {dimension_numbers = #tpu.dot_dimension_numbers<[1], [0], [0], [1], [0, 0, 1, 1], [], []>} : vector<32x8xf32>, vector<8x18xf32>, vector<32x18xf32> -> vector<32x18xf32>
    %177 = arith.addf %15, %176 : vector<32x18xf32>
    %c32_167 = arith.constant 32 : index
    %c48_168 = arith.constant 48 : index
    %178 = vector.load %arg8[%c32_167, %c48_168] : memref<64x64xf32, #tpu.memory_space<vmem>>, vector<32x8xf32>
    %179 = vector.extract_strided_slice %16 {offsets = [1, 0, 0], sizes = [1, 8, 18], strides = [1, 1, 1]} : vector<2x8x18xf32> to vector<1x8x18xf32>
    %180 = vector.shape_cast %179 : vector<1x8x18xf32> to vector<8x18xf32>
    %cst_169 = arith.constant dense<0.000000e+00> : vector<32x18xf32>
    %181 = tpu.matmul %178, %180, %cst_169 {dimension_numbers = #tpu.dot_dimension_numbers<[1], [0], [0], [1], [0, 0, 1, 1], [], []>} : vector<32x8xf32>, vector<8x18xf32>, vector<32x18xf32> -> vector<32x18xf32>
    %182 = arith.addf %177, %181 : vector<32x18xf32>
    %183 = vector.extract_strided_slice %182 {offsets = [0, 0], sizes = [8, 18], strides = [1, 1]} : vector<32x18xf32> to vector<8x18xf32>
    %c0_170 = arith.constant 0 : index
    %c0_171 = arith.constant 0 : index
    %c0_172 = arith.constant 0 : index
    %c13 = arith.constant 13 : index
    %c0_173 = arith.constant 0 : index
    %184 = vector.load %arg7[%c0_170, %c0_171, %c0_172, %c13, %c0_173] : memref<1x8x2x18x18xf32, #tpu.memory_space<vmem>>, vector<1x8x1x1x18xf32>
    %185 = vector.shape_cast %184 : vector<1x8x1x1x18xf32> to vector<8x18xf32>
    %186 = vector.shape_cast %183 : vector<8x18xf32> to vector<1x8x1x1x18xf32>
    tpu.vector_store %arg7[%c0_170, %c0_171, %c0_172, %c13, %c0_173], %186 {strides = array<i32>} : memref<1x8x2x18x18xf32, #tpu.memory_space<vmem>>, vector<1x8x1x1x18xf32>,
    %187 = vector.extract_strided_slice %182 {offsets = [8, 0], sizes = [8, 18], strides = [1, 1]} : vector<32x18xf32> to vector<8x18xf32>
    %c0_174 = arith.constant 0 : index
    %c0_175 = arith.constant 0 : index
    %c0_176 = arith.constant 0 : index
    %c14 = arith.constant 14 : index
    %c0_177 = arith.constant 0 : index
    %188 = vector.load %arg7[%c0_174, %c0_175, %c0_176, %c14, %c0_177] : memref<1x8x2x18x18xf32, #tpu.memory_space<vmem>>, vector<1x8x1x1x18xf32>
    %189 = vector.shape_cast %188 : vector<1x8x1x1x18xf32> to vector<8x18xf32>
    %190 = vector.shape_cast %187 : vector<8x18xf32> to vector<1x8x1x1x18xf32>
    tpu.vector_store %arg7[%c0_174, %c0_175, %c0_176, %c14, %c0_177], %190 {strides = array<i32>} : memref<1x8x2x18x18xf32, #tpu.memory_space<vmem>>, vector<1x8x1x1x18xf32>,
    %191 = vector.extract_strided_slice %182 {offsets = [16, 0], sizes = [8, 18], strides = [1, 1]} : vector<32x18xf32> to vector<8x18xf32>
    %c0_178 = arith.constant 0 : index
    %c0_179 = arith.constant 0 : index
    %c1_180 = arith.constant 1 : index
    %c13_181 = arith.constant 13 : index
    %c0_182 = arith.constant 0 : index
    %192 = vector.load %arg7[%c0_178, %c0_179, %c1_180, %c13_181, %c0_182] : memref<1x8x2x18x18xf32, #tpu.memory_space<vmem>>, vector<1x8x1x1x18xf32>
    %193 = vector.shape_cast %192 : vector<1x8x1x1x18xf32> to vector<8x18xf32>
    %194 = vector.shape_cast %191 : vector<8x18xf32> to vector<1x8x1x1x18xf32>
    tpu.vector_store %arg7[%c0_178, %c0_179, %c1_180, %c13_181, %c0_182], %194 {strides = array<i32>} : memref<1x8x2x18x18xf32, #tpu.memory_space<vmem>>, vector<1x8x1x1x18xf32>,
    %195 = vector.extract_strided_slice %182 {offsets = [24, 0], sizes = [8, 18], strides = [1, 1]} : vector<32x18xf32> to vector<8x18xf32>
    %c0_183 = arith.constant 0 : index
    %c0_184 = arith.constant 0 : index
    %c1_185 = arith.constant 1 : index
    %c14_186 = arith.constant 14 : index
    %c0_187 = arith.constant 0 : index
    %196 = vector.load %arg7[%c0_183, %c0_184, %c1_185, %c14_186, %c0_187] : memref<1x8x2x18x18xf32, #tpu.memory_space<vmem>>, vector<1x8x1x1x18xf32>
    %197 = vector.shape_cast %196 : vector<1x8x1x1x18xf32> to vector<8x18xf32>
    %198 = vector.shape_cast %195 : vector<8x18xf32> to vector<1x8x1x1x18xf32>
    tpu.vector_store %arg7[%c0_183, %c0_184, %c1_185, %c14_186, %c0_187], %198 {strides = array<i32>} : memref<1x8x2x18x18xf32, #tpu.memory_space<vmem>>, vector<1x8x1x1x18xf32>,
    %c0_188 = arith.constant 0 : index
    %c56 = arith.constant 56 : index
    %199 = vector.load %arg8[%c0_188, %c56] : memref<64x64xf32, #tpu.memory_space<vmem>>, vector<32x8xf32>
    %200 = vector.extract_strided_slice %16 {offsets = [0, 0, 0], sizes = [1, 8, 18], strides = [1, 1, 1]} : vector<2x8x18xf32> to vector<1x8x18xf32>
    %201 = vector.shape_cast %200 : vector<1x8x18xf32> to vector<8x18xf32>
    %cst_189 = arith.constant dense<0.000000e+00> : vector<32x18xf32>
    %202 = tpu.matmul %199, %201, %cst_189 {dimension_numbers = #tpu.dot_dimension_numbers<[1], [0], [0], [1], [0, 0, 1, 1], [], []>} : vector<32x8xf32>, vector<8x18xf32>, vector<32x18xf32> -> vector<32x18xf32>
    %203 = arith.addf %15, %202 : vector<32x18xf32>
    %c32_190 = arith.constant 32 : index
    %c56_191 = arith.constant 56 : index
    %204 = vector.load %arg8[%c32_190, %c56_191] : memref<64x64xf32, #tpu.memory_space<vmem>>, vector<32x8xf32>
    %205 = vector.extract_strided_slice %16 {offsets = [1, 0, 0], sizes = [1, 8, 18], strides = [1, 1, 1]} : vector<2x8x18xf32> to vector<1x8x18xf32>
    %206 = vector.shape_cast %205 : vector<1x8x18xf32> to vector<8x18xf32>
    %cst_192 = arith.constant dense<0.000000e+00> : vector<32x18xf32>
    %207 = tpu.matmul %204, %206, %cst_192 {dimension_numbers = #tpu.dot_dimension_numbers<[1], [0], [0], [1], [0, 0, 1, 1], [], []>} : vector<32x8xf32>, vector<8x18xf32>, vector<32x18xf32> -> vector<32x18xf32>
    %208 = arith.addf %203, %207 : vector<32x18xf32>
    %209 = vector.extract_strided_slice %208 {offsets = [0, 0], sizes = [8, 18], strides = [1, 1]} : vector<32x18xf32> to vector<8x18xf32>
    %c0_193 = arith.constant 0 : index
    %c0_194 = arith.constant 0 : index
    %c0_195 = arith.constant 0 : index
    %c15 = arith.constant 15 : index
    %c0_196 = arith.constant 0 : index
    %210 = vector.load %arg7[%c0_193, %c0_194, %c0_195, %c15, %c0_196] : memref<1x8x2x18x18xf32, #tpu.memory_space<vmem>>, vector<1x8x1x1x18xf32>
    %211 = vector.shape_cast %210 : vector<1x8x1x1x18xf32> to vector<8x18xf32>
    %212 = vector.shape_cast %209 : vector<8x18xf32> to vector<1x8x1x1x18xf32>
    tpu.vector_store %arg7[%c0_193, %c0_194, %c0_195, %c15, %c0_196], %212 {strides = array<i32>} : memref<1x8x2x18x18xf32, #tpu.memory_space<vmem>>, vector<1x8x1x1x18xf32>,
    %213 = vector.extract_strided_slice %208 {offsets = [8, 0], sizes = [8, 18], strides = [1, 1]} : vector<32x18xf32> to vector<8x18xf32>
    %c0_197 = arith.constant 0 : index
    %c0_198 = arith.constant 0 : index
    %c0_199 = arith.constant 0 : index
    %c16_200 = arith.constant 16 : index
    %c0_201 = arith.constant 0 : index
    %214 = vector.load %arg7[%c0_197, %c0_198, %c0_199, %c16_200, %c0_201] : memref<1x8x2x18x18xf32, #tpu.memory_space<vmem>>, vector<1x8x1x1x18xf32>
    %215 = vector.shape_cast %214 : vector<1x8x1x1x18xf32> to vector<8x18xf32>
    %216 = vector.shape_cast %213 : vector<8x18xf32> to vector<1x8x1x1x18xf32>
    tpu.vector_store %arg7[%c0_197, %c0_198, %c0_199, %c16_200, %c0_201], %216 {strides = array<i32>} : memref<1x8x2x18x18xf32, #tpu.memory_space<vmem>>, vector<1x8x1x1x18xf32>,
    %217 = vector.extract_strided_slice %208 {offsets = [16, 0], sizes = [8, 18], strides = [1, 1]} : vector<32x18xf32> to vector<8x18xf32>
    %c0_202 = arith.constant 0 : index
    %c0_203 = arith.constant 0 : index
    %c1_204 = arith.constant 1 : index
    %c15_205 = arith.constant 15 : index
    %c0_206 = arith.constant 0 : index
    %218 = vector.load %arg7[%c0_202, %c0_203, %c1_204, %c15_205, %c0_206] : memref<1x8x2x18x18xf32, #tpu.memory_space<vmem>>, vector<1x8x1x1x18xf32>
    %219 = vector.shape_cast %218 : vector<1x8x1x1x18xf32> to vector<8x18xf32>
    %220 = vector.shape_cast %217 : vector<8x18xf32> to vector<1x8x1x1x18xf32>
    tpu.vector_store %arg7[%c0_202, %c0_203, %c1_204, %c15_205, %c0_206], %220 {strides = array<i32>} : memref<1x8x2x18x18xf32, #tpu.memory_space<vmem>>, vector<1x8x1x1x18xf32>,
    %221 = vector.extract_strided_slice %208 {offsets = [24, 0], sizes = [8, 18], strides = [1, 1]} : vector<32x18xf32> to vector<8x18xf32>
    %c0_207 = arith.constant 0 : index
    %c0_208 = arith.constant 0 : index
    %c1_209 = arith.constant 1 : index
    %c16_210 = arith.constant 16 : index
    %c0_211 = arith.constant 0 : index
    %222 = vector.load %arg7[%c0_207, %c0_208, %c1_209, %c16_210, %c0_211] : memref<1x8x2x18x18xf32, #tpu.memory_space<vmem>>, vector<1x8x1x1x18xf32>
    %223 = vector.shape_cast %222 : vector<1x8x1x1x18xf32> to vector<8x18xf32>
    %224 = vector.shape_cast %221 : vector<8x18xf32> to vector<1x8x1x1x18xf32>
    tpu.vector_store %arg7[%c0_207, %c0_208, %c1_209, %c16_210, %c0_211], %224 {strides = array<i32>} : memref<1x8x2x18x18xf32, #tpu.memory_space<vmem>>, vector<1x8x1x1x18xf32>,
    return
  }
  func.func @transform_0(%arg0: i32, %arg1: i32, %arg2: i32) -> (i32, i32, i32, i32) {
    %c0_i32 = arith.constant 0 : i32
    %c0_i32_0 = arith.constant 0 : i32
    %c0_i32_1 = arith.constant 0 : i32
    return %arg0, %arg2, %c0_i32, %c0_i32_0 : i32, i32, i32, i32
  }
  func.func @transform_1(%arg0: i32, %arg1: i32, %arg2: i32) -> (i32, i32, i32) {
    %c0_i32 = arith.constant 0 : i32
    %c0_i32_0 = arith.constant 0 : i32
    %c0_i32_1 = arith.constant 0 : i32
    return %arg1, %c0_i32, %c0_i32_0 : i32, i32, i32
  }
  func.func @transform_2(%arg0: i32, %arg1: i32, %arg2: i32) -> (i32, i32, i32) {
    %c0_i32 = arith.constant 0 : i32
    %c0_i32_0 = arith.constant 0 : i32
    %c0_i32_1 = arith.constant 0 : i32
    %c0_i32_2 = arith.constant 0 : i32
    return %c0_i32, %c0_i32_0, %c0_i32_1 : i32, i32, i32
  }
  func.func @transform_3(%arg0: i32, %arg1: i32, %arg2: i32) -> (i32, i32, i32) {
    %c0_i32 = arith.constant 0 : i32
    %c0_i32_0 = arith.constant 0 : i32
    %c0_i32_1 = arith.constant 0 : i32
    return %arg1, %c0_i32, %c0_i32_0 : i32, i32, i32
  }
  func.func @transform_4(%arg0: i32, %arg1: i32, %arg2: i32) -> (i32, i32, i32, i32, i32) {
    %c0_i32 = arith.constant 0 : i32
    %c0_i32_0 = arith.constant 0 : i32
    %c0_i32_1 = arith.constant 0 : i32
    return %arg0, %arg1, %arg2, %c0_i32, %c0_i32_0 : i32, i32, i32, i32, i32
  }
}

</mosaic_0001>

<bundles_post_ra>
// kernel: tpu_custom_call.1
= control target key start
LH: loop header
LB: loop body
LE: loop exit
PB: predicated region body
PF: predicated region fallthrough
CT: control target
= control target key end

     0   :  { %s6929_s0 = inlined_call_operand.hbm [shape: f32[2,4,4,64], index: 0, kind: input, shape index: {}]   ;;  %s6930_s1 = inlined_call_operand.vmem [shape: f32[1,64,4], index: 1, kind: input, shape index: {}]   ;;  %s6931_s2 = inlined_call_operand.hbm [shape: f32[2,8,18], index: 2, kind: input, shape index: {}]   ;;  %s6932_s3 = inlined_call_operand.vmem [shape: f32[1,32,18], index: 3, kind: input, shape index: {}]   ;;  %s6933_s4 = inlined_call_operand.vmem [shape: f32[2,8,8,18,18], index: 4, kind: output, shape index: {}]  }
   0x1   :  { %6939 = sst [smem:[#allocation11_spill]] %s6931_s2 }
   0x2   :  { %6940 = sst [smem:[#allocation12_spill]] %s6933_s4 }
   0x3   :  { %9 = vsyncpa [#allocation4], 0 }
   0x4   :  { %11 = vsyncpa [#allocation4 + $0x1], 0 }
   0x5   :  { %12 = vsyncpa [#allocation6], 0  ;;  %s5533_s15 = smov 0   ;;  %s5535_s16 = smov 0  }
   0x6   :  { %s5537_s17 = smov 0   ;;  %s5539_s18 = smov 0  }
   0x7   :  { %s5541_s19 = smov 0   ;;  %s5543_s20 = smov 0  }
   0x8   :  { %s5545_s21 = smov 0   ;;  %s5547_s22 = smov 0  }
   0x9 LB: > { %s4749_s23 = sadd.s32 4294967295, %s5493_s22   ;;  %p59_p0 = scmp.ne.s32.totalorder %s5469_s16, %s5465_s15  ;;  %s5493_s22 = sphi %s5547_s22, %s18_s22   ;;  %s5489_s21 = sphi %s5545_s21, %s6962_s21   ;;  %s5485_s20 = sphi %s5543_s20, %s6961_s20   ;;  %s5481_s19 = sphi %s5541_s19, %s6960_s19   ;;  %s5477_s18 = sphi %s5539_s18, %s6959_s18   ;;  %s5473_s17 = sphi %s5537_s17, %s6958_s17   ;;  %s5469_s16 = sphi %s5535_s16, %s6957_s16   ;;  %s5465_s15 = sphi %s5533_s15, %s6956_s15  }
   0xa   : > { %p5575_p1 = scmp.eq.s32.totalorder %s4749_s23, 0  ;;  %p4751_p2 = scmp.ge.s32.totalorder %s5493_s22, 1 }
   0xb   : > { %p173_p3 = scmp.lt.s32.totalorder %s5493_s22, 9  ;;  %s5495_s27 = smov [#allocation5]  }
   0xc   : > { %s6941_s24 = scalar_select %p5575_p1, 1, 0 }
   0xd   : > { %p5583_p4 = por %p5575_p1, %p59_p0  ;;  %p5587_p5 = pnand %p4751_p2, %p173_p3 }
   0xe   : > { %s193_s28 = sshll.u32 %s5495_s27, 4  ;;  %s6945_s2 = sld [smem:[#allocation11_spill]]  ;;  %s194_s28 = int_to_ptr.vmem [resolvable:$true] %s193_s28 }
   0xf   : > { %s6942_s25 = scalar_select %p5583_p4, 1, 0 }
  0x10   : > { %s6943_s26 = scalar_select %p5587_p5, 1, 0 }
  0x11   : > { %p5274_p6 = pneg %p5587_p5 }
  0x13   : > { %p5595_p7 = pnand %p5274_p6, %p5575_p1 }
  0x14   : > { %s5365_s6 = scalar_lea.hbm %s6945_s2, 256 }
  0x15   : > { %p5366_p8 = scmp.ne.s32.totalorder %s6945_s2, %s5365_s6  ;;  %p5367_p9 = pneg %p5595_p7 }
  0x16   : > { %p5372_p12 = scmp.lt.u32.totalorder %s5365_s6, %s6945_s2 }
  0x17   : > { %p5368_p10 = pnand %p5367_p9, %p5366_p8 }
  0x19   : > { %p5369_p11 = pneg %p5368_p10 }
  0x1b   : > { %p5374_p13 = pnand %p5372_p12, %p5369_p11 }
  0x1d   : > { %5377 = shalt.err (!%p5374_p13)
}
  0x1e   : > { %s5378_s11 = scalar_lea.vmem %s194_s28, 256  ;;  %p5386_p6 = scmp.lt.s32.totalorder %s194_s28, %s194_s28 }
  0x1f   : > { %p5379_p0 = scmp.ne.s32.totalorder %s194_s28, %s5378_s11  ;;  %p5387_p1 = scmp.lt.s32.totalorder %s5378_s11, %s5378_s11 }
  0x21   : > { %p5381_p2 = pnand %p5379_p0, %p5367_p9  ;;  %p5388_p4 = por %p5387_p1, %p5386_p6 }
  0x23   : > { %p5382_p3 = pneg %p5381_p2 }
  0x25   : > { %p5389_p5 = pnand %p5388_p4, %p5382_p3 }
  0x27   : > { %5392 = shalt.err (!%p5389_p5)
}
  0x28   : > { %s5496_s12 = smov 128   ;;  %s5497_s13 = smov 8  }
  0x29   : > { %5277 = dma.hbm_to_vmem [thread:$0]  (!%p5595_p7), %s6945_s2, 256, %s194_s28, [#allocation6], %s5496_s12, %s5496_s12, %s5497_s13  }
  0x2a   : > { %p160_p1 = scmp.eq.s32.totalorder %s4749_s23, 7  ;;  %s30_s27 = sadd.s32 1, %s5485_s20 }
  0x2b   : > { %p31_p4 = scmp.ge.s32.totalorder %s30_s27, 4  ;;  %s37_s30 = sadd.s32 1, %s5489_s21 }
  0x2c   : > { %p53_p5 = scmp.ne.s32.totalorder %s5473_s17, %s5469_s16  ;;  %p54_p8 = scmp.eq.s32.totalorder %s5493_s22, 0 }
  0x2d   : > { %s6964_s27 = smov (%p31_p4, %s30_s27), 0  ;;  %s6966_s30 = smov (!%p31_p4, %s37_s30), %s5489_s21 }
  0x2e   : > { %6946 = sst [smem:[#allocation10_spill]] %s6964_s27  ;;  %s42_s29 = ssub.s32 %s5485_s20, %s6964_s27 }
  0x2f   : > { %s46_s5 = sadd.s32 1, %s5473_s17  ;;  %p39_p9 = scmp.ge.s32.totalorder %s6966_s30, 2 }
  0x30   : > { %p5628_p7 = por %p160_p1, %p53_p5  ;;  %p5632_p10 = por %p54_p8, %p53_p5 }
  0x31   : > { %s215_s6 = sand.u32 1, %s5473_s17   ;;  %s6968_s30 = smov (%p39_p9, %s6966_s30), 0 }
  0x32   : > { %p5283_p11 = scmp.lt.s32.totalorder %s5493_s22, 8  ;;  %s4756_s7 = sshll.u32 %s215_s6, 2 }
  0x33   : > { %s41_s8 = ssub.s32 %s5489_s21, %s6968_s30  ;;  %s4757_s10 = sshll.u32 %s5489_s21, 2 }
  0x34   : > { %s43_s9 = sor.u32 %s42_s29, %s41_s8  ;;  %s224_s11 = sadd.s32 %s5485_s20, %s4757_s10 }
  0x35   : > { %p44_p12 = scmp.eq.s32.totalorder %s43_s9, 0  ;;  %s4758_s12 = sshll.u32 %s224_s11, 6 }
  0x36   : > { %s219_s13 = scalar_lea.vmem [#allocation3], %s4756_s7  ;;  %s5650_s4 = scalar_lea.hbm %s6929_s0, %s4758_s12 }
  0x37   : > { %s228_s14 = sshll.u32 %s219_s13, 4  ;;  %p5658_p13 = pnand %p5283_p11, %p5632_p10  ;;  %s5652_s14 = int_to_ptr.vmem [resolvable:$true] %s228_s14 }
  0x38   : > { %s5645_s15 = scalar_select %p44_p12, %s5473_s17, %s46_s5  }
  0x39   : > { %s216_s5 = scalar_lea.sflag [#allocation4], %s215_s6  ;;  %s5393_s7 = scalar_lea.hbm %s5650_s4, 64 }
  0x3a   : > { %p5394_p0 = scmp.ne.s32.totalorder %s5650_s4, %s5393_s7  ;;  %p5395_p2 = pneg %p5658_p13 }
  0x3b   : > { %s5398_s23 = scalar_lea.hbm %s6929_s0, 512  ;;  %p5399_p1 = scmp.lt.u32.totalorder %s5650_s4, %s6929_s0 }
  0x3c   : > { %p5396_p3 = pnand %p5395_p2, %p5394_p0  ;;  %p5400_p4 = scmp.lt.u32.totalorder %s5398_s23, %s5393_s7 }
  0x3d   : > { %p5402_p8 = scmp.lt.u32.totalorder %s5393_s7, %s5650_s4 }
  0x3e   : > { %p5397_p6 = pneg %p5396_p3  ;;  %p5401_p5 = por %p5400_p4, %p5399_p1 }
  0x40   : > { %p5403_p9 = por %p5402_p8, %p5401_p5 }
  0x42   : > { %p5404_p10 = pnand %p5403_p9, %p5397_p6 }
  0x44   : > { %5407 = shalt.err (!%p5404_p10)
}
  0x45   : > { %s5408_s6 = scalar_lea.vmem %s5652_s14, 64  ;;  %s5498_s10 = smov [#allocation3]  }
  0x46   : > { %p5409_p11 = scmp.ne.s32.totalorder %s5652_s14, %s5408_s6  ;;  %s5413_s11 = sshll.u32 %s5498_s10, 4  ;;  %s5414_s11 = int_to_ptr.vmem [resolvable:$false] %s5413_s11 }
  0x47   : > { %s5415_s12 = scalar_lea.vmem %s5414_s11, 128  ;;  %p5416_p3 = scmp.lt.s32.totalorder %s5652_s14, %s5414_s11 }
  0x48   : > { %p5411_p12 = pnand %p5409_p11, %p5395_p2  ;;  %p5417_p1 = scmp.lt.s32.totalorder %s5415_s12, %s5408_s6 }
  0x4a   : > { %p5412_p0 = pneg %p5411_p12  ;;  %p5418_p4 = por %p5417_p1, %p5416_p3 }
  0x4c   : > { %p5419_p5 = pnand %p5418_p4, %p5412_p0 }
  0x4e   : > { %5422 = shalt.err (!%p5419_p5)
}
  0x4f   : > { %5281 = dma.hbm_to_vmem [thread:$0]  (!%p5658_p13), %s5650_s4, 64, %s5652_s14, %s216_s5  }
  0x50   : > { %p6950_p6 = scmp.ne.s32.totalorder %s6943_s26, 0 }
  0x51   : > { %s239_s13 = sand.u32 (!%p6950_p6), 1, %s5469_s16   ;;  %p6951_p2 = scmp.ne.s32.totalorder (!%p6950_p6), %s6942_s25, 0 }
  0x52   : > { %237 = sbr.rel (%p6950_p6) target bundleno = 853 (0x355), region = 36  ;;  %s4760_s7 = sshll.u32 (!%p6950_p6), %s239_s13, 2 }
  0x53   : > { %s240_s2 = scalar_lea.sflag (!%p6950_p6), [#allocation4], %s239_s13  ;;  %s5690_s27 = scalar_lea.vmem (!%p6950_p6), [#allocation3], %s4760_s7 }
  0x59   : > { %5456 = dma.done.wait (%p6951_p2), %s240_s2, 64  }
  0x5a   : > { %5458 = vsyncadd (%p6951_p2), %s240_s2, 4294967232  ;;  %p6952_p8 = scmp.ne.s32.totalorder %s6941_s24, 0 }
  0x5c   : > { %5460 = dma.done.wait (%p6952_p8), [#allocation6], 256  }
  0x5d   : > { %5462 = vsyncadd (%p6952_p8), [#allocation6], 4294967040  ;;  %s5265_s4 = smul.u32 384, %s239_s13  ;;  %vm293_vm0 = vcmask 139264   ;;  %v5499_v0 = vmov 0.0   ;;  %vm360_vm1 = vcmask 1043456  }
  0x5e   : > { %v334_v1 = vld [vmem:[%s5690_s27] sm:$0xf]  ;;  %vm335_vm2 = vcmask 31744   ;;  %v327_v4 = vld [vmem:[%s6930_s1 + $0x8] sm:$0xff]  ;;  %v328_v6 = vld [vmem:[%s6930_s1 + $0x10] sm:$0xff]  ;;  %vm469_vm3 = vcmask 523264  }
  0x5f   : > { %s5700_s26 = scalar_lea.vmem [#allocation7], %s5265_s4  ;;  %v326_v2 = vld [vmem:[%s6930_s1] sm:$0xff]  ;;  %5057 = vmatprep.subr.msk.mxu0 %vm360_vm1, %v334_v1  ;;  %5199 = vmatprep.subr.msk.mxu1 %vm360_vm1, %v334_v1  ;;  %v331_v5 = vld [vmem:[%s6930_s1 + $0x28] sm:$0xff]  ;;  %v332_v7 = vld [vmem:[%s6930_s1 + $0x30] sm:$0xff]  ;;  %vm488_vm4 = vcmask 64512   ;;  %s5500_s4 = smov 120  }
  0x60   : > { %294 = vst.msk [vmem:[%s5700_s26] sm:$0x1] %vm293_vm0, %v5499_v0  ;;  %295 = vst.msk [vmem:[%s5700_s26 + $0x18] sm:$0x1] %vm293_vm0, %v5499_v0  ;;  %v330_v3 = vld [vmem:[%s6930_s1 + $0x20] sm:$0xff]  ;;  %5058 = vmatpush3.msk.msra.mxu0 %vm360_vm1, %v334_v1  ;;  %5200 = vmatpush3.msk.msra.mxu1 %vm360_vm1, %v334_v1  ;;  %v329_v8 = vld [vmem:[%s6930_s1 + $0x18] sm:$0xff] }
  0x61   : > { %296 = vst.msk [vmem:[%s5700_s26 + $0x30] sm:$0x1] %vm293_vm0, %v5499_v0  ;;  %297 = vst.msk [vmem:[%s5700_s26 + $0x48] sm:$0x1] %vm293_vm0, %v5499_v0  ;;  %5059 = vmatprep.mubr.msk.f32.mxu0 %vm335_vm2, %v326_v2  ;;  %5065 = vmatprep.mubr.msk.f32.mxu1 %vm335_vm2, %v330_v3  ;;  %v333_v9 = vld [vmem:[%s6930_s1 + $0x38] sm:$0xff]  ;;  %v5799_v10 = vld [vmem:[#allocation5] sm:$0xff] }
  0x62   : > { %298 = vst.msk [vmem:[%s5700_s26 + $0x60] sm:$0x1] %vm293_vm0, %v5499_v0  ;;  %299 = vst.msk [vmem:[%s5700_s26 + $0x78] sm:$0x1] %vm293_vm0, %v5499_v0  ;;  %5060 = vmatmul.mubr.msk.f32.vlgmr.msra.gmra.mrb[0].mxu0 %vm335_vm2, %v327_v4  ;;  %5066 = vmatmul.mubr.msk.f32.vlgmr.msra.gmra.mrb[0].mxu1 %vm335_vm2, %v331_v5  ;;  %v5805_v11 = vld [vmem:[#allocation5 + $0x8] sm:$0xff]  ;;  %s5501_s24 = smov 104  }
  0x63   : > { %300 = vst.msk [vmem:[%s5700_s26 + $0x90] sm:$0x1] %vm293_vm0, %v5499_v0  ;;  %301 = vst.msk [vmem:[%s5700_s26 + $0xa8] sm:$0x1] %vm293_vm0, %v5499_v0  ;;  %5062 = vmatprep.mubr.msk.f32.mxu0 %vm335_vm2, %v328_v6  ;;  %5068 = vmatprep.mubr.msk.f32.mxu1 %vm335_vm2, %v332_v7  ;;  %s5502_s25 = smov 112   ;;  %s5503_s14 = smov 88  }
  0x64   : > { %302 = vst.msk [vmem:[%s5700_s26 + $0xc0] sm:$0x1] %vm293_vm0, %v5499_v0  ;;  %303 = vst.msk [vmem:[%s5700_s26 + $0xd8] sm:$0x1] %vm293_vm0, %v5499_v0  ;;  %5071 = vmatprep.subr.mxu1 %v5799_v10  ;;  %5087 = vmatprep.subr.mxu0 %v5799_v10  ;;  %s5504_s29 = smov 96   ;;  %s5505_s5 = smov 80  }
  0x65   : > { %304 = vst.msk [vmem:[%s5700_s26 + $0xf0] sm:$0x1] %vm293_vm0, %v5499_v0  ;;  %305 = vst.msk [vmem:[%s5700_s26 + $0x108] sm:$0x1] %vm293_vm0, %v5499_v0  ;;  %5072 = vmatpush3.msra.mxu1 %v5799_v10  ;;  %5088 = vmatpush3.msra.mxu0 %v5799_v10  ;;  %s5506_s23 = smov 72   ;;  %s5267_s8 = smul.u32 (%p5628_p7), 192, %s5481_s19 }
  0x66   : > { %306 = vst.msk [vmem:[%s5700_s26 + $0x120] sm:$0x1] %vm293_vm0, %v5499_v0  ;;  %307 = vst.msk [vmem:[%s5700_s26 + $0x138] sm:$0x1] %vm293_vm0, %v5499_v0  ;;  %5063 = vmatmul.mubr.msk.f32.gmra.mrb[2].mxu0 %vm335_vm2, %v329_v8  ;;  %5069 = vmatmul.mubr.msk.f32.gmra.mrb[2].mxu1 %vm335_vm2, %v333_v9  ;;  %s6953_s6 = sld [smem:[#allocation12_spill]] (%p5628_p7) }
  0x67   : > { %308 = vst.msk [vmem:[%s5700_s26 + $0x150] sm:$0x1] %vm293_vm0, %v5499_v0  ;;  %309 = vst.msk [vmem:[%s5700_s26 + $0x168] sm:$0x1] %vm293_vm0, %v5499_v0  ;;  %5079 = vmatprep.subr.mxu1 %v5805_v11  ;;  %5095 = vmatprep.subr.mxu0 %v5805_v11 }
  0x68   : > { %310 = vst.msk [vmem:[%s5700_s26 + $0x11] sm:$0x1] %vm293_vm0, %v5499_v0  ;;  %311 = vst.msk [vmem:[%s5700_s26 + $0x29] sm:$0x1] %vm293_vm0, %v5499_v0 }
  0x69   : > { %312 = vst.msk [vmem:[%s5700_s26 + $0x41] sm:$0x1] %vm293_vm0, %v5499_v0  ;;  %313 = vst.msk [vmem:[%s5700_s26 + $0x59] sm:$0x1] %vm293_vm0, %v5499_v0 }
  0x6a   : > { %314 = vst.msk [vmem:[%s5700_s26 + $0x71] sm:$0x1] %vm293_vm0, %v5499_v0  ;;  %315 = vst.msk [vmem:[%s5700_s26 + $0x89] sm:$0x1] %vm293_vm0, %v5499_v0 }
  0x6b   : > { %316 = vst.msk [vmem:[%s5700_s26 + $0xa1] sm:$0x1] %vm293_vm0, %v5499_v0  ;;  %317 = vst.msk [vmem:[%s5700_s26 + $0xb9] sm:$0x1] %vm293_vm0, %v5499_v0 }
  0x6c   : > { %318 = vst.msk [vmem:[%s5700_s26 + $0xd1] sm:$0x1] %vm293_vm0, %v5499_v0  ;;  %319 = vst.msk [vmem:[%s5700_s26 + $0xe9] sm:$0x1] %vm293_vm0, %v5499_v0 }
  0x6d   : > { %320 = vst.msk [vmem:[%s5700_s26 + $0x101] sm:$0x1] %vm293_vm0, %v5499_v0  ;;  %321 = vst.msk [vmem:[%s5700_s26 + $0x119] sm:$0x1] %vm293_vm0, %v5499_v0 }
  0x6e   : > { %322 = vst.msk [vmem:[%s5700_s26 + $0x131] sm:$0x1] %vm293_vm0, %v5499_v0  ;;  %323 = vst.msk [vmem:[%s5700_s26 + $0x149] sm:$0x1] %vm293_vm0, %v5499_v0 }
  0x6f   : > { %324 = vst.msk [vmem:[%s5700_s26 + $0x161] sm:$0x1] %vm293_vm0, %v5499_v0  ;;  %325 = vst.msk [vmem:[%s5700_s26 + $0x179] sm:$0x1] %vm293_vm0, %v5499_v0 }
 0x135   : > { %v5061_v12 = vpop.f32.mrb[0].mxu0  ;;  %v5067_v13 = vpop.f32.mrb[0].mxu1 }
 0x136   : > { %471 = vst.msk [vmem:[#allocation2 + $0x8] sm:$0xff] %vm469_vm3, %v5061_v12  ;;  %475 = vst.msk [vmem:[#allocation2 + $0x28] sm:$0xff] %vm469_vm3, %v5067_v13  ;;  %v430_v14 = vpop.f32.mrb[1].mxu0  ;;  %v450_v15 = vpop.f32.mrb[1].mxu1 }
 0x137   : > { %470 = vst.msk [vmem:[#allocation2] sm:$0xff] %vm469_vm3, %v430_v14  ;;  %474 = vst.msk [vmem:[#allocation2 + $0x20] sm:$0xff] %vm469_vm3, %v450_v15  ;;  %v5507_v15 = vmov 1966171168  }
 0x139   : > { %v5064_v16 = vpop.f32.mrb[2].mxu0  ;;  %v5070_v17 = vpop.f32.mrb[2].mxu1 }
 0x13a   : > { %473 = vst.msk [vmem:[#allocation2 + $0x18] sm:$0xff] %vm469_vm3, %v5064_v16  ;;  %v440_v18 = vpop.f32.mrb[3].mxu0  ;;  %477 = vst.msk [vmem:[#allocation2 + $0x38] sm:$0xff] %vm469_vm3, %v5070_v17  ;;  %v460_v19 = vpop.f32.mrb[3].mxu1  ;;  %v698_v16 = vunpack.c.l.s4 %v5507_v15  ;;  %v700_v17 = vlaneseq }
 0x13b   : > { %472 = vst.msk [vmem:[#allocation2 + $0x10] sm:$0xff] %vm469_vm3, %v440_v18  ;;  %476 = vst.msk [vmem:[#allocation2 + $0x30] sm:$0xff] %vm469_vm3, %v460_v19 }
 0x13d   : > { %v5817_v20 = vld [vmem:[#allocation2 + $0x28] sm:$0xff] }
 0x13e   : > { %v5819_v21 = vld [vmem:[#allocation2 + $0x8] sm:$0xff]  ;;  %1083 = vrot.lane.b32.xlu1 %v5817_v20, %s5500_s4  ;;  %v484_v22 = vld [vmem:[#allocation2] sm:$0xff] }
 0x13f   : > { %970 = vrot.lane.b32.xlu0 %v5819_v21, %s5500_s4  ;;  %5073 = vmatprep.mubr.msk.f32.mxu1 %vm488_vm4, %v484_v22  ;;  %v590_v25 = vld [vmem:[#allocation2 + $0x20] sm:$0xff] }
 0x140   : > { %5074 = vmatmul.mubr.msk.f32.vlgmr.msra.gmra.mrb[4].mxu1 %vm488_vm4, %v5819_v21 }
 0x141   : > { %v487_v23 = vld [vmem:[#allocation2 + $0x18] sm:$0xff]  ;;  %5080 = vmatpush3.msra.mxu1 %v5805_v11 }
 0x142   : > { %1950 = vrot.lane.b32.xlu1 %v5819_v21, %s5501_s24  ;;  %v486_v24 = vld [vmem:[#allocation2 + $0x10] sm:$0xff]  ;;  %5103 = vmatprep.subr.mxu1 %v5799_v10  ;;  %v593_v27 = vld [vmem:[#allocation2 + $0x38] sm:$0xff] }
 0x143   : > { %1460 = vrot.lane.b32.xlu0 %v5819_v21, %s5502_s25  ;;  %5076 = vmatprep.mubr.msk.f32.mxu1 %vm488_vm4, %v486_v24  ;;  %v592_v26 = vld [vmem:[#allocation2 + $0x30] sm:$0xff] }
 0x144   : > { %5077 = vmatmul.mubr.msk.f32.gmra.mrb[6].mxu1 %vm488_vm4, %v487_v23 }
 0x145   : > { %5081 = vmatprep.mubr.msk.f32.mxu1 %vm488_vm4, %v590_v25 }
 0x146   : > { %2063 = vrot.lane.b32.xlu1 %v5817_v20, %s5501_s24 }
 0x147   : > { %1573 = vrot.lane.b32.xlu0 %v5817_v20, %s5502_s25 }
 0x148   : > { %5082 = vmatmul.mubr.msk.f32.vlgmr.msra.gmra.mrb[4].mxu1 %vm488_vm4, %v5817_v20 }
 0x149   : > { %5084 = vmatprep.mubr.msk.f32.mxu1 %vm488_vm4, %v592_v26  ;;  %5104 = vmatpush3.msra.mxu1 %v5799_v10 }
 0x14a   : > { %2930 = vrot.lane.b32.xlu1 %v5819_v21, %s5503_s14  ;;  %5111 = vmatprep.subr.mxu1 %v5805_v11 }
 0x14b   : > { %2440 = vrot.lane.b32.xlu0 %v5819_v21, %s5504_s29 }
 0x14c   : > { %5085 = vmatmul.mubr.msk.f32.gmra.mrb[6].mxu1 %vm488_vm4, %v593_v27 }
 0x14e   : > { %1948 = vrot.lane.b32.xlu1 %v484_v22, %s5501_s24 }
 0x14f   : > { %968 = vrot.lane.b32.xlu0 %v484_v22, %s5500_s4 }
 0x152   : > { %2061 = vrot.lane.b32.xlu1 %v590_v25, %s5501_s24 }
 0x153   : > { %1081 = vrot.lane.b32.xlu0 %v590_v25, %s5500_s4 }
 0x156   : > { %2928 = vrot.lane.b32.xlu1 %v484_v22, %s5503_s14 }
 0x157   : > { %1458 = vrot.lane.b32.xlu0 %v484_v22, %s5502_s25 }
 0x15a   : > { %974 = vrot.lane.b32.xlu1 %v487_v23, %s5500_s4 }
 0x15b   : > { %1571 = vrot.lane.b32.xlu0 %v590_v25, %s5502_s25 }
 0x15e   : > { %1087 = vrot.lane.b32.xlu1 %v593_v27, %s5500_s4 }
 0x15f   : > { %2438 = vrot.lane.b32.xlu0 %v484_v22, %s5504_s29 }
 0x162   : > { %1954 = vrot.lane.b32.xlu1 %v487_v23, %s5501_s24 }
 0x163   : > { %2551 = vrot.lane.b32.xlu0 %v590_v25, %s5504_s29 }
 0x166   : > { %2067 = vrot.lane.b32.xlu1 %v593_v27, %s5501_s24 }
 0x167   : > { %1464 = vrot.lane.b32.xlu0 %v487_v23, %s5502_s25 }
 0x16a   : > { %2934 = vrot.lane.b32.xlu1 %v487_v23, %s5503_s14 }
 0x16b   : > { %1577 = vrot.lane.b32.xlu0 %v593_v27, %s5502_s25 }
 0x16e   : > { %972 = vrot.lane.b32.xlu1 %v486_v24, %s5500_s4 }
 0x16f   : > { %2444 = vrot.lane.b32.xlu0 %v487_v23, %s5504_s29 }
 0x172   : > { %3041 = vrot.lane.b32.xlu1 %v590_v25, %s5503_s14 }
 0x173   : > { %2553 = vrot.lane.b32.xlu0 %v5817_v20, %s5504_s29 }
 0x176   : > { %3043 = vrot.lane.b32.xlu1 %v5817_v20, %s5503_s14 }
 0x177   : > { %1085 = vrot.lane.b32.xlu0 %v592_v26, %s5500_s4 }
 0x17a   : > { %3047 = vrot.lane.b32.xlu1 %v593_v27, %s5503_s14 }
 0x17b   : > { %2557 = vrot.lane.b32.xlu0 %v593_v27, %s5504_s29 }
 0x17e   : > { %1952 = vrot.lane.b32.xlu1 %v486_v24, %s5501_s24 }
 0x17f   : > { %1462 = vrot.lane.b32.xlu0 %v486_v24, %s5502_s25 }
 0x182   : > { %3908 = vrot.lane.b32.xlu1 %v484_v22, %s5506_s23 }
 0x183   : > { %3418 = vrot.lane.b32.xlu0 %v484_v22, %s5505_s5 }
 0x186   : > { %2065 = vrot.lane.b32.xlu1 %v592_v26, %s5501_s24 }
 0x187   : > { %1575 = vrot.lane.b32.xlu0 %v592_v26, %s5502_s25 }
 0x18a   : > { %3910 = vrot.lane.b32.xlu1 %v5819_v21, %s5506_s23 }
 0x18b   : > { %3420 = vrot.lane.b32.xlu0 %v5819_v21, %s5505_s5 }
 0x18e   : > { %2932 = vrot.lane.b32.xlu1 %v486_v24, %s5503_s14 }
 0x18f   : > { %2442 = vrot.lane.b32.xlu0 %v486_v24, %s5504_s29 }
 0x192   : > { %3914 = vrot.lane.b32.xlu1 %v487_v23, %s5506_s23 }
 0x193   : > { %3424 = vrot.lane.b32.xlu0 %v487_v23, %s5505_s5  ;;  %v5977_v23 = vld [vmem:[%s6932_s3 + $0x8] sm:$0xff] }
 0x196   : > { %3045 = vrot.lane.b32.xlu1 %v592_v26, %s5503_s14 }
 0x197   : > { %2555 = vrot.lane.b32.xlu0 %v592_v26, %s5504_s29 }
 0x19a   : > { %4021 = vrot.lane.b32.xlu1 %v590_v25, %s5506_s23 }
 0x19b   : > { %3531 = vrot.lane.b32.xlu0 %v590_v25, %s5505_s5 }
 0x19e   : > { %3912 = vrot.lane.b32.xlu1 %v486_v24, %s5506_s23 }
 0x19f   : > { %3422 = vrot.lane.b32.xlu0 %v486_v24, %s5505_s5 }
 0x1a2   : > { %4023 = vrot.lane.b32.xlu1 %v5817_v20, %s5506_s23 }
 0x1a3   : > { %3533 = vrot.lane.b32.xlu0 %v5817_v20, %s5505_s5  ;;  %v701_v20 = vshrl.u32 %v700_v17, 7 }
 0x1a6   : > { %4025 = vrot.lane.b32.xlu1 %v592_v26, %s5506_s23 }
 0x1a7   : > { %3535 = vrot.lane.b32.xlu0 %v592_v26, %s5505_s5  ;;  %v5984_v26 = vld [vmem:[%s6932_s3] sm:$0xff] }
 0x1aa   : > { %4027 = vrot.lane.b32.xlu1 %v593_v27, %s5506_s23  ;;  %s5266_s23 = smul.u32 (%p5628_p7), 6, %s5477_s18 }
 0x1ab   : > { %3537 = vrot.lane.b32.xlu0 %v593_v27, %s5505_s5 }
 0x1ac   : > { %s4403_s28 = sadd.s32 (%p5628_p7), %s5267_s8, %s5266_s23 }
 0x1ad   : > { %s4965_s18 = sshll.u32 (%p5628_p7), %s4403_s28, 3 }
 0x1ae   : > { %s6822_s10 = scalar_lea.vmem (%p5628_p7), %s6953_s6, %s4965_s18 }
 0x1b0   : > { %v1084_v28 = vpop.permute.xlu1 %1083 }
 0x1b1   : > { %v971_v29 = vpop.permute.xlu0 %970 }
 0x1b4   : > { %v1951_v30 = vpop.permute.xlu1 %1950 }
 0x1b5   : > { %v1461_v31 = vpop.permute.xlu0 %1460 }
 0x1b8   : > { %v2064_v32 = vpop.permute.xlu1 %2063 }
 0x1b9   : > { %v1574_v33 = vpop.permute.xlu0 %1573 }
 0x1bc   : > { %v5889_v34 = vpop.permute.xlu1 %2930 }
 0x1bd   : > { %v5891_v35 = vpop.permute.xlu0 %2440 }
 0x1c0   : > { %v1949_v36 = vpop.permute.xlu1 %1948 }
 0x1c1   : > { %v969_v37 = vpop.permute.xlu0 %968 }
 0x1c2   : > { %5089 = vmatprep.mubr.msk.f32.mxu0 %vm488_vm4, %v969_v37 }
 0x1c3   : > { %5090 = vmatmul.mubr.msk.f32.vlgmr.msra.gmra.mrb[4].mxu0 %vm488_vm4, %v971_v29 }
 0x1c4   : > { %5096 = vmatpush3.msra.mxu0 %v5805_v11  ;;  %v2062_v38 = vpop.permute.xlu1 %2061 }
 0x1c5   : > { %v1082_v39 = vpop.permute.xlu0 %1081  ;;  %5119 = vmatprep.subr.mxu0 %v5799_v10 }
 0x1c8   : > { %v2929_v40 = vpop.permute.xlu1 %2928 }
 0x1c9   : > { %v1459_v41 = vpop.permute.xlu0 %1458 }
 0x1ca   : > { %5105 = vmatprep.mubr.msk.f32.mxu1 %vm488_vm4, %v1459_v41 }
 0x1cb   : > { %5106 = vmatmul.mubr.msk.f32.vlgmr.msra.gmra.mrb[8].mxu1 %vm488_vm4, %v1461_v31 }
 0x1cc   : > { %5112 = vmatpush3.msra.mxu1 %v5805_v11  ;;  %v975_v43 = vpop.permute.xlu1 %974 }
 0x1cd   : > { %v1572_v42 = vpop.permute.xlu0 %1571  ;;  %5135 = vmatprep.subr.mxu1 %v5799_v10 }
 0x1d0   : > { %v1088_v45 = vpop.permute.xlu1 %1087 }
 0x1d1   : > { %v2439_v44 = vpop.permute.xlu0 %2438 }
 0x1d4   : > { %v1955_v47 = vpop.permute.xlu1 %1954 }
 0x1d5   : > { %v5901_v46 = vpop.permute.xlu0 %2551 }
 0x1d8   : > { %v2068_v49 = vpop.permute.xlu1 %2067 }
 0x1d9   : > { %v1465_v48 = vpop.permute.xlu0 %1464 }
 0x1dc   : > { %v2935_v51 = vpop.permute.xlu1 %2934 }
 0x1dd   : > { %v1578_v50 = vpop.permute.xlu0 %1577 }
 0x1e0   : > { %v973_v53 = vpop.permute.xlu1 %972 }
 0x1e1   : > { %v2445_v52 = vpop.permute.xlu0 %2444  ;;  %5092 = vmatprep.mubr.msk.f32.mxu0 %vm488_vm4, %v973_v53 }
 0x1e2   : > { %5093 = vmatmul.mubr.msk.f32.gmra.mrb[6].mxu0 %vm488_vm4, %v975_v43 }
 0x1e3   : > { %5097 = vmatprep.mubr.msk.f32.mxu0 %vm488_vm4, %v1082_v39 }
 0x1e4   : > { %v3042_v55 = vpop.permute.xlu1 %3041 }
 0x1e5   : > { %v2554_v54 = vpop.permute.xlu0 %2553 }
 0x1e6   : > { %5098 = vmatmul.mubr.msk.f32.vlgmr.msra.gmra.mrb[4].mxu0 %vm488_vm4, %v1084_v28 }
 0x1e7   : > { %5120 = vmatpush3.msra.mxu0 %v5799_v10 }
 0x1e8   : > { %v3044_v57 = vpop.permute.xlu1 %3043  ;;  %5127 = vmatprep.subr.mxu0 %v5805_v11 }
 0x1e9   : > { %v1086_v56 = vpop.permute.xlu0 %1085 }
 0x1ea   : > { %5100 = vmatprep.mubr.msk.f32.mxu0 %vm488_vm4, %v1086_v56 }
 0x1eb   : > { %5101 = vmatmul.mubr.msk.f32.gmra.mrb[6].mxu0 %vm488_vm4, %v1088_v45 }
 0x1ec   : > { %5121 = vmatprep.mubr.msk.f32.mxu0 %vm488_vm4, %v1949_v36  ;;  %v3048_v59 = vpop.permute.xlu1 %3047 }
 0x1ed   : > { %v2558_v58 = vpop.permute.xlu0 %2557 }
 0x1ef   : > { %5122 = vmatmul.mubr.msk.f32.vlgmr.msra.gmra.mrb[8].mxu0 %vm488_vm4, %v1951_v30 }
 0x1f0   : > { %5128 = vmatpush3.msra.mxu0 %v5805_v11  ;;  %v1953_v61 = vpop.permute.xlu1 %1952 }
 0x1f1   : > { %v1463_v60 = vpop.permute.xlu0 %1462  ;;  %5151 = vmatprep.subr.mxu0 %v5799_v10  ;;  %5124 = vmatprep.mubr.msk.f32.mxu0 %vm488_vm4, %v1953_v61 }
 0x1f2   : > { %5108 = vmatprep.mubr.msk.f32.mxu1 %vm488_vm4, %v1463_v60 }
 0x1f3   : > { %5109 = vmatmul.mubr.msk.f32.gmra.mrb[10].mxu1 %vm488_vm4, %v1465_v48  ;;  %5125 = vmatmul.mubr.msk.f32.gmra.mrb[10].mxu0 %vm488_vm4, %v1955_v47 }
 0x1f4   : > { %5113 = vmatprep.mubr.msk.f32.mxu1 %vm488_vm4, %v1572_v42  ;;  %5129 = vmatprep.mubr.msk.f32.mxu0 %vm488_vm4, %v2062_v38  ;;  %v3909_v63 = vpop.permute.xlu1 %3908 }
 0x1f5   : > { %v3419_v62 = vpop.permute.xlu0 %3418 }
 0x1f7   : > { %5114 = vmatmul.mubr.msk.f32.vlgmr.msra.gmra.mrb[8].mxu1 %vm488_vm4, %v1574_v33  ;;  %5130 = vmatmul.mubr.msk.f32.vlgmr.msra.gmra.mrb[8].mxu0 %vm488_vm4, %v2064_v32 }
 0x1f8   : > { %5136 = vmatpush3.msra.mxu1 %v5799_v10  ;;  %5152 = vmatpush3.msra.mxu0 %v5799_v10  ;;  %v2066_v1 = vpop.permute.xlu1 %2065 }
 0x1f9   : > { %v1576_v0 = vpop.permute.xlu0 %1575  ;;  %5159 = vmatprep.subr.mxu0 %v5805_v11  ;;  %5143 = vmatprep.subr.mxu1 %v5805_v11 }
 0x1fa   : > { %5116 = vmatprep.mubr.msk.f32.mxu1 %vm488_vm4, %v1576_v0  ;;  %5132 = vmatprep.mubr.msk.f32.mxu0 %vm488_vm4, %v2066_v1 }
 0x1fb   : > { %5117 = vmatmul.mubr.msk.f32.gmra.mrb[10].mxu1 %vm488_vm4, %v1578_v50  ;;  %5133 = vmatmul.mubr.msk.f32.gmra.mrb[10].mxu0 %vm488_vm4, %v2068_v49 }
 0x1fc   : > { %5137 = vmatprep.mubr.msk.f32.mxu1 %vm488_vm4, %v2439_v44  ;;  %5153 = vmatprep.mubr.msk.f32.mxu0 %vm488_vm4, %v2929_v40  ;;  %v3911_v3 = vpop.permute.xlu1 %3910 }
 0x1fd   : > { %v3421_v2 = vpop.permute.xlu0 %3420 }
 0x1ff   : > { %5138 = vmatmul.mubr.msk.f32.vlgmr.msra.gmra.mrb[12].mxu1 %vm488_vm4, %v5891_v35  ;;  %5154 = vmatmul.mubr.msk.f32.vlgmr.msra.gmra.mrb[12].mxu0 %vm488_vm4, %v5889_v34  ;;  %v5994_v34 = vld [vmem:[%s6932_s3 + $0x18] sm:$0xff]  ;;  %v5999_v35 = vld [vmem:[%s6932_s3 + $0x10] sm:$0xff] }
 0x200   : > { %5144 = vmatpush3.msra.mxu1 %v5805_v11  ;;  %5160 = vmatpush3.msra.mxu0 %v5805_v11  ;;  %v2933_v5 = vpop.permute.xlu1 %2932 }
 0x201   : > { %v2443_v4 = vpop.permute.xlu0 %2442  ;;  %5183 = vmatprep.subr.mxu0 %v5799_v10  ;;  %5167 = vmatprep.subr.mxu1 %v5799_v10 }
 0x202   : > { %5140 = vmatprep.mubr.msk.f32.mxu1 %vm488_vm4, %v2443_v4  ;;  %5156 = vmatprep.mubr.msk.f32.mxu0 %vm488_vm4, %v2933_v5 }
 0x203   : > { %5141 = vmatmul.mubr.msk.f32.gmra.mrb[14].mxu1 %vm488_vm4, %v2445_v52  ;;  %5157 = vmatmul.mubr.msk.f32.gmra.mrb[14].mxu0 %vm488_vm4, %v2935_v51 }
 0x204   : > { %5145 = vmatprep.mubr.msk.f32.mxu1 %vm488_vm4, %v5901_v46  ;;  %5161 = vmatprep.mubr.msk.f32.mxu0 %vm488_vm4, %v3042_v55  ;;  %v3915_v7 = vpop.permute.xlu1 %3914 }
 0x205   : > { %v3425_v6 = vpop.permute.xlu0 %3424 }
 0x207   : > { %5146 = vmatmul.mubr.msk.f32.vlgmr.msra.gmra.mrb[12].mxu1 %vm488_vm4, %v2554_v54  ;;  %5162 = vmatmul.mubr.msk.f32.vlgmr.msra.gmra.mrb[12].mxu0 %vm488_vm4, %v3044_v57 }
 0x208   : > { %5168 = vmatpush3.msra.mxu1 %v5799_v10  ;;  %5184 = vmatpush3.msra.mxu0 %v5799_v10  ;;  %v3046_v9 = vpop.permute.xlu1 %3045 }
 0x209   : > { %v2556_v8 = vpop.permute.xlu0 %2555  ;;  %5191 = vmatprep.subr.mxu0 %v5805_v11  ;;  %5175 = vmatprep.subr.mxu1 %v5805_v11 }
 0x20a   : > { %5148 = vmatprep.mubr.msk.f32.mxu1 %vm488_vm4, %v2556_v8  ;;  %5164 = vmatprep.mubr.msk.f32.mxu0 %vm488_vm4, %v3046_v9 }
 0x20b   : > { %5149 = vmatmul.mubr.msk.f32.gmra.mrb[14].mxu1 %vm488_vm4, %v2558_v58  ;;  %5165 = vmatmul.mubr.msk.f32.gmra.mrb[14].mxu0 %vm488_vm4, %v3048_v59 }
 0x20c   : > { %5169 = vmatprep.mubr.msk.f32.mxu1 %vm488_vm4, %v3419_v62  ;;  %5185 = vmatprep.mubr.msk.f32.mxu0 %vm488_vm4, %v3909_v63  ;;  %v4022_v10 = vpop.permute.xlu1 %4021 }
 0x20d   : > { %v3532_v12 = vpop.permute.xlu0 %3531 }
 0x20f   : > { %5170 = vmatmul.mubr.msk.f32.vlgmr.msra.gmra.mrb[16].mxu1 %vm488_vm4, %v3421_v2  ;;  %5186 = vmatmul.mubr.msk.f32.vlgmr.msra.gmra.mrb[16].mxu0 %vm488_vm4, %v3911_v3 }
 0x210   : > { %5176 = vmatpush3.msra.mxu1 %v5805_v11  ;;  %5192 = vmatpush3.msra.mxu0 %v5805_v11  ;;  %v3913_v14 = vpop.permute.xlu1 %3912  ;;  %v699_v11 = vunpack.c.0.s8 %v698_v16 }
 0x211   : > { %v3423_v13 = vpop.permute.xlu0 %3422  ;;  %5188 = vmatprep.mubr.msk.f32.mxu0 %vm488_vm4, %v3913_v14 }
 0x212   : > { %5172 = vmatprep.mubr.msk.f32.mxu1 %vm488_vm4, %v3423_v13  ;;  %v5979_v24 = vsub.s32 %v699_v11, %v701_v20 }
 0x213   : > { %5173 = vmatmul.mubr.msk.f32.gmra.mrb[18].mxu1 %vm488_vm4, %v3425_v6  ;;  %5189 = vmatmul.mubr.msk.f32.gmra.mrb[18].mxu0 %vm488_vm4, %v3915_v7 }
 0x214   : > { %5177 = vmatprep.mubr.msk.f32.mxu1 %vm488_vm4, %v3532_v12  ;;  %5193 = vmatprep.mubr.msk.f32.mxu0 %vm488_vm4, %v4022_v10  ;;  %v4024_v19 = vpop.permute.xlu1 %4023 }
 0x215   : > { %v3534_v18 = vpop.permute.xlu0 %3533 }
 0x217   : > { %5178 = vmatmul.mubr.msk.f32.vlgmr.msra.gmra.mrb[16].mxu1 %vm488_vm4, %v3534_v18  ;;  %5194 = vmatmul.mubr.msk.f32.vlgmr.msra.gmra.mrb[16].mxu0 %vm488_vm4, %v4024_v19 }
 0x218   : > { %v4026_v22 = vpop.permute.xlu1 %4025 }
 0x219   : > { %v3536_v21 = vpop.permute.xlu0 %3535  ;;  %5196 = vmatprep.mubr.msk.f32.mxu0 %vm488_vm4, %v4026_v22 }
 0x21a   : > { %5180 = vmatprep.mubr.msk.f32.mxu1 %vm488_vm4, %v3536_v21 }
 0x21b   : > { %v5083_v25 = vpop.f32.mrb[4].mxu1 }
 0x21c   : > { %v5201_v27 = vadd.f32 %v5083_v25, %v5977_v23  ;;  %v4028_v29 = vpop.permute.xlu1 %4027  ;;  %v672_v30 = vpop.f32.mrb[5].mxu1 }
 0x21d   : > { %v3538_v28 = vpop.permute.xlu0 %3537  ;;  %5197 = vmatmul.mubr.msk.f32.gmra.mrb[18].mxu0 %vm488_vm4, %v4028_v29  ;;  %v5202_v33 = vadd.f32 %v672_v30, %v5984_v26 }
 0x21e   : > { %5181 = vmatmul.mubr.msk.f32.gmra.mrb[18].mxu1 %vm488_vm4, %v3538_v28  ;;  %v762_v31 = vcombine.high %v5201_v27, %v5201_v27  ;;  %v769_v32 = vrot.slane %v5201_v27, %v5979_v24 }
 0x21f   : > { %v5086_v36 = vpop.f32.mrb[6].mxu1  ;;  %v696_v40 = vcombine.high %v5202_v33, %v5202_v33  ;;  %v703_v42 = vrot.slane %v5202_v33, %v5979_v24 }
 0x220   : > { %v776_v37 = vrot.slane %v762_v31, %v5979_v24  ;;  %v777_v38 = vcombine.high %v769_v32, %v769_v32  ;;  %v785_v39 = vrot.slane %v769_v32, %v5979_v24  ;;  %v682_v41 = vpop.f32.mrb[7].mxu1  ;;  %v5203_v43 = vadd.f32 %v5086_v36, %v5994_v34 }
 0x221   : > { %v5204_v44 = vadd.f32 %v682_v41, %v5999_v35  ;;  %v710_v49 = vrot.slane %v696_v40, %v5979_v24  ;;  %v711_v50 = vcombine.high %v703_v42, %v703_v42  ;;  %v719_v51 = vrot.slane %v703_v42, %v5979_v24 }
 0x222   : > { %v778_v45 = vcombine.high %v776_v37, %v776_v37  ;;  %v792_v46 = vrot.slane %v776_v37, %v5979_v24  ;;  %v799_v47 = vrot.slane %v777_v38, %v5979_v24  ;;  %v807_v48 = vcombine.high %v785_v39, %v785_v39  ;;  %819 = vst.msk [vmem:[%s5700_s26 + $0x2] sm:$0x1] %vm293_vm0, %v785_v39 }
 0x223   : > { %v895_v52 = vcombine.high %v5203_v43, %v5203_v43  ;;  %v902_v56 = vrot.slane %v5203_v43, %v5979_v24  ;;  %v712_v57 = vcombine.high %v710_v49, %v710_v49  ;;  %v726_v58 = vrot.slane %v710_v49, %v5979_v24  ;;  %753 = vst.msk [vmem:[%s5700_s26 + $0x1] sm:$0x1] %vm293_vm0, %v719_v51 }
 0x224   : > { %v806_v53 = vrot.slane %v778_v45, %v5979_v24  ;;  %v808_v54 = vcombine.high %v792_v46, %v792_v46  ;;  %v809_v55 = vcombine.high %v799_v47, %v799_v47  ;;  %820 = vst.msk [vmem:[%s5700_s26 + $0x32] sm:$0x1] %vm293_vm0, %v799_v47  ;;  %821 = vst.msk [vmem:[%s5700_s26 + $0x62] sm:$0x1] %vm293_vm0, %v807_v48 }
 0x225   : > { %823 = vst.msk [vmem:[%s5700_s26 + $0xc2] sm:$0x1] %vm293_vm0, %v792_v46  ;;  %v733_v59 = vrot.slane %v711_v50, %v5979_v24  ;;  %v741_v60 = vcombine.high %v719_v51, %v719_v51  ;;  %v909_v62 = vrot.slane %v895_v52, %v5979_v24  ;;  %v910_v63 = vcombine.high %v902_v56, %v902_v56 }
 0x226   : > { %v810_v61 = vcombine.high %v806_v53, %v806_v53  ;;  %822 = vst.msk [vmem:[%s5700_s26 + $0x92] sm:$0x1] %vm293_vm0, %v809_v55  ;;  %824 = vst.msk [vmem:[%s5700_s26 + $0xf2] sm:$0x1] %vm293_vm0, %v806_v53  ;;  %v918_v0 = vrot.slane %v902_v56, %v5979_v24  ;;  %v740_v1 = vrot.slane %v712_v57, %v5979_v24 }
 0x227   : > { %825 = vst.msk [vmem:[%s5700_s26 + $0x122] sm:$0x1] %vm293_vm0, %v808_v54  ;;  %v742_v2 = vcombine.high %v726_v58, %v726_v58  ;;  %v743_v3 = vcombine.high %v733_v59, %v733_v59  ;;  %754 = vst.msk [vmem:[%s5700_s26 + $0x31] sm:$0x1] %vm293_vm0, %v733_v59  ;;  %v828_v4 = vcombine.high %v5204_v44, %v5204_v44 }
 0x228   : > { %755 = vst.msk [vmem:[%s5700_s26 + $0x61] sm:$0x1] %vm293_vm0, %v741_v60  ;;  %757 = vst.msk [vmem:[%s5700_s26 + $0xc1] sm:$0x1] %vm293_vm0, %v726_v58  ;;  %v911_v5 = vcombine.high %v909_v62, %v909_v62  ;;  %v925_v6 = vrot.slane %v909_v62, %v5979_v24  ;;  %v932_v7 = vrot.slane %v910_v63, %v5979_v24 }
 0x229   : > { %826 = vst.msk [vmem:[%s5700_s26 + $0x152] sm:$0x1] %vm293_vm0, %v810_v61  ;;  %v940_v8 = vcombine.high %v918_v0, %v918_v0  ;;  %4787 = vst.msk [vmem:[%s5700_s26 + $0x1a] sm:$0x1] %vm293_vm0, %v918_v0  ;;  %v744_v9 = vcombine.high %v740_v1, %v740_v1  ;;  %v835_v12 = vrot.slane %v5204_v44, %v5979_v24 }
 0x22a   : > { %756 = vst.msk [vmem:[%s5700_s26 + $0x91] sm:$0x1] %vm293_vm0, %v743_v3  ;;  %758 = vst.msk [vmem:[%s5700_s26 + $0xf1] sm:$0x1] %vm293_vm0, %v740_v1  ;;  %v842_v10 = vrot.slane %v828_v4, %v5979_v24  ;;  %v939_v13 = vrot.slane %v911_v5, %v5979_v24  ;;  %v941_v14 = vcombine.high %v925_v6, %v925_v6 }
 0x22b   : > { %759 = vst.msk [vmem:[%s5700_s26 + $0x121] sm:$0x1] %vm293_vm0, %v742_v2  ;;  %v942_v15 = vcombine.high %v932_v7, %v932_v7  ;;  %4788 = vst.msk [vmem:[%s5700_s26 + $0x4a] sm:$0x1] %vm293_vm0, %v932_v7  ;;  %v843_v16 = vcombine.high %v835_v12, %v835_v12  ;;  %v851_v18 = vrot.slane %v835_v12, %v5979_v24 }
 0x22c   : > { %4789 = vst.msk [vmem:[%s5700_s26 + $0x7a] sm:$0x1] %vm293_vm0, %v940_v8  ;;  %4791 = vst.msk [vmem:[%s5700_s26 + $0xda] sm:$0x1] %vm293_vm0, %v925_v6  ;;  %v844_v17 = vcombine.high %v842_v10, %v842_v10  ;;  %v858_v19 = vrot.slane %v842_v10, %v5979_v24  ;;  %v943_v11 = vcombine.high %v939_v13, %v939_v13 }
 0x22d   : > { %760 = vst.msk [vmem:[%s5700_s26 + $0x151] sm:$0x1] %vm293_vm0, %v744_v9  ;;  %4790 = vst.msk [vmem:[%s5700_s26 + $0xaa] sm:$0x1] %vm293_vm0, %v942_v15  ;;  %v865_v20 = vrot.slane %v843_v16, %v5979_v24  ;;  %v873_v22 = vcombine.high %v851_v18, %v851_v18 }
 0x22e   : > { %4792 = vst.msk [vmem:[%s5700_s26 + $0x10a] sm:$0x1] %vm293_vm0, %v939_v13  ;;  %4793 = vst.msk [vmem:[%s5700_s26 + $0x13a] sm:$0x1] %vm293_vm0, %v941_v14  ;;  %v872_v21 = vrot.slane %v844_v17, %v5979_v24  ;;  %v874_v25 = vcombine.high %v858_v19, %v858_v19 }
 0x22f   : > { %4779 = vst.msk [vmem:[%s5700_s26 + $0x19] sm:$0x1] %vm293_vm0, %v851_v18  ;;  %4783 = vst.msk [vmem:[%s5700_s26 + $0xd9] sm:$0x1] %vm293_vm0, %v858_v19  ;;  %v875_v27 = vcombine.high %v865_v20, %v865_v20 }
 0x230   : > { %4794 = vst.msk [vmem:[%s5700_s26 + $0x16a] sm:$0x1] %vm293_vm0, %v943_v11  ;;  %v876_v28 = vcombine.high %v872_v21, %v872_v21  ;;  %4780 = vst.msk [vmem:[%s5700_s26 + $0x49] sm:$0x1] %vm293_vm0, %v865_v20 }
 0x231   : > { %4781 = vst.msk [vmem:[%s5700_s26 + $0x79] sm:$0x1] %vm293_vm0, %v873_v22  ;;  %4784 = vst.msk [vmem:[%s5700_s26 + $0x109] sm:$0x1] %vm293_vm0, %v872_v21 }
 0x232   : > { %4785 = vst.msk [vmem:[%s5700_s26 + $0x139] sm:$0x1] %vm293_vm0, %v874_v25  ;;  %4782 = vst.msk [vmem:[%s5700_s26 + $0xa9] sm:$0x1] %vm293_vm0, %v875_v27 }
 0x233   : > { %4786 = vst.msk [vmem:[%s5700_s26 + $0x169] sm:$0x1] %vm293_vm0, %v876_v28 }
 0x2b9   : > { %v5099_v29 = vpop.f32.mrb[4].mxu0 }
 0x2ba   : > { %v5205_v30 = vadd.f32 %v5099_v29, %v5977_v23  ;;  %v1163_v31 = vpop.f32.mrb[5].mxu0 }
 0x2bb   : > { %v5206_v32 = vadd.f32 %v1163_v31, %v5984_v26 }
 0x2bc   : > { %v1253_v33 = vcombine.high %v5205_v30, %v5205_v30  ;;  %v1260_v36 = vrot.slane %v5205_v30, %v5979_v24 }
 0x2bd   : > { %v1187_v37 = vcombine.high %v5206_v32, %v5206_v32  ;;  %v1194_v38 = vrot.slane %v5206_v32, %v5979_v24 }
 0x2be   : > { %v5102_v39 = vpop.f32.mrb[6].mxu0  ;;  %v1267_v40 = vrot.slane %v1253_v33, %v5979_v24  ;;  %v1268_v41 = vcombine.high %v1260_v36, %v1260_v36  ;;  %v1276_v42 = vrot.slane %v1260_v36, %v5979_v24 }
 0x2bf   : > { %v5207_v43 = vadd.f32 %v5102_v39, %v5994_v34  ;;  %v1173_v44 = vpop.f32.mrb[7].mxu0  ;;  %v1201_v45 = vrot.slane %v1187_v37, %v5979_v24  ;;  %v1202_v46 = vcombine.high %v1194_v38, %v1194_v38  ;;  %v1210_v47 = vrot.slane %v1194_v38, %v5979_v24 }
 0x2c0   : > { %v5208_v48 = vadd.f32 %v1173_v44, %v5999_v35  ;;  %v1269_v49 = vcombine.high %v1267_v40, %v1267_v40  ;;  %v1283_v50 = vrot.slane %v1267_v40, %v5979_v24  ;;  %v1290_v51 = vrot.slane %v1268_v41, %v5979_v24  ;;  %1310 = vst.msk [vmem:[%s5700_s26 + $0x4] sm:$0x1] %vm293_vm0, %v1276_v42 }
 0x2c1   : > { %v1298_v52 = vcombine.high %v1276_v42, %v1276_v42  ;;  %v1203_v53 = vcombine.high %v1201_v45, %v1201_v45  ;;  %v1217_v54 = vrot.slane %v1201_v45, %v5979_v24  ;;  %v1224_v55 = vrot.slane %v1202_v46, %v5979_v24  ;;  %1244 = vst.msk [vmem:[%s5700_s26 + $0x3] sm:$0x1] %vm293_vm0, %v1210_v47 }
 0x2c2   : > { %v1232_v56 = vcombine.high %v1210_v47, %v1210_v47  ;;  %v1297_v57 = vrot.slane %v1269_v49, %v5979_v24  ;;  %v1299_v58 = vcombine.high %v1283_v50, %v1283_v50  ;;  %v1300_v59 = vcombine.high %v1290_v51, %v1290_v51  ;;  %1311 = vst.msk [vmem:[%s5700_s26 + $0x34] sm:$0x1] %vm293_vm0, %v1290_v51 }
 0x2c3   : > { %1312 = vst.msk [vmem:[%s5700_s26 + $0x64] sm:$0x1] %vm293_vm0, %v1298_v52  ;;  %1314 = vst.msk [vmem:[%s5700_s26 + $0xc4] sm:$0x1] %vm293_vm0, %v1283_v50  ;;  %v1385_v60 = vcombine.high %v5207_v43, %v5207_v43  ;;  %v1231_v61 = vrot.slane %v1203_v53, %v5979_v24  ;;  %v1233_v62 = vcombine.high %v1217_v54, %v1217_v54 }
 0x2c4   : > { %v1234_v63 = vcombine.high %v1224_v55, %v1224_v55  ;;  %1245 = vst.msk [vmem:[%s5700_s26 + $0x33] sm:$0x1] %vm293_vm0, %v1224_v55  ;;  %1246 = vst.msk [vmem:[%s5700_s26 + $0x63] sm:$0x1] %vm293_vm0, %v1232_v56  ;;  %v1392_v0 = vrot.slane %v5207_v43, %v5979_v24  ;;  %v1301_v1 = vcombine.high %v1297_v57, %v1297_v57 }
 0x2c5   : > { %1248 = vst.msk [vmem:[%s5700_s26 + $0xc3] sm:$0x1] %vm293_vm0, %v1217_v54  ;;  %1313 = vst.msk [vmem:[%s5700_s26 + $0x94] sm:$0x1] %vm293_vm0, %v1300_v59  ;;  %v1399_v2 = vrot.slane %v1385_v60, %v5979_v24  ;;  %v1319_v3 = vcombine.high %v5208_v48, %v5208_v48  ;;  %v1326_v4 = vrot.slane %v5208_v48, %v5979_v24 }
 0x2c6   : > { %1315 = vst.msk [vmem:[%s5700_s26 + $0xf4] sm:$0x1] %vm293_vm0, %v1297_v57  ;;  %1316 = vst.msk [vmem:[%s5700_s26 + $0x124] sm:$0x1] %vm293_vm0, %v1299_v58  ;;  %v1235_v5 = vcombine.high %v1231_v61, %v1231_v61  ;;  %v1400_v6 = vcombine.high %v1392_v0, %v1392_v0  ;;  %v1408_v7 = vrot.slane %v1392_v0, %v5979_v24 }
 0x2c7   : > { %1247 = vst.msk [vmem:[%s5700_s26 + $0x93] sm:$0x1] %vm293_vm0, %v1234_v63  ;;  %1249 = vst.msk [vmem:[%s5700_s26 + $0xf3] sm:$0x1] %vm293_vm0, %v1231_v61  ;;  %v1401_v8 = vcombine.high %v1399_v2, %v1399_v2  ;;  %v1415_v9 = vrot.slane %v1399_v2, %v5979_v24  ;;  %v1333_v12 = vrot.slane %v1319_v3, %v5979_v24 }
 0x2c8   : > { %1250 = vst.msk [vmem:[%s5700_s26 + $0x123] sm:$0x1] %vm293_vm0, %v1233_v62  ;;  %1317 = vst.msk [vmem:[%s5700_s26 + $0x154] sm:$0x1] %vm293_vm0, %v1301_v1  ;;  %v1334_v10 = vcombine.high %v1326_v4, %v1326_v4  ;;  %v1422_v13 = vrot.slane %v1400_v6, %v5979_v24  ;;  %v1430_v14 = vcombine.high %v1408_v7, %v1408_v7 }
 0x2c9   : > { %1251 = vst.msk [vmem:[%s5700_s26 + $0x153] sm:$0x1] %vm293_vm0, %v1235_v5  ;;  %4811 = vst.msk [vmem:[%s5700_s26 + $0x1c] sm:$0x1] %vm293_vm0, %v1408_v7  ;;  %v1342_v15 = vrot.slane %v1326_v4, %v5979_v24  ;;  %v1429_v16 = vrot.slane %v1401_v8, %v5979_v24  ;;  %v1431_v17 = vcombine.high %v1415_v9, %v1415_v9 }
 0x2ca   : > { %4815 = vst.msk [vmem:[%s5700_s26 + $0xdc] sm:$0x1] %vm293_vm0, %v1415_v9  ;;  %v1335_v18 = vcombine.high %v1333_v12, %v1333_v12  ;;  %v1349_v19 = vrot.slane %v1333_v12, %v5979_v24  ;;  %v1432_v11 = vcombine.high %v1422_v13, %v1422_v13  ;;  %4812 = vst.msk [vmem:[%s5700_s26 + $0x4c] sm:$0x1] %vm293_vm0, %v1422_v13  ;;  %v5115_v22 = vpop.f32.mrb[8].mxu1  ;;  %v5131_v25 = vpop.f32.mrb[8].mxu0 }
 0x2cb   : > { %4813 = vst.msk [vmem:[%s5700_s26 + $0x7c] sm:$0x1] %vm293_vm0, %v1430_v14  ;;  %v1356_v20 = vrot.slane %v1334_v10, %v5979_v24  ;;  %v1364_v21 = vcombine.high %v1342_v15, %v1342_v15  ;;  %4803 = vst.msk [vmem:[%s5700_s26 + $0x1b] sm:$0x1] %vm293_vm0, %v1342_v15  ;;  %v1433_v27 = vcombine.high %v1429_v16, %v1429_v16  ;;  %v1653_v31 = vpop.f32.mrb[9].mxu1  ;;  %v2143_v32 = vpop.f32.mrb[9].mxu0 }
 0x2cc   : > { %4816 = vst.msk [vmem:[%s5700_s26 + $0x10c] sm:$0x1] %vm293_vm0, %v1429_v16  ;;  %4817 = vst.msk [vmem:[%s5700_s26 + $0x13c] sm:$0x1] %vm293_vm0, %v1431_v17  ;;  %v1363_v28 = vrot.slane %v1335_v18, %v5979_v24  ;;  %v1365_v29 = vcombine.high %v1349_v19, %v1349_v19  ;;  %v5209_v30 = vadd.f32 %v5115_v22, %v5977_v23 }
 0x2cd   : > { %4807 = vst.msk [vmem:[%s5700_s26 + $0xdb] sm:$0x1] %vm293_vm0, %v1349_v19  ;;  %4814 = vst.msk [vmem:[%s5700_s26 + $0xac] sm:$0x1] %vm293_vm0, %v1432_v11  ;;  %v1366_v33 = vcombine.high %v1356_v20, %v1356_v20  ;;  %v5213_v36 = vadd.f32 %v5131_v25, %v5977_v23  ;;  %v5210_v37 = vadd.f32 %v1653_v31, %v5984_v26 }
 0x2ce   : > { %4804 = vst.msk [vmem:[%s5700_s26 + $0x4b] sm:$0x1] %vm293_vm0, %v1356_v20  ;;  %4805 = vst.msk [vmem:[%s5700_s26 + $0x7b] sm:$0x1] %vm293_vm0, %v1364_v21  ;;  %v6176_v38 = vadd.f32 %v2143_v32, %v5984_v26  ;;  %v1367_v39 = vcombine.high %v1363_v28, %v1363_v28  ;;  %v1743_v40 = vcombine.high %v5209_v30, %v5209_v30  ;;  %v5118_v46 = vpop.f32.mrb[10].mxu1  ;;  %v6189_v47 = vpop.f32.mrb[10].mxu0 }
 0x2cf   : > { %4818 = vst.msk [vmem:[%s5700_s26 + $0x16c] sm:$0x1] %vm293_vm0, %v1433_v27  ;;  %4808 = vst.msk [vmem:[%s5700_s26 + $0x10b] sm:$0x1] %vm293_vm0, %v1363_v28  ;;  %v1750_v41 = vrot.slane %v5209_v30, %v5979_v24  ;;  %v2233_v42 = vcombine.high %v5213_v36, %v5213_v36  ;;  %v2240_v43 = vrot.slane %v5213_v36, %v5979_v24  ;;  %v6197_v52 = vpop.f32.mrb[11].mxu1  ;;  %v6199_v53 = vpop.f32.mrb[11].mxu0 }
 0x2d0   : > { %4809 = vst.msk [vmem:[%s5700_s26 + $0x13b] sm:$0x1] %vm293_vm0, %v1365_v29  ;;  %4806 = vst.msk [vmem:[%s5700_s26 + $0xab] sm:$0x1] %vm293_vm0, %v1366_v33  ;;  %v1677_v44 = vcombine.high %v5210_v37, %v5210_v37  ;;  %v1684_v45 = vrot.slane %v5210_v37, %v5979_v24  ;;  %v1757_v48 = vrot.slane %v1743_v40, %v5979_v24 }
 0x2d1   : > { %4810 = vst.msk [vmem:[%s5700_s26 + $0x16b] sm:$0x1] %vm293_vm0, %v1367_v39  ;;  %v1758_v49 = vcombine.high %v1750_v41, %v1750_v41  ;;  %v1766_v50 = vrot.slane %v1750_v41, %v5979_v24  ;;  %v2167_v51 = vcombine.high %v6176_v38, %v6176_v38  ;;  %v2247_v54 = vrot.slane %v2233_v42, %v5979_v24 }
 0x2d2   : > { %v2248_v55 = vcombine.high %v2240_v43, %v2240_v43  ;;  %v2256_v56 = vrot.slane %v2240_v43, %v5979_v24  ;;  %v1691_v57 = vrot.slane %v1677_v44, %v5979_v24  ;;  %v1759_v58 = vcombine.high %v1757_v48, %v1757_v48 }
 0x2d3   : > { %v1773_v59 = vrot.slane %v1757_v48, %v5979_v24  ;;  %v1780_v60 = vrot.slane %v1758_v49, %v5979_v24  ;;  %v1788_v61 = vcombine.high %v1766_v50, %v1766_v50  ;;  %1800 = vst.msk [vmem:[%s5700_s26 + $0x6] sm:$0x1] %vm293_vm0, %v1766_v50  ;;  %v2249_v62 = vcombine.high %v2247_v54, %v2247_v54 }
 0x2d4   : > { %v2263_v63 = vrot.slane %v2247_v54, %v5979_v24  ;;  %v2270_v0 = vrot.slane %v2248_v55, %v5979_v24  ;;  %v2278_v1 = vcombine.high %v2256_v56, %v2256_v56  ;;  %2290 = vst.msk [vmem:[%s5700_s26 + $0x8] sm:$0x1] %vm293_vm0, %v2256_v56  ;;  %v1787_v2 = vrot.slane %v1759_v58, %v5979_v24 }
 0x2d5   : > { %v1789_v3 = vcombine.high %v1773_v59, %v1773_v59  ;;  %v1790_v4 = vcombine.high %v1780_v60, %v1780_v60  ;;  %1801 = vst.msk [vmem:[%s5700_s26 + $0x36] sm:$0x1] %vm293_vm0, %v1780_v60  ;;  %1802 = vst.msk [vmem:[%s5700_s26 + $0x66] sm:$0x1] %vm293_vm0, %v1788_v61  ;;  %v1692_v5 = vcombine.high %v1684_v45, %v1684_v45 }
 0x2d6   : > { %1804 = vst.msk [vmem:[%s5700_s26 + $0xc6] sm:$0x1] %vm293_vm0, %v1773_v59  ;;  %v2277_v6 = vrot.slane %v2249_v62, %v5979_v24  ;;  %v2279_v7 = vcombine.high %v2263_v63, %v2263_v63  ;;  %v2280_v8 = vcombine.high %v2270_v0, %v2270_v0  ;;  %2291 = vst.msk [vmem:[%s5700_s26 + $0x38] sm:$0x1] %vm293_vm0, %v2270_v0 }
 0x2d7   : > { %2292 = vst.msk [vmem:[%s5700_s26 + $0x68] sm:$0x1] %vm293_vm0, %v2278_v1  ;;  %2294 = vst.msk [vmem:[%s5700_s26 + $0xc8] sm:$0x1] %vm293_vm0, %v2263_v63  ;;  %v1693_v9 = vcombine.high %v1691_v57, %v1691_v57  ;;  %v1791_v12 = vcombine.high %v1787_v2, %v1787_v2  ;;  %v1700_v10 = vrot.slane %v1684_v45, %v5979_v24 }
 0x2d8   : > { %1803 = vst.msk [vmem:[%s5700_s26 + $0x96] sm:$0x1] %vm293_vm0, %v1790_v4  ;;  %1805 = vst.msk [vmem:[%s5700_s26 + $0xf6] sm:$0x1] %vm293_vm0, %v1787_v2  ;;  %v1707_v13 = vrot.slane %v1691_v57, %v5979_v24  ;;  %v1714_v14 = vrot.slane %v1692_v5, %v5979_v24  ;;  %v2281_v15 = vcombine.high %v2277_v6, %v2277_v6 }
 0x2d9   : > { %1806 = vst.msk [vmem:[%s5700_s26 + $0x126] sm:$0x1] %vm293_vm0, %v1789_v3  ;;  %2293 = vst.msk [vmem:[%s5700_s26 + $0x98] sm:$0x1] %vm293_vm0, %v2280_v8  ;;  %v1721_v16 = vrot.slane %v1693_v9, %v5979_v24  ;;  %v2174_v17 = vrot.slane %v6176_v38, %v5979_v24  ;;  %v2181_v18 = vrot.slane %v2167_v51, %v5979_v24 }
 0x2da   : > { %2295 = vst.msk [vmem:[%s5700_s26 + $0xf8] sm:$0x1] %vm293_vm0, %v2277_v6  ;;  %2296 = vst.msk [vmem:[%s5700_s26 + $0x128] sm:$0x1] %vm293_vm0, %v2279_v7  ;;  %v1722_v19 = vcombine.high %v1700_v10, %v1700_v10  ;;  %v1723_v11 = vcombine.high %v1707_v13, %v1707_v13  ;;  %v1724_v20 = vcombine.high %v1714_v14, %v1714_v14  ;;  %v6277_v39 = vpop.f32.mrb[12].mxu1  ;;  %v6279_v40 = vpop.f32.mrb[12].mxu0 }
 0x2db   : > { %1807 = vst.msk [vmem:[%s5700_s26 + $0x156] sm:$0x1] %vm293_vm0, %v1791_v12  ;;  %1734 = vst.msk [vmem:[%s5700_s26 + $0x5] sm:$0x1] %vm293_vm0, %v1700_v10  ;;  %v5211_v21 = vadd.f32 %v5118_v46, %v5994_v34  ;;  %v1725_v22 = vcombine.high %v1721_v16, %v1721_v16  ;;  %v2182_v25 = vcombine.high %v2174_v17, %v2174_v17  ;;  %v6285_v45 = vpop.f32.mrb[13].mxu1  ;;  %v6287_v46 = vpop.f32.mrb[13].mxu0 }
 0x2dc   : > { %1735 = vst.msk [vmem:[%s5700_s26 + $0x35] sm:$0x1] %vm293_vm0, %v1714_v14  ;;  %1738 = vst.msk [vmem:[%s5700_s26 + $0xc5] sm:$0x1] %vm293_vm0, %v1707_v13  ;;  %v2183_v27 = vcombine.high %v2181_v18, %v2181_v18  ;;  %v2190_v28 = vrot.slane %v2174_v17, %v5979_v24  ;;  %v2197_v29 = vrot.slane %v2181_v18, %v5979_v24 }
 0x2dd   : > { %2297 = vst.msk [vmem:[%s5700_s26 + $0x158] sm:$0x1] %vm293_vm0, %v2281_v15  ;;  %1739 = vst.msk [vmem:[%s5700_s26 + $0xf5] sm:$0x1] %vm293_vm0, %v1721_v16  ;;  %v1875_v30 = vcombine.high %v5211_v21, %v5211_v21  ;;  %v1882_v31 = vrot.slane %v5211_v21, %v5979_v24  ;;  %v5215_v32 = vadd.f32 %v6189_v47, %v5994_v34 }
 0x2de   : > { %1736 = vst.msk [vmem:[%s5700_s26 + $0x65] sm:$0x1] %vm293_vm0, %v1722_v19  ;;  %1737 = vst.msk [vmem:[%s5700_s26 + $0x95] sm:$0x1] %vm293_vm0, %v1724_v20  ;;  %v2204_v33 = vrot.slane %v2182_v25, %v5979_v24  ;;  %v2211_v36 = vrot.slane %v2183_v27, %v5979_v24  ;;  %v2212_v37 = vcombine.high %v2190_v28, %v2190_v28  ;;  %v6308_v60 = vpop.f32.mrb[14].mxu1  ;;  %v6310_v61 = vpop.f32.mrb[14].mxu0 }
 0x2df   : > { %1740 = vst.msk [vmem:[%s5700_s26 + $0x125] sm:$0x1] %vm293_vm0, %v1723_v11  ;;  %1741 = vst.msk [vmem:[%s5700_s26 + $0x155] sm:$0x1] %vm293_vm0, %v1725_v22  ;;  %v5212_v38 = vadd.f32 %v6197_v52, %v5999_v35  ;;  %v2213_v41 = vcombine.high %v2197_v29, %v2197_v29  ;;  %v1889_v42 = vrot.slane %v1875_v30, %v5979_v24  ;;  %v6320_v2 = vpop.f32.mrb[15].mxu1  ;;  %v6322_v3 = vpop.f32.mrb[15].mxu0 }
 0x2e0   : > { %2224 = vst.msk [vmem:[%s5700_s26 + $0x7] sm:$0x1] %vm293_vm0, %v2190_v28  ;;  %2228 = vst.msk [vmem:[%s5700_s26 + $0xc7] sm:$0x1] %vm293_vm0, %v2197_v29  ;;  %v1890_v43 = vcombine.high %v1882_v31, %v1882_v31  ;;  %v1898_v44 = vrot.slane %v1882_v31, %v5979_v24  ;;  %v2214_v47 = vcombine.high %v2204_v33, %v2204_v33 }
 0x2e1   : > { %v2215_v48 = vcombine.high %v2211_v36, %v2211_v36  ;;  %2225 = vst.msk [vmem:[%s5700_s26 + $0x37] sm:$0x1] %vm293_vm0, %v2204_v33  ;;  %2226 = vst.msk [vmem:[%s5700_s26 + $0x67] sm:$0x1] %vm293_vm0, %v2212_v37  ;;  %v2365_v49 = vcombine.high %v5215_v32, %v5215_v32  ;;  %v2372_v50 = vrot.slane %v5215_v32, %v5979_v24 }
 0x2e2   : > { %2229 = vst.msk [vmem:[%s5700_s26 + $0xf7] sm:$0x1] %vm293_vm0, %v2211_v36  ;;  %2230 = vst.msk [vmem:[%s5700_s26 + $0x127] sm:$0x1] %vm293_vm0, %v2213_v41  ;;  %v1891_v51 = vcombine.high %v1889_v42, %v1889_v42  ;;  %v1905_v52 = vrot.slane %v1889_v42, %v5979_v24  ;;  %v1912_v54 = vrot.slane %v1890_v43, %v5979_v24 }
 0x2e3   : > { %v1920_v55 = vcombine.high %v1898_v44, %v1898_v44  ;;  %4835 = vst.msk [vmem:[%s5700_s26 + $0x1e] sm:$0x1] %vm293_vm0, %v1898_v44  ;;  %2227 = vst.msk [vmem:[%s5700_s26 + $0x97] sm:$0x1] %vm293_vm0, %v2214_v47  ;;  %v2379_v56 = vrot.slane %v2365_v49, %v5979_v24  ;;  %v2380_v57 = vcombine.high %v2372_v50, %v2372_v50 }
 0x2e4   : > { %2231 = vst.msk [vmem:[%s5700_s26 + $0x157] sm:$0x1] %vm293_vm0, %v2215_v48  ;;  %v2388_v58 = vrot.slane %v2372_v50, %v5979_v24  ;;  %v1809_v59 = vcombine.high %v5212_v38, %v5212_v38  ;;  %v1919_v62 = vrot.slane %v1891_v51, %v5979_v24  ;;  %v1921_v63 = vcombine.high %v1905_v52, %v1905_v52 }
 0x2e5   : > { %v1922_v0 = vcombine.high %v1912_v54, %v1912_v54  ;;  %4836 = vst.msk [vmem:[%s5700_s26 + $0x4e] sm:$0x1] %vm293_vm0, %v1912_v54  ;;  %4837 = vst.msk [vmem:[%s5700_s26 + $0x7e] sm:$0x1] %vm293_vm0, %v1920_v55  ;;  %v1816_v1 = vrot.slane %v5212_v38, %v5979_v24  ;;  %v2381_v4 = vcombine.high %v2379_v56, %v2379_v56 }
 0x2e6   : > { %4839 = vst.msk [vmem:[%s5700_s26 + $0xde] sm:$0x1] %vm293_vm0, %v1905_v52  ;;  %v2395_v5 = vrot.slane %v2379_v56, %v5979_v24  ;;  %v2402_v6 = vrot.slane %v2380_v57, %v5979_v24  ;;  %v2410_v7 = vcombine.high %v2388_v58, %v2388_v58  ;;  %4859 = vst.msk [vmem:[%s5700_s26 + $0x20] sm:$0x1] %vm293_vm0, %v2388_v58 }
 0x2e7   : > { %v1923_v8 = vcombine.high %v1919_v62, %v1919_v62  ;;  %4838 = vst.msk [vmem:[%s5700_s26 + $0xae] sm:$0x1] %vm293_vm0, %v1922_v0  ;;  %4840 = vst.msk [vmem:[%s5700_s26 + $0x10e] sm:$0x1] %vm293_vm0, %v1919_v62  ;;  %v1823_v9 = vrot.slane %v1809_v59, %v5979_v24  ;;  %v1824_v12 = vcombine.high %v1816_v1, %v1816_v1 }
 0x2e8   : > { %4841 = vst.msk [vmem:[%s5700_s26 + $0x13e] sm:$0x1] %vm293_vm0, %v1921_v63  ;;  %v1832_v10 = vrot.slane %v1816_v1, %v5979_v24  ;;  %v2409_v13 = vrot.slane %v2381_v4, %v5979_v24  ;;  %v2411_v14 = vcombine.high %v2395_v5, %v2395_v5  ;;  %v2412_v15 = vcombine.high %v2402_v6, %v2402_v6 }
 0x2e9   : > { %4860 = vst.msk [vmem:[%s5700_s26 + $0x50] sm:$0x1] %vm293_vm0, %v2402_v6  ;;  %4861 = vst.msk [vmem:[%s5700_s26 + $0x80] sm:$0x1] %vm293_vm0, %v2410_v7  ;;  %v5216_v16 = vadd.f32 %v6199_v53, %v5999_v35  ;;  %v1825_v17 = vcombine.high %v1823_v9, %v1823_v9  ;;  %v1839_v18 = vrot.slane %v1823_v9, %v5979_v24 }
 0x2ea   : > { %4863 = vst.msk [vmem:[%s5700_s26 + $0xe0] sm:$0x1] %vm293_vm0, %v2395_v5  ;;  %4842 = vst.msk [vmem:[%s5700_s26 + $0x16e] sm:$0x1] %vm293_vm0, %v1923_v8  ;;  %v1846_v19 = vrot.slane %v1824_v12, %v5979_v24  ;;  %v1854_v11 = vcombine.high %v1832_v10, %v1832_v10  ;;  %v2413_v20 = vcombine.high %v2409_v13, %v2409_v13  ;;  %v6397_v54 = vpop.f32.mrb[16].mxu1  ;;  %v6399_v55 = vpop.f32.mrb[16].mxu0 }
 0x2eb   : > { %4827 = vst.msk [vmem:[%s5700_s26 + $0x1d] sm:$0x1] %vm293_vm0, %v1832_v10  ;;  %4862 = vst.msk [vmem:[%s5700_s26 + $0xb0] sm:$0x1] %vm293_vm0, %v2412_v15  ;;  %v2299_v53 = vcombine.high %v5216_v16, %v5216_v16  ;;  %v2306_v21 = vrot.slane %v5216_v16, %v5979_v24  ;;  %v5217_v22 = vadd.f32 %v6277_v39, %v5977_v23  ;;  %v6405_v62 = vpop.f32.mrb[17].mxu1  ;;  %v6407_v63 = vpop.f32.mrb[17].mxu0 }
 0x2ec   : > { %4864 = vst.msk [vmem:[%s5700_s26 + $0x110] sm:$0x1] %vm293_vm0, %v2409_v13  ;;  %4865 = vst.msk [vmem:[%s5700_s26 + $0x140] sm:$0x1] %vm293_vm0, %v2411_v14  ;;  %v1853_v25 = vrot.slane %v1825_v17, %v5979_v24  ;;  %v1855_v27 = vcombine.high %v1839_v18, %v1839_v18  ;;  %v1856_v28 = vcombine.high %v1846_v19, %v1846_v19 }
 0x2ed   : > { %4828 = vst.msk [vmem:[%s5700_s26 + $0x4d] sm:$0x1] %vm293_vm0, %v1846_v19  ;;  %4829 = vst.msk [vmem:[%s5700_s26 + $0x7d] sm:$0x1] %vm293_vm0, %v1854_v11  ;;  %v5221_v29 = vadd.f32 %v6279_v40, %v5977_v23  ;;  %v2313_v30 = vrot.slane %v2299_v53, %v5979_v24  ;;  %v2314_v31 = vcombine.high %v2306_v21, %v2306_v21 }
 0x2ee   : > { %4831 = vst.msk [vmem:[%s5700_s26 + $0xdd] sm:$0x1] %vm293_vm0, %v1839_v18  ;;  %4866 = vst.msk [vmem:[%s5700_s26 + $0x170] sm:$0x1] %vm293_vm0, %v2413_v20  ;;  %v2322_v32 = vrot.slane %v2306_v21, %v5979_v24  ;;  %v2723_v33 = vcombine.high %v5217_v22, %v5217_v22  ;;  %v1857_v36 = vcombine.high %v1853_v25, %v1853_v25 }
 0x2ef   : > { %4830 = vst.msk [vmem:[%s5700_s26 + $0xad] sm:$0x1] %vm293_vm0, %v1856_v28  ;;  %4832 = vst.msk [vmem:[%s5700_s26 + $0x10d] sm:$0x1] %vm293_vm0, %v1853_v25  ;;  %v2730_v37 = vrot.slane %v5217_v22, %v5979_v24  ;;  %v3213_v23 = vcombine.high %v5221_v29, %v5221_v29  ;;  %v3220_v38 = vrot.slane %v5221_v29, %v5979_v24 }
 0x2f0   : > { %4833 = vst.msk [vmem:[%s5700_s26 + $0x13d] sm:$0x1] %vm293_vm0, %v1855_v27  ;;  %v2315_v39 = vcombine.high %v2313_v30, %v2313_v30  ;;  %v2329_v40 = vrot.slane %v2313_v30, %v5979_v24  ;;  %v2336_v41 = vrot.slane %v2314_v31, %v5979_v24  ;;  %v2344_v42 = vcombine.high %v2322_v32, %v2322_v32  ;;  %v6463_v22 = vpop.f32.mrb[18].mxu0 }
 0x2f1   : > { %4851 = vst.msk [vmem:[%s5700_s26 + $0x1f] sm:$0x1] %vm293_vm0, %v2322_v32  ;;  %4834 = vst.msk [vmem:[%s5700_s26 + $0x16d] sm:$0x1] %vm293_vm0, %v1857_v36  ;;  %v2737_v43 = vrot.slane %v2723_v33, %v5979_v24  ;;  %v2738_v44 = vcombine.high %v2730_v37, %v2730_v37  ;;  %v2746_v47 = vrot.slane %v2730_v37, %v5979_v24  ;;  %v6461_v21 = vpop.f32.mrb[18].mxu1  ;;  %v6471_v29 = vpop.f32.mrb[19].mxu0 }
 0x2f2   : > { %v3227_v48 = vrot.slane %v3213_v23, %v5979_v24  ;;  %v2343_v49 = vrot.slane %v2315_v39, %v5979_v24  ;;  %v2345_v50 = vcombine.high %v2329_v40, %v2329_v40  ;;  %v2346_v51 = vcombine.high %v2336_v41, %v2336_v41  ;;  %4852 = vst.msk [vmem:[%s5700_s26 + $0x4f] sm:$0x1] %vm293_vm0, %v2336_v41  ;;  %v6469_v28 = vpop.f32.mrb[19].mxu1 }
 0x2f3   : > { %4853 = vst.msk [vmem:[%s5700_s26 + $0x7f] sm:$0x1] %vm293_vm0, %v2344_v42  ;;  %4855 = vst.msk [vmem:[%s5700_s26 + $0xdf] sm:$0x1] %vm293_vm0, %v2329_v40  ;;  %v3228_v52 = vcombine.high %v3220_v38, %v3220_v38  ;;  %v2739_v56 = vcombine.high %v2737_v43, %v2737_v43  ;;  %v2753_v57 = vrot.slane %v2737_v43, %v5979_v24 }
 0x2f4   : > { %v2760_v58 = vrot.slane %v2738_v44, %v5979_v24  ;;  %v2768_v59 = vcombine.high %v2746_v47, %v2746_v47  ;;  %2780 = vst.msk [vmem:[%s5700_s26 + $0xa] sm:$0x1] %vm293_vm0, %v2746_v47  ;;  %v2347_v0 = vcombine.high %v2343_v49, %v2343_v49  ;;  %4854 = vst.msk [vmem:[%s5700_s26 + $0xaf] sm:$0x1] %vm293_vm0, %v2346_v51 }
 0x2f5   : > { %4856 = vst.msk [vmem:[%s5700_s26 + $0x10f] sm:$0x1] %vm293_vm0, %v2343_v49  ;;  %4857 = vst.msk [vmem:[%s5700_s26 + $0x13f] sm:$0x1] %vm293_vm0, %v2345_v50  ;;  %v3229_v1 = vcombine.high %v3227_v48, %v3227_v48  ;;  %v3236_v4 = vrot.slane %v3220_v38, %v5979_v24  ;;  %v3243_v5 = vrot.slane %v3227_v48, %v5979_v24 }
 0x2f6   : > { %v2767_v6 = vrot.slane %v2739_v56, %v5979_v24  ;;  %v2769_v7 = vcombine.high %v2753_v57, %v2753_v57  ;;  %v2770_v8 = vcombine.high %v2760_v58, %v2760_v58  ;;  %2781 = vst.msk [vmem:[%s5700_s26 + $0x3a] sm:$0x1] %vm293_vm0, %v2760_v58  ;;  %2782 = vst.msk [vmem:[%s5700_s26 + $0x6a] sm:$0x1] %vm293_vm0, %v2768_v59 }
 0x2f7   : > { %2784 = vst.msk [vmem:[%s5700_s26 + $0xca] sm:$0x1] %vm293_vm0, %v2753_v57  ;;  %v3250_v9 = vrot.slane %v3228_v52, %v5979_v24  ;;  %4858 = vst.msk [vmem:[%s5700_s26 + $0x16f] sm:$0x1] %vm293_vm0, %v2347_v0  ;;  %v3257_v12 = vrot.slane %v3229_v1, %v5979_v24  ;;  %v3258_v10 = vcombine.high %v3236_v4, %v3236_v4 }
 0x2f8   : > { %v3259_v13 = vcombine.high %v3243_v5, %v3243_v5  ;;  %3270 = vst.msk [vmem:[%s5700_s26 + $0xc] sm:$0x1] %vm293_vm0, %v3236_v4  ;;  %3274 = vst.msk [vmem:[%s5700_s26 + $0xcc] sm:$0x1] %vm293_vm0, %v3243_v5  ;;  %v5218_v14 = vadd.f32 %v6285_v45, %v5984_v26  ;;  %v2771_v15 = vcombine.high %v2767_v6, %v2767_v6 }
 0x2f9   : > { %2783 = vst.msk [vmem:[%s5700_s26 + $0x9a] sm:$0x1] %vm293_vm0, %v2770_v8  ;;  %2785 = vst.msk [vmem:[%s5700_s26 + $0xfa] sm:$0x1] %vm293_vm0, %v2767_v6  ;;  %v3260_v16 = vcombine.high %v3250_v9, %v3250_v9  ;;  %v5222_v17 = vadd.f32 %v6287_v46, %v5984_v26  ;;  %v5219_v18 = vadd.f32 %v6308_v60, %v5994_v34 }
 0x2fa   : > { %2786 = vst.msk [vmem:[%s5700_s26 + $0x12a] sm:$0x1] %vm293_vm0, %v2769_v7  ;;  %3271 = vst.msk [vmem:[%s5700_s26 + $0x3c] sm:$0x1] %vm293_vm0, %v3250_v9  ;;  %v3261_v45 = vcombine.high %v3257_v12, %v3257_v12  ;;  %v2657_v19 = vcombine.high %v5218_v14, %v5218_v14  ;;  %v2664_v11 = vrot.slane %v5218_v14, %v5979_v24 }
 0x2fb   : > { %3272 = vst.msk [vmem:[%s5700_s26 + $0x6c] sm:$0x1] %vm293_vm0, %v3258_v10  ;;  %3275 = vst.msk [vmem:[%s5700_s26 + $0xfc] sm:$0x1] %vm293_vm0, %v3257_v12  ;;  %v5223_v20 = vadd.f32 %v6310_v61, %v5994_v34  ;;  %v3147_v26 = vcombine.high %v5222_v17, %v5222_v17  ;;  %v3154_v46 = vrot.slane %v5222_v17, %v5979_v24 }
 0x2fc   : > { %3276 = vst.msk [vmem:[%s5700_s26 + $0x12c] sm:$0x1] %vm293_vm0, %v3259_v13  ;;  %2787 = vst.msk [vmem:[%s5700_s26 + $0x15a] sm:$0x1] %vm293_vm0, %v2771_v15  ;;  %v2855_v60 = vcombine.high %v5219_v18, %v5219_v18  ;;  %v2862_v53 = vrot.slane %v5219_v18, %v5979_v24  ;;  %v2671_v25 = vrot.slane %v2657_v19, %v5979_v24 }
 0x2fd   : > { %3273 = vst.msk [vmem:[%s5700_s26 + $0x9c] sm:$0x1] %vm293_vm0, %v3260_v16  ;;  %3277 = vst.msk [vmem:[%s5700_s26 + $0x15c] sm:$0x1] %vm293_vm0, %v3261_v45  ;;  %v2672_v34 = vcombine.high %v2664_v11, %v2664_v11  ;;  %v2680_v61 = vrot.slane %v2664_v11, %v5979_v24  ;;  %v3345_v27 = vcombine.high %v5223_v20, %v5223_v20  ;;  %v5361_v11 = vld [vmem:[%s6932_s3 + $0x8] sm:$0xff] }
 0x2fe   : > { %v3161_v30 = vrot.slane %v3147_v26, %v5979_v24  ;;  %v3162_v31 = vcombine.high %v3154_v46, %v3154_v46  ;;  %v3170_v32 = vrot.slane %v3154_v46, %v5979_v24  ;;  %v2869_v33 = vrot.slane %v2855_v60, %v5979_v24 }
 0x2ff   : > { %v2673_v36 = vcombine.high %v2671_v25, %v2671_v25  ;;  %v2687_v37 = vrot.slane %v2671_v25, %v5979_v24  ;;  %v2694_v23 = vrot.slane %v2672_v34, %v5979_v24  ;;  %v2702_v38 = vcombine.high %v2680_v61, %v2680_v61  ;;  %2714 = vst.msk [vmem:[%s5700_s26 + $0x9] sm:$0x1] %vm293_vm0, %v2680_v61 }
 0x300   : > { %v3163_v39 = vcombine.high %v3161_v30, %v3161_v30  ;;  %v3177_v40 = vrot.slane %v3161_v30, %v5979_v24  ;;  %v3184_v41 = vrot.slane %v3162_v31, %v5979_v24  ;;  %v3192_v42 = vcombine.high %v3170_v32, %v3170_v32  ;;  %3204 = vst.msk [vmem:[%s5700_s26 + $0xb] sm:$0x1] %vm293_vm0, %v3170_v32 }
 0x301   : > { %v2701_v43 = vrot.slane %v2673_v36, %v5979_v24  ;;  %v2703_v44 = vcombine.high %v2687_v37, %v2687_v37  ;;  %v2704_v47 = vcombine.high %v2694_v23, %v2694_v23  ;;  %2715 = vst.msk [vmem:[%s5700_s26 + $0x39] sm:$0x1] %vm293_vm0, %v2694_v23  ;;  %2716 = vst.msk [vmem:[%s5700_s26 + $0x69] sm:$0x1] %vm293_vm0, %v2702_v38 }
 0x302   : > { %2718 = vst.msk [vmem:[%s5700_s26 + $0xc9] sm:$0x1] %vm293_vm0, %v2687_v37  ;;  %v2870_v48 = vcombine.high %v2862_v53, %v2862_v53  ;;  %v3191_v49 = vrot.slane %v3163_v39, %v5979_v24  ;;  %v3193_v50 = vcombine.high %v3177_v40, %v3177_v40  ;;  %v3194_v51 = vcombine.high %v3184_v41, %v3184_v41 }
 0x303   : > { %3205 = vst.msk [vmem:[%s5700_s26 + $0x3b] sm:$0x1] %vm293_vm0, %v3184_v41  ;;  %3206 = vst.msk [vmem:[%s5700_s26 + $0x6b] sm:$0x1] %vm293_vm0, %v3192_v42  ;;  %v2871_v52 = vcombine.high %v2869_v33, %v2869_v33  ;;  %v2705_v56 = vcombine.high %v2701_v43, %v2701_v43  ;;  %v2878_v57 = vrot.slane %v2862_v53, %v5979_v24 }
 0x304   : > { %3208 = vst.msk [vmem:[%s5700_s26 + $0xcb] sm:$0x1] %vm293_vm0, %v3177_v40  ;;  %2717 = vst.msk [vmem:[%s5700_s26 + $0x99] sm:$0x1] %vm293_vm0, %v2704_v47  ;;  %v2885_v58 = vrot.slane %v2869_v33, %v5979_v24  ;;  %v2892_v59 = vrot.slane %v2870_v48, %v5979_v24  ;;  %v3195_v0 = vcombine.high %v3191_v49, %v3191_v49 }
 0x305   : > { %2719 = vst.msk [vmem:[%s5700_s26 + $0xf9] sm:$0x1] %vm293_vm0, %v2701_v43  ;;  %2720 = vst.msk [vmem:[%s5700_s26 + $0x129] sm:$0x1] %vm293_vm0, %v2703_v44  ;;  %v2899_v1 = vrot.slane %v2871_v52, %v5979_v24  ;;  %v3352_v4 = vrot.slane %v5223_v20, %v5979_v24  ;;  %v3359_v5 = vrot.slane %v3345_v27, %v5979_v24 }
 0x306   : > { %3207 = vst.msk [vmem:[%s5700_s26 + $0x9b] sm:$0x1] %vm293_vm0, %v3194_v51  ;;  %3209 = vst.msk [vmem:[%s5700_s26 + $0xfb] sm:$0x1] %vm293_vm0, %v3191_v49  ;;  %v2900_v6 = vcombine.high %v2878_v57, %v2878_v57  ;;  %v2901_v7 = vcombine.high %v2885_v58, %v2885_v58  ;;  %v2902_v8 = vcombine.high %v2892_v59, %v2892_v59 }
 0x307   : > { %3210 = vst.msk [vmem:[%s5700_s26 + $0x12b] sm:$0x1] %vm293_vm0, %v3193_v50  ;;  %2721 = vst.msk [vmem:[%s5700_s26 + $0x159] sm:$0x1] %vm293_vm0, %v2705_v56  ;;  %v5220_v9 = vadd.f32 %v6320_v2, %v5999_v35  ;;  %v2903_v12 = vcombine.high %v2899_v1, %v2899_v1  ;;  %v3360_v10 = vcombine.high %v3352_v4, %v3352_v4 }
 0x308   : > { %4883 = vst.msk [vmem:[%s5700_s26 + $0x22] sm:$0x1] %vm293_vm0, %v2878_v57  ;;  %4884 = vst.msk [vmem:[%s5700_s26 + $0x52] sm:$0x1] %vm293_vm0, %v2892_v59  ;;  %v3361_v13 = vcombine.high %v3359_v5, %v3359_v5  ;;  %v3368_v14 = vrot.slane %v3352_v4, %v5979_v24  ;;  %v3375_v15 = vrot.slane %v3359_v5, %v5979_v24  ;;  %v5362_v5 = vld [vmem:[%s6932_s3] sm:$0xff] }
 0x309   : > { %4887 = vst.msk [vmem:[%s5700_s26 + $0xe2] sm:$0x1] %vm293_vm0, %v2885_v58  ;;  %3211 = vst.msk [vmem:[%s5700_s26 + $0x15b] sm:$0x1] %vm293_vm0, %v3195_v0  ;;  %v2789_v2 = vcombine.high %v5220_v9, %v5220_v9  ;;  %v2796_v16 = vrot.slane %v5220_v9, %v5979_v24  ;;  %v5224_v17 = vadd.f32 %v6322_v3, %v5999_v35 }
 0x30a   : > { %4888 = vst.msk [vmem:[%s5700_s26 + $0x112] sm:$0x1] %vm293_vm0, %v2899_v1  ;;  %4885 = vst.msk [vmem:[%s5700_s26 + $0x82] sm:$0x1] %vm293_vm0, %v2900_v6  ;;  %v3382_v18 = vrot.slane %v3360_v10, %v5979_v24  ;;  %v3389_v45 = vrot.slane %v3361_v13, %v5979_v24  ;;  %v3390_v19 = vcombine.high %v3368_v14, %v3368_v14 }
 0x30b   : > { %4886 = vst.msk [vmem:[%s5700_s26 + $0xb2] sm:$0x1] %vm293_vm0, %v2902_v8  ;;  %4889 = vst.msk [vmem:[%s5700_s26 + $0x142] sm:$0x1] %vm293_vm0, %v2901_v7  ;;  %v5225_v20 = vadd.f32 %v5361_v11, %v6397_v54  ;;  %v3391_v26 = vcombine.high %v3375_v15, %v3375_v15  ;;  %v2803_v35 = vrot.slane %v2789_v2, %v5979_v24 }
 0x30c   : > { %4890 = vst.msk [vmem:[%s5700_s26 + $0x172] sm:$0x1] %vm293_vm0, %v2903_v12  ;;  %4907 = vst.msk [vmem:[%s5700_s26 + $0x24] sm:$0x1] %vm293_vm0, %v3368_v14  ;;  %v2804_v3 = vcombine.high %v2796_v16, %v2796_v16  ;;  %v2812_v46 = vrot.slane %v2796_v16, %v5979_v24  ;;  %v3392_v60 = vcombine.high %v3382_v18, %v3382_v18 }
 0x30d   : > { %4911 = vst.msk [vmem:[%s5700_s26 + $0xe4] sm:$0x1] %vm293_vm0, %v3375_v15  ;;  %v3393_v53 = vcombine.high %v3389_v45, %v3389_v45  ;;  %4908 = vst.msk [vmem:[%s5700_s26 + $0x54] sm:$0x1] %vm293_vm0, %v3382_v18  ;;  %v3279_v54 = vcombine.high %v5224_v17, %v5224_v17  ;;  %v3286_v25 = vrot.slane %v5224_v17, %v5979_v24 }
 0x30e   : > { %4909 = vst.msk [vmem:[%s5700_s26 + $0x84] sm:$0x1] %vm293_vm0, %v3390_v19  ;;  %4912 = vst.msk [vmem:[%s5700_s26 + $0x114] sm:$0x1] %vm293_vm0, %v3389_v45  ;;  %v2805_v34 = vcombine.high %v2803_v35, %v2803_v35  ;;  %v2819_v61 = vrot.slane %v2803_v35, %v5979_v24  ;;  %v2826_v27 = vrot.slane %v2804_v3, %v5979_v24 }
 0x30f   : > { %4913 = vst.msk [vmem:[%s5700_s26 + $0x144] sm:$0x1] %vm293_vm0, %v3391_v26  ;;  %v2834_v30 = vcombine.high %v2812_v46, %v2812_v46  ;;  %4875 = vst.msk [vmem:[%s5700_s26 + $0x21] sm:$0x1] %vm293_vm0, %v2812_v46  ;;  %v3293_v31 = vrot.slane %v3279_v54, %v5979_v24  ;;  %v3294_v32 = vcombine.high %v3286_v25, %v3286_v25 }
 0x310   : > { %4910 = vst.msk [vmem:[%s5700_s26 + $0xb4] sm:$0x1] %vm293_vm0, %v3392_v60  ;;  %4914 = vst.msk [vmem:[%s5700_s26 + $0x174] sm:$0x1] %vm293_vm0, %v3393_v53  ;;  %v3302_v33 = vrot.slane %v3286_v25, %v5979_v24  ;;  %v3703_v36 = vcombine.high %v5225_v20, %v5225_v20  ;;  %v2833_v37 = vrot.slane %v2805_v34, %v5979_v24 }
 0x311   : > { %v2835_v23 = vcombine.high %v2819_v61, %v2819_v61  ;;  %v2836_v38 = vcombine.high %v2826_v27, %v2826_v27  ;;  %4876 = vst.msk [vmem:[%s5700_s26 + $0x51] sm:$0x1] %vm293_vm0, %v2826_v27  ;;  %4877 = vst.msk [vmem:[%s5700_s26 + $0x81] sm:$0x1] %vm293_vm0, %v2834_v30  ;;  %v3710_v39 = vrot.slane %v5225_v20, %v5979_v24 }
 0x312   : > { %4879 = vst.msk [vmem:[%s5700_s26 + $0xe1] sm:$0x1] %vm293_vm0, %v2819_v61  ;;  %v3295_v40 = vcombine.high %v3293_v31, %v3293_v31  ;;  %v3309_v41 = vrot.slane %v3293_v31, %v5979_v24  ;;  %v3316_v42 = vrot.slane %v3294_v32, %v5979_v24  ;;  %v3324_v43 = vcombine.high %v3302_v33, %v3302_v33 }
 0x313   : > { %4899 = vst.msk [vmem:[%s5700_s26 + $0x23] sm:$0x1] %vm293_vm0, %v3302_v33  ;;  %v2837_v44 = vcombine.high %v2833_v37, %v2833_v37  ;;  %4878 = vst.msk [vmem:[%s5700_s26 + $0xb1] sm:$0x1] %vm293_vm0, %v2836_v38  ;;  %v3717_v47 = vrot.slane %v3703_v36, %v5979_v24  ;;  %v3718_v48 = vcombine.high %v3710_v39, %v3710_v39 }
 0x314   : > { %4880 = vst.msk [vmem:[%s5700_s26 + $0x111] sm:$0x1] %vm293_vm0, %v2833_v37  ;;  %4881 = vst.msk [vmem:[%s5700_s26 + $0x141] sm:$0x1] %vm293_vm0, %v2835_v23  ;;  %v3726_v49 = vrot.slane %v3710_v39, %v5979_v24  ;;  %v3323_v50 = vrot.slane %v3295_v40, %v5979_v24  ;;  %v3325_v51 = vcombine.high %v3309_v41, %v3309_v41 }
 0x315   : > { %v3326_v52 = vcombine.high %v3316_v42, %v3316_v42  ;;  %4900 = vst.msk [vmem:[%s5700_s26 + $0x53] sm:$0x1] %vm293_vm0, %v3316_v42  ;;  %4901 = vst.msk [vmem:[%s5700_s26 + $0x83] sm:$0x1] %vm293_vm0, %v3324_v43  ;;  %v5229_v56 = vadd.f32 %v5361_v11, %v6399_v55  ;;  %v3719_v57 = vcombine.high %v3717_v47, %v3717_v47 }
 0x316   : > { %4903 = vst.msk [vmem:[%s5700_s26 + $0xe3] sm:$0x1] %vm293_vm0, %v3309_v41  ;;  %4882 = vst.msk [vmem:[%s5700_s26 + $0x171] sm:$0x1] %vm293_vm0, %v2837_v44  ;;  %v3733_v58 = vrot.slane %v3717_v47, %v5979_v24  ;;  %v3740_v59 = vrot.slane %v3718_v48, %v5979_v24  ;;  %v3748_v0 = vcombine.high %v3726_v49, %v3726_v49  ;;  %v5363_v41 = vld [vmem:[%s6932_s3 + $0x18] sm:$0xff]  ;;  %v5364_v48 = vld [vmem:[%s6932_s3 + $0x10] sm:$0xff] }
 0x317   : > { %3760 = vst.msk [vmem:[%s5700_s26 + $0xe] sm:$0x1] %vm293_vm0, %v3726_v49  ;;  %v3327_v1 = vcombine.high %v3323_v50, %v3323_v50  ;;  %4902 = vst.msk [vmem:[%s5700_s26 + $0xb3] sm:$0x1] %vm293_vm0, %v3326_v52  ;;  %v4193_v55 = vcombine.high %v5229_v56, %v5229_v56  ;;  %v4200_v4 = vrot.slane %v5229_v56, %v5979_v24 }
 0x318   : > { %4904 = vst.msk [vmem:[%s5700_s26 + $0x113] sm:$0x1] %vm293_vm0, %v3323_v50  ;;  %4905 = vst.msk [vmem:[%s5700_s26 + $0x143] sm:$0x1] %vm293_vm0, %v3325_v51  ;;  %v5226_v6 = vadd.f32 %v5362_v5, %v6405_v62  ;;  %v3747_v7 = vrot.slane %v3719_v57, %v5979_v24  ;;  %v3749_v8 = vcombine.high %v3733_v58, %v3733_v58 }
 0x319   : > { %v3750_v9 = vcombine.high %v3740_v59, %v3740_v59  ;;  %3761 = vst.msk [vmem:[%s5700_s26 + $0x3e] sm:$0x1] %vm293_vm0, %v3740_v59  ;;  %3762 = vst.msk [vmem:[%s5700_s26 + $0x6e] sm:$0x1] %vm293_vm0, %v3748_v0  ;;  %v5230_v12 = vadd.f32 %v5362_v5, %v6407_v63  ;;  %v4207_v10 = vrot.slane %v4193_v55, %v5979_v24 }
 0x31a   : > { %3764 = vst.msk [vmem:[%s5700_s26 + $0xce] sm:$0x1] %vm293_vm0, %v3733_v58  ;;  %4906 = vst.msk [vmem:[%s5700_s26 + $0x173] sm:$0x1] %vm293_vm0, %v3327_v1  ;;  %v4208_v62 = vcombine.high %v4200_v4, %v4200_v4  ;;  %v4216_v13 = vrot.slane %v4200_v4, %v5979_v24  ;;  %v3637_v14 = vcombine.high %v5226_v6, %v5226_v6 }
 0x31b   : > { %v3751_v15 = vcombine.high %v3747_v7, %v3747_v7  ;;  %3763 = vst.msk [vmem:[%s5700_s26 + $0x9e] sm:$0x1] %vm293_vm0, %v3750_v9  ;;  %3765 = vst.msk [vmem:[%s5700_s26 + $0xfe] sm:$0x1] %vm293_vm0, %v3747_v7  ;;  %v3644_v2 = vrot.slane %v5226_v6, %v5979_v24  ;;  %v4127_v63 = vcombine.high %v5230_v12, %v5230_v12 }
 0x31c   : > { %3766 = vst.msk [vmem:[%s5700_s26 + $0x12e] sm:$0x1] %vm293_vm0, %v3749_v8  ;;  %v4134_v16 = vrot.slane %v5230_v12, %v5979_v24  ;;  %v4209_v17 = vcombine.high %v4207_v10, %v4207_v10  ;;  %v4223_v18 = vrot.slane %v4207_v10, %v5979_v24  ;;  %v4230_v45 = vrot.slane %v4208_v62, %v5979_v24 }
 0x31d   : > { %v4238_v19 = vcombine.high %v4216_v13, %v4216_v13  ;;  %4250 = vst.msk [vmem:[%s5700_s26 + $0x10] sm:$0x1] %vm293_vm0, %v4216_v13  ;;  %3767 = vst.msk [vmem:[%s5700_s26 + $0x15e] sm:$0x1] %vm293_vm0, %v3751_v15  ;;  %v3651_v11 = vrot.slane %v3637_v14, %v5979_v24  ;;  %v3652_v20 = vcombine.high %v3644_v2, %v3644_v2 }
 0x31e   : > { %v3660_v26 = vrot.slane %v3644_v2, %v5979_v24  ;;  %v4141_v35 = vrot.slane %v4127_v63, %v5979_v24  ;;  %v4237_v3 = vrot.slane %v4209_v17, %v5979_v24  ;;  %v4239_v46 = vcombine.high %v4223_v18, %v4223_v18  ;;  %4251 = vst.msk [vmem:[%s5700_s26 + $0x40] sm:$0x1] %vm293_vm0, %v4230_v45 }
 0x31f   : > { %v4240_v60 = vcombine.high %v4230_v45, %v4230_v45  ;;  %4252 = vst.msk [vmem:[%s5700_s26 + $0x70] sm:$0x1] %vm293_vm0, %v4238_v19  ;;  %4254 = vst.msk [vmem:[%s5700_s26 + $0xd0] sm:$0x1] %vm293_vm0, %v4223_v18  ;;  %v4142_v53 = vcombine.high %v4134_v16, %v4134_v16  ;;  %v3653_v54 = vcombine.high %v3651_v11, %v3651_v11 }
 0x320   : > { %v3667_v25 = vrot.slane %v3651_v11, %v5979_v24  ;;  %v3674_v34 = vrot.slane %v3652_v20, %v5979_v24  ;;  %v3682_v61 = vcombine.high %v3660_v26, %v3660_v26  ;;  %3694 = vst.msk [vmem:[%s5700_s26 + $0xd] sm:$0x1] %vm293_vm0, %v3660_v26  ;;  %v4241_v27 = vcombine.high %v4237_v3, %v4237_v3 }
 0x321   : > { %4253 = vst.msk [vmem:[%s5700_s26 + $0xa0] sm:$0x1] %vm293_vm0, %v4240_v60  ;;  %4255 = vst.msk [vmem:[%s5700_s26 + $0x100] sm:$0x1] %vm293_vm0, %v4237_v3  ;;  %v4143_v30 = vcombine.high %v4141_v35, %v4141_v35  ;;  %v4150_v31 = vrot.slane %v4134_v16, %v5979_v24  ;;  %v4157_v32 = vrot.slane %v4141_v35, %v5979_v24 }
 0x322   : > { %4256 = vst.msk [vmem:[%s5700_s26 + $0x130] sm:$0x1] %vm293_vm0, %v4239_v46  ;;  %v3681_v33 = vrot.slane %v3653_v54, %v5979_v24  ;;  %v3683_v36 = vcombine.high %v3667_v25, %v3667_v25  ;;  %v3684_v37 = vcombine.high %v3674_v34, %v3674_v34  ;;  %3695 = vst.msk [vmem:[%s5700_s26 + $0x3d] sm:$0x1] %vm293_vm0, %v3674_v34 }
 0x323   : > { %3696 = vst.msk [vmem:[%s5700_s26 + $0x6d] sm:$0x1] %vm293_vm0, %v3682_v61  ;;  %3698 = vst.msk [vmem:[%s5700_s26 + $0xcd] sm:$0x1] %vm293_vm0, %v3667_v25  ;;  %v4164_v23 = vrot.slane %v4142_v53, %v5979_v24  ;;  %v4171_v38 = vrot.slane %v4143_v30, %v5979_v24  ;;  %v4172_v39 = vcombine.high %v4150_v31, %v4150_v31 }
 0x324   : > { %4257 = vst.msk [vmem:[%s5700_s26 + $0x160] sm:$0x1] %vm293_vm0, %v4241_v27  ;;  %v4173_v40 = vcombine.high %v4157_v32, %v4157_v32  ;;  %4184 = vst.msk [vmem:[%s5700_s26 + $0xf] sm:$0x1] %vm293_vm0, %v4150_v31  ;;  %v5227_v42 = vadd.f32 %v5363_v41, %v6461_v21  ;;  %v3685_v43 = vcombine.high %v3681_v33, %v3681_v33 }
 0x325   : > { %4188 = vst.msk [vmem:[%s5700_s26 + $0xcf] sm:$0x1] %vm293_vm0, %v4157_v32  ;;  %3697 = vst.msk [vmem:[%s5700_s26 + $0x9d] sm:$0x1] %vm293_vm0, %v3684_v37  ;;  %v4174_v44 = vcombine.high %v4164_v23, %v4164_v23  ;;  %v5231_v47 = vadd.f32 %v5363_v41, %v6463_v22  ;;  %v5228_v21 = vadd.f32 %v5364_v48, %v6469_v28  ;;  %v4533_v41 = vld [vmem:[%s5700_s26 + $0x18] sm:$0xff] (%p5628_p7) }
 0x326   : > { %3699 = vst.msk [vmem:[%s5700_s26 + $0xfd] sm:$0x1] %vm293_vm0, %v3681_v33  ;;  %3700 = vst.msk [vmem:[%s5700_s26 + $0x12d] sm:$0x1] %vm293_vm0, %v3683_v36  ;;  %v4175_v49 = vcombine.high %v4171_v38, %v4171_v38  ;;  %v3835_v50 = vcombine.high %v5227_v42, %v5227_v42  ;;  %v3842_v51 = vrot.slane %v5227_v42, %v5979_v24 }
 0x327   : > { %4185 = vst.msk [vmem:[%s5700_s26 + $0x3f] sm:$0x1] %vm293_vm0, %v4164_v23  ;;  %4186 = vst.msk [vmem:[%s5700_s26 + $0x6f] sm:$0x1] %vm293_vm0, %v4172_v39  ;;  %v5232_v52 = vadd.f32 %v5364_v48, %v6471_v29  ;;  %v4325_v22 = vcombine.high %v5231_v47, %v5231_v47  ;;  %v4332_v56 = vrot.slane %v5231_v47, %v5979_v24  ;;  %v4543_v48 = vld [vmem:[%s5700_s26 + $0x40] sm:$0xff] (%p5628_p7) }
 0x328   : > { %4189 = vst.msk [vmem:[%s5700_s26 + $0xff] sm:$0x1] %vm293_vm0, %v4171_v38  ;;  %4190 = vst.msk [vmem:[%s5700_s26 + $0x12f] sm:$0x1] %vm293_vm0, %v4173_v40  ;;  %v3769_v28 = vcombine.high %v5228_v21, %v5228_v21  ;;  %v3776_v57 = vrot.slane %v5228_v21, %v5979_v24  ;;  %v3849_v58 = vrot.slane %v3835_v50, %v5979_v24  ;;  %v4531_v40 = vld [vmem:[%s5700_s26 + $0x10] sm:$0xff] (%p5628_p7)  ;;  %v4545_v21 = vld [vmem:[%s5700_s26 + $0x48] sm:$0xff] (%p5628_p7) }
 0x329   : > { %3701 = vst.msk [vmem:[%s5700_s26 + $0x15d] sm:$0x1] %vm293_vm0, %v3685_v43  ;;  %4187 = vst.msk [vmem:[%s5700_s26 + $0x9f] sm:$0x1] %vm293_vm0, %v4174_v44  ;;  %v3850_v59 = vcombine.high %v3842_v51, %v3842_v51  ;;  %v3858_v0 = vrot.slane %v3842_v51, %v5979_v24  ;;  %v4259_v29 = vcombine.high %v5232_v52, %v5232_v52  ;;  %v4539_v44 = vld [vmem:[%s5700_s26 + $0x30] sm:$0xff] (%p5628_p7)  ;;  %v4551_v51 = vld [vmem:[%s5700_s26 + $0x60] sm:$0xff] (%p5628_p7) }
 0x32a   : > { %4191 = vst.msk [vmem:[%s5700_s26 + $0x15f] sm:$0x1] %vm293_vm0, %v4175_v49  ;;  %v4339_v1 = vrot.slane %v4325_v22, %v5979_v24  ;;  %v4340_v55 = vcombine.high %v4332_v56, %v4332_v56  ;;  %v4348_v4 = vrot.slane %v4332_v56, %v5979_v24  ;;  %v3783_v5 = vrot.slane %v3769_v28, %v5979_v24  ;;  %v4555_v22 = vld [vmem:[%s5700_s26 + $0x70] sm:$0xff] (%p5628_p7)  ;;  %v4557_v56 = vld [vmem:[%s5700_s26 + $0x78] sm:$0xff] (%p5628_p7) }
 0x32b   : > { %v3851_v6 = vcombine.high %v3849_v58, %v3849_v58  ;;  %v3865_v7 = vrot.slane %v3849_v58, %v5979_v24  ;;  %v3872_v8 = vrot.slane %v3850_v59, %v5979_v24  ;;  %v3880_v9 = vcombine.high %v3858_v0, %v3858_v0  ;;  %4931 = vst.msk [vmem:[%s5700_s26 + $0x26] sm:$0x1] %vm293_vm0, %v3858_v0  ;;  %v4529_v39 = vld [vmem:[%s5700_s26 + $0x8] sm:$0xff] (%p5628_p7)  ;;  %v4563_v58 = vld [vmem:[%s5700_s26 + $0x90] sm:$0xff] (%p5628_p7)  ;;  %v4567_v0 = vld [vmem:[%s5700_s26 + $0xa0] sm:$0xff] (%p5628_p7) }
 0x32c   : > { %v4341_v12 = vcombine.high %v4339_v1, %v4339_v1  ;;  %v4355_v10 = vrot.slane %v4339_v1, %v5979_v24  ;;  %v4362_v62 = vrot.slane %v4340_v55, %v5979_v24  ;;  %v4370_v13 = vcombine.high %v4348_v4, %v4348_v4  ;;  %4955 = vst.msk [vmem:[%s5700_s26 + $0x28] sm:$0x1] %vm293_vm0, %v4348_v4  ;;  %v4575_v4 = vld [vmem:[%s5700_s26 + $0xc0] sm:$0xff] (%p5628_p7) }
 0x32d   : > { %v3879_v14 = vrot.slane %v3851_v6, %v5979_v24  ;;  %v3881_v15 = vcombine.high %v3865_v7, %v3865_v7  ;;  %v3882_v2 = vcombine.high %v3872_v8, %v3872_v8  ;;  %4932 = vst.msk [vmem:[%s5700_s26 + $0x56] sm:$0x1] %vm293_vm0, %v3872_v8  ;;  %4933 = vst.msk [vmem:[%s5700_s26 + $0x86] sm:$0x1] %vm293_vm0, %v3880_v9  ;;  %v4579_v6 = vld [vmem:[%s5700_s26 + $0xd0] sm:$0xff] (%p5628_p7) }
 0x32e   : > { %4935 = vst.msk [vmem:[%s5700_s26 + $0xe6] sm:$0x1] %vm293_vm0, %v3865_v7  ;;  %v3784_v63 = vcombine.high %v3776_v57, %v3776_v57  ;;  %v4369_v16 = vrot.slane %v4341_v12, %v5979_v24  ;;  %v4371_v17 = vcombine.high %v4355_v10, %v4355_v10  ;;  %v4372_v18 = vcombine.high %v4362_v62, %v4362_v62  ;;  %v4541_v47 = vld [vmem:[%s5700_s26 + $0x38] sm:$0xff] (%p5628_p7)  ;;  %v4587_v12 = vld [vmem:[%s5700_s26 + $0xf0] sm:$0xff] (%p5628_p7) }
 0x32f   : > { %4956 = vst.msk [vmem:[%s5700_s26 + $0x58] sm:$0x1] %vm293_vm0, %v4362_v62  ;;  %4957 = vst.msk [vmem:[%s5700_s26 + $0x88] sm:$0x1] %vm293_vm0, %v4370_v13  ;;  %v3785_v45 = vcombine.high %v3783_v5, %v3783_v5  ;;  %v3883_v19 = vcombine.high %v3879_v14, %v3879_v14  ;;  %v3792_v11 = vrot.slane %v3776_v57, %v5979_v24  ;;  %v4581_v7 = vld [vmem:[%s5700_s26 + $0xd8] sm:$0xff] (%p5628_p7)  ;;  %v4591_v62 = vld [vmem:[%s5700_s26 + $0x100] sm:$0xff] (%p5628_p7) }
 0x330   : > { %4959 = vst.msk [vmem:[%s5700_s26 + $0xe8] sm:$0x1] %vm293_vm0, %v4355_v10  ;;  %4934 = vst.msk [vmem:[%s5700_s26 + $0xb6] sm:$0x1] %vm293_vm0, %v3882_v2  ;;  %v3799_v20 = vrot.slane %v3783_v5, %v5979_v24  ;;  %v3806_v26 = vrot.slane %v3784_v63, %v5979_v24  ;;  %v4373_v35 = vcombine.high %v4369_v16, %v4369_v16  ;;  %v4565_v59 = vld [vmem:[%s5700_s26 + $0x98] sm:$0xff] (%p5628_p7)  ;;  %v4577_v5 = vld [vmem:[%s5700_s26 + $0xc8] sm:$0xff] (%p5628_p7) }
 0x331   : > { %4936 = vst.msk [vmem:[%s5700_s26 + $0x116] sm:$0x1] %vm293_vm0, %v3879_v14  ;;  %4937 = vst.msk [vmem:[%s5700_s26 + $0x146] sm:$0x1] %vm293_vm0, %v3881_v15  ;;  %v3813_v3 = vrot.slane %v3785_v45, %v5979_v24  ;;  %v4266_v46 = vrot.slane %v5232_v52, %v5979_v24  ;;  %v4273_v60 = vrot.slane %v4259_v29, %v5979_v24  ;;  %v4553_v52 = vld [vmem:[%s5700_s26 + $0x68] sm:$0xff] (%p5628_p7)  ;;  %v4589_v10 = vld [vmem:[%s5700_s26 + $0xf8] sm:$0xff] (%p5628_p7) }
 0x332   : > { %4958 = vst.msk [vmem:[%s5700_s26 + $0xb8] sm:$0x1] %vm293_vm0, %v4372_v18  ;;  %4960 = vst.msk [vmem:[%s5700_s26 + $0x118] sm:$0x1] %vm293_vm0, %v4369_v16  ;;  %v3814_v53 = vcombine.high %v3792_v11, %v3792_v11  ;;  %v3815_v54 = vcombine.high %v3799_v20, %v3799_v20  ;;  %v3816_v25 = vcombine.high %v3806_v26, %v3806_v26  ;;  %v4569_v29 = vld [vmem:[%s5700_s26 + $0xa8] sm:$0xff] (%p5628_p7)  ;;  %v4599_v2 = vld [vmem:[%s5700_s26 + $0x120] sm:$0xff] (%p5628_p7) }
 0x333   : > { %4961 = vst.msk [vmem:[%s5700_s26 + $0x148] sm:$0x1] %vm293_vm0, %v4371_v17  ;;  %4938 = vst.msk [vmem:[%s5700_s26 + $0x176] sm:$0x1] %vm293_vm0, %v3883_v19  ;;  %v3817_v34 = vcombine.high %v3813_v3, %v3813_v3  ;;  %v4274_v61 = vcombine.high %v4266_v46, %v4266_v46  ;;  %v4275_v27 = vcombine.high %v4273_v60, %v4273_v60  ;;  %v4537_v43 = vld [vmem:[%s5700_s26 + $0x28] sm:$0xff] (%p5628_p7)  ;;  %v4603_v16 = vld [vmem:[%s5700_s26 + $0x130] sm:$0xff] (%p5628_p7) }
 0x334   : > { %4923 = vst.msk [vmem:[%s5700_s26 + $0x25] sm:$0x1] %vm293_vm0, %v3792_v11  ;;  %4924 = vst.msk [vmem:[%s5700_s26 + $0x55] sm:$0x1] %vm293_vm0, %v3806_v26  ;;  %v4282_v30 = vrot.slane %v4266_v46, %v5979_v24  ;;  %v4289_v31 = vrot.slane %v4273_v60, %v5979_v24  ;;  %v4593_v13 = vld [vmem:[%s5700_s26 + $0x108] sm:$0xff] (%p5628_p7)  ;;  %v4605_v17 = vld [vmem:[%s5700_s26 + $0x138] sm:$0xff] (%p5628_p7) }
 0x335   : > { %4927 = vst.msk [vmem:[%s5700_s26 + $0xe5] sm:$0x1] %vm293_vm0, %v3799_v20  ;;  %4962 = vst.msk [vmem:[%s5700_s26 + $0x178] sm:$0x1] %vm293_vm0, %v4373_v35  ;;  %v4296_v32 = vrot.slane %v4274_v61, %v5979_v24  ;;  %v4303_v33 = vrot.slane %v4275_v27, %v5979_v24  ;;  %v4527_v24 = vld [vmem:[%s5700_s26] sm:$0xff] (%p5628_p7)  ;;  %v4601_v63 = vld [vmem:[%s5700_s26 + $0x128] sm:$0xff] (%p5628_p7) }
 0x336   : > { %4928 = vst.msk [vmem:[%s5700_s26 + $0x115] sm:$0x1] %vm293_vm0, %v3813_v3  ;;  %4925 = vst.msk [vmem:[%s5700_s26 + $0x85] sm:$0x1] %vm293_vm0, %v3814_v53  ;;  %v4304_v36 = vcombine.high %v4282_v30, %v4282_v30  ;;  %v4305_v37 = vcombine.high %v4289_v31, %v4289_v31  ;;  %4396 = sbr.rel (!%p5628_p7) target bundleno = 853 (0x355), region = 48  ;;  %v4549_v50 = vld [vmem:[%s5700_s26 + $0x58] sm:$0xff] (%p5628_p7) }
 0x337   : > { %4926 = vst.msk [vmem:[%s5700_s26 + $0xb5] sm:$0x1] %vm293_vm0, %v3816_v25  ;;  %4929 = vst.msk [vmem:[%s5700_s26 + $0x145] sm:$0x1] %vm293_vm0, %v3815_v54  ;;  %v4306_v23 = vcombine.high %v4296_v32, %v4296_v32  ;;  %v4307_v38 = vcombine.high %v4303_v33, %v4303_v33  ;;  %v4561_v57 = vld [vmem:[%s5700_s26 + $0x88] sm:$0xff] (%p5628_p7)  ;;  %v4611_v19 = vld [vmem:[%s5700_s26 + $0x150] sm:$0xff] (%p5628_p7) }
 0x338   : > { %4930 = vst.msk [vmem:[%s5700_s26 + $0x175] sm:$0x1] %vm293_vm0, %v3817_v34  ;;  %4947 = vst.msk [vmem:[%s5700_s26 + $0x27] sm:$0x1] %vm293_vm0, %v4282_v30  ;;  %v4585_v9 = vld [vmem:[%s5700_s26 + $0xe8] sm:$0xff] (%p5628_p7)  ;;  %v4613_v11 = vld [vmem:[%s5700_s26 + $0x158] sm:$0xff] (%p5628_p7) }
 0x339   : > { %4951 = vst.msk [vmem:[%s5700_s26 + $0xe7] sm:$0x1] %vm293_vm0, %v4289_v31  ;;  %4948 = vst.msk [vmem:[%s5700_s26 + $0x57] sm:$0x1] %vm293_vm0, %v4296_v32  ;;  %v4573_v55 = vld [vmem:[%s5700_s26 + $0xb8] sm:$0xff] (%p5628_p7)  ;;  %v4615_v20 = vld [vmem:[%s5700_s26 + $0x160] sm:$0xff] (%p5628_p7) }
 0x33a   : > { %4949 = vst.msk [vmem:[%s5700_s26 + $0x87] sm:$0x1] %vm293_vm0, %v4304_v36  ;;  %4952 = vst.msk [vmem:[%s5700_s26 + $0x117] sm:$0x1] %vm293_vm0, %v4303_v33  ;;  %v4597_v15 = vld [vmem:[%s5700_s26 + $0x118] sm:$0xff] (%p5628_p7)  ;;  %v4609_v45 = vld [vmem:[%s5700_s26 + $0x148] sm:$0xff] (%p5628_p7) }
 0x33b   : > { %4953 = vst.msk [vmem:[%s5700_s26 + $0x147] sm:$0x1] %vm293_vm0, %v4305_v37  ;;  %4950 = vst.msk [vmem:[%s5700_s26 + $0xb7] sm:$0x1] %vm293_vm0, %v4306_v23  ;;  %v4617_v26 = vld [vmem:[%s5700_s26 + $0x168] sm:$0xff] (%p5628_p7) }
 0x33c   : > { %4954 = vst.msk [vmem:[%s5700_s26 + $0x177] sm:$0x1] %vm293_vm0, %v4307_v38  ;;  %4528 = vst [vmem:[%s6822_s10] sm:$0xff] (%p5628_p7), %v4527_v24  ;;  %v4621_v3 = vld [vmem:[%s5700_s26 + $0x178] sm:$0xff] (%p5628_p7) }
 0x33d   : > { %4530 = vst [vmem:[%s6822_s10 + $0x8] sm:$0xff] %v4529_v39  ;;  %4532 = vst [vmem:[%s6822_s10 + $0x10] sm:$0xff] %v4531_v40 }
 0x33e   : > { %4534 = vst [vmem:[%s6822_s10 + $0x18] sm:$0xff] %v4533_v41  ;;  %4538 = vst [vmem:[%s6822_s10 + $0x28] sm:$0xff] %v4537_v43 }
 0x33f   : > { %v4535_v42 = vld [vmem:[%s5700_s26 + $0x20] sm:$0xff]  ;;  %4540 = vst [vmem:[%s6822_s10 + $0xc0] sm:$0xff] %v4539_v44  ;;  %4542 = vst [vmem:[%s6822_s10 + $0xc8] sm:$0xff] %v4541_v47 }
 0x340   : > { %v4547_v49 = vld [vmem:[%s5700_s26 + $0x50] sm:$0xff]  ;;  %4536 = vst [vmem:[%s6822_s10 + $0x20] sm:$0xff] %v4535_v42  ;;  %4544 = vst [vmem:[%s6822_s10 + $0xd0] sm:$0xff] %v4543_v48  ;;  %v4583_v8 = vld [vmem:[%s5700_s26 + $0xe0] sm:$0xff] }
 0x341   : > { %v4559_v28 = vld [vmem:[%s5700_s26 + $0x80] sm:$0xff]  ;;  %4546 = vst [vmem:[%s6822_s10 + $0xd8] sm:$0xff] %v4545_v21  ;;  %4548 = vst [vmem:[%s6822_s10 + $0xe0] sm:$0xff] %v4547_v49  ;;  %v4595_v14 = vld [vmem:[%s5700_s26 + $0x110] sm:$0xff] }
 0x342   : > { %4550 = vst [vmem:[%s6822_s10 + $0xe8] sm:$0xff] %v4549_v50  ;;  %4552 = vst [vmem:[%s6822_s10 + $0x180] sm:$0xff] %v4551_v51  ;;  %v4571_v1 = vld [vmem:[%s5700_s26 + $0xb0] sm:$0xff]  ;;  %v4607_v18 = vld [vmem:[%s5700_s26 + $0x140] sm:$0xff] }
 0x343   : > { %4554 = vst [vmem:[%s6822_s10 + $0x188] sm:$0xff] %v4553_v52  ;;  %4556 = vst [vmem:[%s6822_s10 + $0x190] sm:$0xff] %v4555_v22  ;;  %v4619_v35 = vld [vmem:[%s5700_s26 + $0x170] sm:$0xff] }
 0x344   : > { %4558 = vst [vmem:[%s6822_s10 + $0x198] sm:$0xff] %v4557_v56  ;;  %4560 = vst [vmem:[%s6822_s10 + $0x1a0] sm:$0xff] %v4559_v28 }
 0x345   : > { %4562 = vst [vmem:[%s6822_s10 + $0x1a8] sm:$0xff] %v4561_v57  ;;  %4564 = vst [vmem:[%s6822_s10 + $0x240] sm:$0xff] %v4563_v58 }
 0x346   : > { %4566 = vst [vmem:[%s6822_s10 + $0x248] sm:$0xff] %v4565_v59  ;;  %4568 = vst [vmem:[%s6822_s10 + $0x250] sm:$0xff] %v4567_v0 }
 0x347   : > { %4570 = vst [vmem:[%s6822_s10 + $0x258] sm:$0xff] %v4569_v29  ;;  %4572 = vst [vmem:[%s6822_s10 + $0x260] sm:$0xff] %v4571_v1 }
 0x348   : > { %4574 = vst [vmem:[%s6822_s10 + $0x268] sm:$0xff] %v4573_v55  ;;  %4576 = vst [vmem:[%s6822_s10 + $0x300] sm:$0xff] %v4575_v4 }
 0x349   : > { %4578 = vst [vmem:[%s6822_s10 + $0x308] sm:$0xff] %v4577_v5  ;;  %4580 = vst [vmem:[%s6822_s10 + $0x310] sm:$0xff] %v4579_v6 }
 0x34a   : > { %4582 = vst [vmem:[%s6822_s10 + $0x318] sm:$0xff] %v4581_v7  ;;  %4584 = vst [vmem:[%s6822_s10 + $0x320] sm:$0xff] %v4583_v8 }
 0x34b   : > { %4586 = vst [vmem:[%s6822_s10 + $0x328] sm:$0xff] %v4585_v9  ;;  %4588 = vst [vmem:[%s6822_s10 + $0x3c0] sm:$0xff] %v4587_v12 }
 0x34c   : > { %4590 = vst [vmem:[%s6822_s10 + $0x3c8] sm:$0xff] %v4589_v10  ;;  %4592 = vst [vmem:[%s6822_s10 + $0x3d0] sm:$0xff] %v4591_v62 }
 0x34d   : > { %4594 = vst [vmem:[%s6822_s10 + $0x3d8] sm:$0xff] %v4593_v13  ;;  %4596 = vst [vmem:[%s6822_s10 + $0x3e0] sm:$0xff] %v4595_v14 }
 0x34e   : > { %4598 = vst [vmem:[%s6822_s10 + $0x3e8] sm:$0xff] %v4597_v15  ;;  %4600 = vst [vmem:[%s6822_s10 + $0x480] sm:$0xff] %v4599_v2 }
 0x34f   : > { %4602 = vst [vmem:[%s6822_s10 + $0x488] sm:$0xff] %v4601_v63  ;;  %4604 = vst [vmem:[%s6822_s10 + $0x490] sm:$0xff] %v4603_v16 }
 0x350   : > { %4606 = vst [vmem:[%s6822_s10 + $0x498] sm:$0xff] %v4605_v17  ;;  %4608 = vst [vmem:[%s6822_s10 + $0x4a0] sm:$0xff] %v4607_v18 }
 0x351   : > { %4610 = vst [vmem:[%s6822_s10 + $0x4a8] sm:$0xff] %v4609_v45  ;;  %4612 = vst [vmem:[%s6822_s10 + $0x540] sm:$0xff] %v4611_v19 }
 0x352   : > { %4614 = vst [vmem:[%s6822_s10 + $0x548] sm:$0xff] %v4613_v11  ;;  %4616 = vst [vmem:[%s6822_s10 + $0x550] sm:$0xff] %v4615_v20 }
 0x353   : > { %4618 = vst [vmem:[%s6822_s10 + $0x558] sm:$0xff] %v4617_v26  ;;  %4620 = vst [vmem:[%s6822_s10 + $0x560] sm:$0xff] %v4619_v35 }
 0x354   : > { %4622 = vst [vmem:[%s6822_s10 + $0x568] sm:$0xff] %v4621_v3 }
 0x355 PF: > { %s18_s22 = sadd.s32 1, %s5493_s22   ;;  %s6954_s11 = smov %s5645_s15 }
 0x356   : > { %p15_p7 = scmp.ge.s32.totalorder %s18_s22, 10   ;;  %s6955_s12 = sld [smem:[#allocation10_spill]] }
 0x357   : > { %s6956_s15 = smov %s5469_s16  ;;  %s6957_s16 = smov %s5473_s17 }
 0x358   : > { %s6958_s17 = smov %s6954_s11  ;;  %s6959_s18 = smov %s5485_s20 }
 0x359   : > { %s6960_s19 = smov %s5489_s21  ;;  %s6962_s21 = smov %s6968_s30 }
 0x35a   :  { %17 = sbr.rel (!%p15_p7) target bundleno = 9 (0x9), region = 125 }
 0x35c   : > { %s6961_s20 = smov %s6955_s12 }
 0x361   :  { %4638 = vsyncpa [#allocation4], 1 }
 0x362   :  { %4640 = vsyncpa [#allocation4 + $0x1], 1 }
 0x363   :  { %4641 = vsyncpa [#allocation6], 1 }

</bundles_post_ra>
